<compile_context>
chip_gen: v6e
topology: v6e:2x2x1
jax: 0.10.0
libtpu: 0.0.40
codegen_flags: <defaults>
</compile_context>

<pallas_src>
import jax
import jax.numpy as jnp
from jax.experimental import pallas as pl
from jax.experimental.pallas import tpu as pltpu

LANE = 128


def _round_up(x, m):
    return (x + m - 1) // m * m


def basic_block_kernel(x_ref,
                       w1_ref, b1_ref, a1_ref,
                       w2_ref, b2_ref, a2_ref,
                       w3_ref, b3_ref, a3_ref,
                       o_ref):
    """Fused fcn1->PReLU->fcn2->PReLU->fcn3->PReLU + residual (x1) block.

    Matmuls run on the MXU in the weights' dtype (bf16 or f32); bias add,
    PReLU and the residual add stay in f32.  Biases / slopes are (1, C) rows
    read once per grid step and broadcast over the row tile (do NOT refactor
    into an inner per-chunk loop without hoisting these broadcasts).
    """
    mxu_dtype = w1_ref.dtype
    x = x_ref[...].astype(mxu_dtype)   # no-op when x is already mxu_dtype

    # fcn1 + PReLU(out_feature)
    h1 = jnp.dot(x, w1_ref[...], preferred_element_type=jnp.float32) + b1_ref[...]
    x1 = jnp.where(h1 > 0, h1, a1_ref[...] * h1)

    # fcn2 + PReLU(hidden)
    h2 = jnp.dot(x1.astype(mxu_dtype), w2_ref[...],
                 preferred_element_type=jnp.float32) + b2_ref[...]
    x2 = jnp.where(h2 > 0, h2, a2_ref[...] * h2)

    # fcn3 + PReLU(out_feature)
    h3 = jnp.dot(x2.astype(mxu_dtype), w3_ref[...],
                 preferred_element_type=jnp.float32) + b3_ref[...]
    x3 = jnp.where(h3 > 0, h3, a3_ref[...] * h3)

    # TODO(synk): nn.Dropout(0.9) is treated as identity (eval-mode semantics);
    # training-mode masking would use pltpu.prng_seed/prng_random_bits + 1/(1-p).
    o_ref[...] = (x3 + x1).astype(o_ref.dtype)


def _basic_block_impl(x2d, params, *, tm, mxu_dtype, out_dtype, force_lane_pad):
    N, in_f = x2d.shape
    w1, b1, a1 = params["w1"], params["b1"], params["a1"]
    w2, b2, a2 = params["w2"], params["b2"], params["a2"]
    w3, b3, a3 = params["w3"], params["b3"], params["a3"]
    hidden = w2.shape[1]
    out_f = w1.shape[1]

    # Lane-dense padding only pays once a dim spans full 128-lane vregs; below
    # that, the pad + post-kernel slice HBM passes cost more than masked stores.
    def padded(d):
        return _round_up(d, LANE) if (force_lane_pad or d >= LANE) else d

    # x is never padded in the primary path (full-extent last-dim block), so no
    # padded-x slab is ever materialized in HBM.
    in_p = _round_up(in_f, LANE) if force_lane_pad else in_f
    h_p = padded(hidden)
    out_p = padded(out_f)

    def pad2(a, rows, cols, dtype=None):
        a = jnp.pad(a, ((0, rows - a.shape[0]), (0, cols - a.shape[1])))
        return a if dtype is None else a.astype(dtype)

    # Fallback path fuses the f32->bf16 cast into the pad of x (single pass);
    # primary path streams x as-is and casts the (tm, in_f) tile in-kernel.
    xp = x2d if in_p == in_f else pad2(x2d, N, in_p, mxu_dtype)
    w1p = pad2(w1, in_p, out_p, mxu_dtype)
    w2p = pad2(w2, out_p, h_p, mxu_dtype)
    w3p = pad2(w3, h_p, out_p, mxu_dtype)
    b1p, a1p = pad2(b1, 1, out_p), pad2(a1, 1, out_p)
    b2p, a2p = pad2(b2, 1, h_p), pad2(a2, 1, h_p)
    b3p, a3p = pad2(b3, 1, out_p), pad2(a3, 1, out_p)

    # Row-tile selection: large tiles amortize the ~0.35us per-grid-step
    # overhead, but keep >= 4 grid steps so v7x megacore (2 TCs) gets >= 2
    # steps per core and the pipeline can hide the x/out DMA behind compute.
    if N <= 32:
        tm = N                                   # single full-extent block
    else:
        tm = min(tm, max(8, (N // 4) // 8 * 8))  # >= 4 steps, multiple of 8
        tm = max(8, (tm // 8) * 8)

    grid = (pl.cdiv(N, tm),)
    rows = lambda i: (i, 0)   # row-tiled operands (activations / output)
    rep = lambda i: (0, 0)    # replicated operands: block index never changes,
                              # so their HBM->VMEM DMA is elided after step 0.

    flops = 2 * N * (in_f * out_f + out_f * hidden + hidden * out_f)
    bytes_accessed = int(
        xp.size * xp.dtype.itemsize
        + sum(int(a.size) * a.dtype.itemsize
              for a in (w1p, b1p, a1p, w2p, b2p, a2p, w3p, b3p, a3p))
        + N * out_p * jnp.dtype(out_dtype).itemsize)

    y = pl.pallas_call(
        basic_block_kernel,
        out_shape=jax.ShapeDtypeStruct((N, out_p), out_dtype),
        grid=grid,
        in_specs=[
            pl.BlockSpec((tm, in_p), rows),
            pl.BlockSpec((in_p, out_p), rep),
            pl.BlockSpec((1, out_p), rep),
            pl.BlockSpec((1, out_p), rep),
            pl.BlockSpec((out_p, h_p), rep),
            pl.BlockSpec((1, h_p), rep),
            pl.BlockSpec((1, h_p), rep),
            pl.BlockSpec((h_p, out_p), rep),
            pl.BlockSpec((1, out_p), rep),
            pl.BlockSpec((1, out_p), rep),
        ],
        out_specs=pl.BlockSpec((tm, out_p), rows),
        compiler_params=pltpu.CompilerParams(
            dimension_semantics=("parallel",)),
        cost_estimate=pl.CostEstimate(
            flops=flops, transcendentals=0, bytes_accessed=bytes_accessed),
    )(xp, w1p, b1p, a1p, w2p, b2p, a2p, w3p, b3p, a3p)

    if out_p != out_f:
        y = y[:, :out_f]
    return y


def basic_block(x, params, *, tm=1024, mxu_dtype=jnp.bfloat16,
                out_dtype=jnp.float32):
    """x: (..., in_feature) float32.  Returns (..., out_feature) out_dtype."""
    *lead, in_f = x.shape
    N = 1
    for d in lead:
        N *= d
    x2d = x.reshape(N, in_f)
    out_f = params["w1"].shape[1]

    try:
        # Primary: fully unpadded small feature dims (no pad / no slice passes).
        y = _basic_block_impl(x2d, params, tm=tm, mxu_dtype=mxu_dtype,
                              out_dtype=out_dtype, force_lane_pad=False)
    except Exception:
        # Mosaic rejected the small-K / small-lane dot on this backend: fall
        # back to the known-good lane-dense-128 layout (cast fused into pad).
        # NOTE: only effective when called eagerly (compile errors under jit
        # surface after tracing); this script runs the wrapper eagerly.
        y = _basic_block_impl(x2d, params, tm=tm, mxu_dtype=mxu_dtype,
                              out_dtype=out_dtype, force_lane_pad=True)
    return y.reshape(*lead, out_f)


def init_params(key, in_feature, hidden, out_feature):
    """Deterministic synthetic init (PyTorch-like shapes, stored transposed)."""
    k1, k2, k3, k4, k5, k6 = jax.random.split(key, 6)

    def lin(kw, kb, fan_in, fan_out):
        bound = 1.0 / jnp.sqrt(fan_in)
        w = jax.random.uniform(kw, (fan_in, fan_out), jnp.float32, -bound, bound)
        b = jax.random.uniform(kb, (1, fan_out), jnp.float32, -bound, bound)
        return w, b

    w1, b1 = lin(k1, k2, in_feature, out_feature)
    w2, b2 = lin(k3, k4, out_feature, hidden)
    w3, b3 = lin(k5, k6, hidden, out_feature)
    # PyTorch PReLU default slope = 0.25 per channel.
    a1 = jnp.full((1, out_feature), 0.25, jnp.float32)
    a2 = jnp.full((1, hidden), 0.25, jnp.float32)
    a3 = jnp.full((1, out_feature), 0.25, jnp.float32)
    return dict(w1=w1, b1=b1, a1=a1, w2=w2, b2=b2, a2=a2, w3=w3, b3=b3, a3=a3)


def reference(x, p, mxu_dtype=jnp.float32):
    """Pure-JAX reference with the same matmul-input dtype as the kernel."""
    *lead, in_f = x.shape
    xr = x.reshape(-1, in_f)

    def lin(h, w, b):
        return jnp.dot(h.astype(mxu_dtype), w.astype(mxu_dtype),
                       preferred_element_type=jnp.float32) + b

    prelu = lambda h, a: jnp.where(h > 0, h, a * h)
    x1 = prelu(lin(xr, p["w1"], p["b1"]), p["a1"])
    x2 = prelu(lin(x1, p["w2"], p["b2"]), p["a2"])
    x3 = prelu(lin(x2, p["w3"], p["b3"]), p["a3"])
    out = x3 + x1
    return out.reshape(*lead, p["w1"].shape[1])


if __name__ == "__main__":
    in_feature, hidden, out_feature = 16, 32, 16
    lead_shape = (8, 8, 16)          # N = 1024 rows -> 4 grid steps at tm cap

    key = jax.random.PRNGKey(0)
    kx, kp = jax.random.split(key)
    x = jax.random.normal(kx, lead_shape + (in_feature,), jnp.float32)
    params = init_params(kp, in_feature, hidden, out_feature)

    # Exact-semantics f32 path (matches the PyTorch module numerics).
    out_f32 = jax.block_until_ready(
        basic_block(x, params, mxu_dtype=jnp.float32))
    ref_f32 = reference(x, params, jnp.float32)
    assert out_f32.shape == lead_shape + (out_feature,)
    assert jnp.allclose(out_f32, ref_f32, atol=1e-4, rtol=1e-4), "f32 mismatch"

    # bf16-MXU fast path (default; valid on v5e/v6e/v7x, epilogue stays f32).
    out_bf16 = jax.block_until_ready(
        basic_block(x, params, mxu_dtype=jnp.bfloat16))
    ref_bf16 = reference(x, params, jnp.bfloat16)
    assert jnp.allclose(out_bf16, ref_bf16, atol=2e-2, rtol=2e-2), "bf16 mismatch"

    print("KERNEL_OK")
</pallas_src>

<mosaic_0001>
module attributes {stable_mosaic.version = 11 : i64} {
  func.func @basic_block_kernel(%arg0: i32, %arg1: memref<256x16xf32, #tpu.memory_space<vmem>>, %arg2: memref<16x16xf32, #tpu.memory_space<vmem>>, %arg3: memref<1x16xf32, #tpu.memory_space<vmem>>, %arg4: memref<1x16xf32, #tpu.memory_space<vmem>>, %arg5: memref<16x32xf32, #tpu.memory_space<vmem>>, %arg6: memref<1x32xf32, #tpu.memory_space<vmem>>, %arg7: memref<1x32xf32, #tpu.memory_space<vmem>>, %arg8: memref<32x16xf32, #tpu.memory_space<vmem>>, %arg9: memref<1x16xf32, #tpu.memory_space<vmem>>, %arg10: memref<1x16xf32, #tpu.memory_space<vmem>>, %arg11: memref<256x16xf32, #tpu.memory_space<vmem>>) attributes {dimension_semantics = [#tpu.dimension_semantics<parallel>], iteration_bounds = array<i64: 4>, scalar_prefetch = 0 : i64, scratch_operands = 0 : i64, tpu.core_type = #tpu.core_type<tc>, window_params = [{transform_indices = @transform_0, window_bounds = array<i64: 256, 16>}, {pipeline_mode = #tpu.pipeline_mode<synchronous>, transform_indices = @transform_1, window_bounds = array<i64: 16, 16>}, {pipeline_mode = #tpu.pipeline_mode<synchronous>, transform_indices = @transform_2, window_bounds = array<i64: 1, 16>}, {pipeline_mode = #tpu.pipeline_mode<synchronous>, transform_indices = @transform_3, window_bounds = array<i64: 1, 16>}, {pipeline_mode = #tpu.pipeline_mode<synchronous>, transform_indices = @transform_4, window_bounds = array<i64: 16, 32>}, {pipeline_mode = #tpu.pipeline_mode<synchronous>, transform_indices = @transform_5, window_bounds = array<i64: 1, 32>}, {pipeline_mode = #tpu.pipeline_mode<synchronous>, transform_indices = @transform_6, window_bounds = array<i64: 1, 32>}, {pipeline_mode = #tpu.pipeline_mode<synchronous>, transform_indices = @transform_7, window_bounds = array<i64: 32, 16>}, {pipeline_mode = #tpu.pipeline_mode<synchronous>, transform_indices = @transform_8, window_bounds = array<i64: 1, 16>}, {pipeline_mode = #tpu.pipeline_mode<synchronous>, transform_indices = @transform_9, window_bounds = array<i64: 1, 16>}, {transform_indices = @transform_10, window_bounds = array<i64: 256, 16>}]} {
    %c0 = arith.constant 0 : index
    %c0_0 = arith.constant 0 : index
    %0 = vector.load %arg1[%c0, %c0_0] : memref<256x16xf32, #tpu.memory_space<vmem>>, vector<256x16xf32>
    %c0_1 = arith.constant 0 : index
    %c0_2 = arith.constant 0 : index
    %1 = vector.load %arg2[%c0_1, %c0_2] : memref<16x16xf32, #tpu.memory_space<vmem>>, vector<16x16xf32>
    %cst = arith.constant dense<0.000000e+00> : vector<256x16xf32>
    %2 = tpu.matmul %0, %1, %cst {dimension_numbers = #tpu.dot_dimension_numbers<[1], [0], [0], [1], [0, 0, 1, 1], [], []>} : vector<256x16xf32>, vector<16x16xf32>, vector<256x16xf32> -> vector<256x16xf32>
    %c0_3 = arith.constant 0 : index
    %c0_4 = arith.constant 0 : index
    %3 = vector.load %arg3[%c0_3, %c0_4] : memref<1x16xf32, #tpu.memory_space<vmem>>, vector<1x16xf32>
    %4 = vector.broadcast %3 : vector<1x16xf32> to vector<256x16xf32>
    %5 = arith.addf %2, %4 : vector<256x16xf32>
    %cst_5 = arith.constant 0.000000e+00 : f32
    %6 = vector.broadcast %cst_5 : f32 to vector<256x16xf32>
    %7 = arith.cmpf ogt, %5, %6 : vector<256x16xf32>
    %c0_6 = arith.constant 0 : index
    %c0_7 = arith.constant 0 : index
    %8 = vector.load %arg4[%c0_6, %c0_7] : memref<1x16xf32, #tpu.memory_space<vmem>>, vector<1x16xf32>
    %9 = vector.broadcast %8 : vector<1x16xf32> to vector<256x16xf32>
    %10 = arith.mulf %9, %5 : vector<256x16xf32>
    %11 = arith.select %7, %5, %10 : vector<256x16xi1>, vector<256x16xf32>
    %c0_8 = arith.constant 0 : index
    %c0_9 = arith.constant 0 : index
    %12 = vector.load %arg5[%c0_8, %c0_9] : memref<16x32xf32, #tpu.memory_space<vmem>>, vector<16x32xf32>
    %cst_10 = arith.constant dense<0.000000e+00> : vector<256x32xf32>
    %13 = tpu.matmul %11, %12, %cst_10 {dimension_numbers = #tpu.dot_dimension_numbers<[1], [0], [0], [1], [0, 0, 1, 1], [], []>} : vector<256x16xf32>, vector<16x32xf32>, vector<256x32xf32> -> vector<256x32xf32>
    %c0_11 = arith.constant 0 : index
    %c0_12 = arith.constant 0 : index
    %14 = vector.load %arg6[%c0_11, %c0_12] : memref<1x32xf32, #tpu.memory_space<vmem>>, vector<1x32xf32>
    %15 = vector.broadcast %14 : vector<1x32xf32> to vector<256x32xf32>
    %16 = arith.addf %13, %15 : vector<256x32xf32>
    %cst_13 = arith.constant 0.000000e+00 : f32
    %17 = vector.broadcast %cst_13 : f32 to vector<256x32xf32>
    %18 = arith.cmpf ogt, %16, %17 : vector<256x32xf32>
    %c0_14 = arith.constant 0 : index
    %c0_15 = arith.constant 0 : index
    %19 = vector.load %arg7[%c0_14, %c0_15] : memref<1x32xf32, #tpu.memory_space<vmem>>, vector<1x32xf32>
    %20 = vector.broadcast %19 : vector<1x32xf32> to vector<256x32xf32>
    %21 = arith.mulf %20, %16 : vector<256x32xf32>
    %22 = arith.select %18, %16, %21 : vector<256x32xi1>, vector<256x32xf32>
    %c0_16 = arith.constant 0 : index
    %c0_17 = arith.constant 0 : index
    %23 = vector.load %arg8[%c0_16, %c0_17] : memref<32x16xf32, #tpu.memory_space<vmem>>, vector<32x16xf32>
    %cst_18 = arith.constant dense<0.000000e+00> : vector<256x16xf32>
    %24 = tpu.matmul %22, %23, %cst_18 {dimension_numbers = #tpu.dot_dimension_numbers<[1], [0], [0], [1], [0, 0, 1, 1], [], []>} : vector<256x32xf32>, vector<32x16xf32>, vector<256x16xf32> -> vector<256x16xf32>
    %c0_19 = arith.constant 0 : index
    %c0_20 = arith.constant 0 : index
    %25 = vector.load %arg9[%c0_19, %c0_20] : memref<1x16xf32, #tpu.memory_space<vmem>>, vector<1x16xf32>
    %26 = vector.broadcast %25 : vector<1x16xf32> to vector<256x16xf32>
    %27 = arith.addf %24, %26 : vector<256x16xf32>
    %cst_21 = arith.constant 0.000000e+00 : f32
    %28 = vector.broadcast %cst_21 : f32 to vector<256x16xf32>
    %29 = arith.cmpf ogt, %27, %28 : vector<256x16xf32>
    %c0_22 = arith.constant 0 : index
    %c0_23 = arith.constant 0 : index
    %30 = vector.load %arg10[%c0_22, %c0_23] : memref<1x16xf32, #tpu.memory_space<vmem>>, vector<1x16xf32>
    %31 = vector.broadcast %30 : vector<1x16xf32> to vector<256x16xf32>
    %32 = arith.mulf %31, %27 : vector<256x16xf32>
    %33 = arith.select %29, %27, %32 : vector<256x16xi1>, vector<256x16xf32>
    %34 = arith.addf %33, %11 : vector<256x16xf32>
    %c0_24 = arith.constant 0 : index
    %c0_25 = arith.constant 0 : index
    %35 = vector.load %arg11[%c0_24, %c0_25] : memref<256x16xf32, #tpu.memory_space<vmem>>, vector<256x16xf32>
    tpu.vector_store %arg11[%c0_24, %c0_25], %34 {strides = array<i32>} : memref<256x16xf32, #tpu.memory_space<vmem>>, vector<256x16xf32>,
    return
  }
  func.func @transform_0(%arg0: i32) -> (i32, i32) {
    %c0_i32 = arith.constant 0 : i32
    %c0_i32_0 = arith.constant 0 : i32
    return %arg0, %c0_i32 : i32, i32
  }
  func.func @transform_1(%arg0: i32) -> (i32, i32) {
    %c0_i32 = arith.constant 0 : i32
    %c0_i32_0 = arith.constant 0 : i32
    %c0_i32_1 = arith.constant 0 : i32
    return %c0_i32, %c0_i32_0 : i32, i32
  }
  func.func @transform_2(%arg0: i32) -> (i32, i32) {
    %c0_i32 = arith.constant 0 : i32
    %c0_i32_0 = arith.constant 0 : i32
    %c0_i32_1 = arith.constant 0 : i32
    return %c0_i32, %c0_i32_0 : i32, i32
  }
  func.func @transform_3(%arg0: i32) -> (i32, i32) {
    %c0_i32 = arith.constant 0 : i32
    %c0_i32_0 = arith.constant 0 : i32
    %c0_i32_1 = arith.constant 0 : i32
    return %c0_i32, %c0_i32_0 : i32, i32
  }
  func.func @transform_4(%arg0: i32) -> (i32, i32) {
    %c0_i32 = arith.constant 0 : i32
    %c0_i32_0 = arith.constant 0 : i32
    %c0_i32_1 = arith.constant 0 : i32
    return %c0_i32, %c0_i32_0 : i32, i32
  }
  func.func @transform_5(%arg0: i32) -> (i32, i32) {
    %c0_i32 = arith.constant 0 : i32
    %c0_i32_0 = arith.constant 0 : i32
    %c0_i32_1 = arith.constant 0 : i32
    return %c0_i32, %c0_i32_0 : i32, i32
  }
  func.func @transform_6(%arg0: i32) -> (i32, i32) {
    %c0_i32 = arith.constant 0 : i32
    %c0_i32_0 = arith.constant 0 : i32
    %c0_i32_1 = arith.constant 0 : i32
    return %c0_i32, %c0_i32_0 : i32, i32
  }
  func.func @transform_7(%arg0: i32) -> (i32, i32) {
    %c0_i32 = arith.constant 0 : i32
    %c0_i32_0 = arith.constant 0 : i32
    %c0_i32_1 = arith.constant 0 : i32
    return %c0_i32, %c0_i32_0 : i32, i32
  }
  func.func @transform_8(%arg0: i32) -> (i32, i32) {
    %c0_i32 = arith.constant 0 : i32
    %c0_i32_0 = arith.constant 0 : i32
    %c0_i32_1 = arith.constant 0 : i32
    return %c0_i32, %c0_i32_0 : i32, i32
  }
  func.func @transform_9(%arg0: i32) -> (i32, i32) {
    %c0_i32 = arith.constant 0 : i32
    %c0_i32_0 = arith.constant 0 : i32
    %c0_i32_1 = arith.constant 0 : i32
    return %c0_i32, %c0_i32_0 : i32, i32
  }
  func.func @transform_10(%arg0: i32) -> (i32, i32) {
    %c0_i32 = arith.constant 0 : i32
    %c0_i32_0 = arith.constant 0 : i32
    return %arg0, %c0_i32 : i32, i32
  }
}

module attributes {stable_mosaic.version = 11 : i64} {
  func.func @basic_block_kernel(%arg0: i32, %arg1: memref<256x128xf32, #tpu.memory_space<vmem>>, %arg2: memref<128x128xf32, #tpu.memory_space<vmem>>, %arg3: memref<1x128xf32, #tpu.memory_space<vmem>>, %arg4: memref<1x128xf32, #tpu.memory_space<vmem>>, %arg5: memref<128x128xf32, #tpu.memory_space<vmem>>, %arg6: memref<1x128xf32, #tpu.memory_space<vmem>>, %arg7: memref<1x128xf32, #tpu.memory_space<vmem>>, %arg8: memref<128x128xf32, #tpu.memory_space<vmem>>, %arg9: memref<1x128xf32, #tpu.memory_space<vmem>>, %arg10: memref<1x128xf32, #tpu.memory_space<vmem>>, %arg11: memref<256x128xf32, #tpu.memory_space<vmem>>) attributes {dimension_semantics = [#tpu.dimension_semantics<parallel>], iteration_bounds = array<i64: 4>, scalar_prefetch = 0 : i64, scratch_operands = 0 : i64, tpu.core_type = #tpu.core_type<tc>, window_params = [{transform_indices = @transform_0, window_bounds = array<i64: 256, 128>}, {pipeline_mode = #tpu.pipeline_mode<synchronous>, transform_indices = @transform_1, window_bounds = array<i64: 128, 128>}, {pipeline_mode = #tpu.pipeline_mode<synchronous>, transform_indices = @transform_2, window_bounds = array<i64: 1, 128>}, {pipeline_mode = #tpu.pipeline_mode<synchronous>, transform_indices = @transform_3, window_bounds = array<i64: 1, 128>}, {pipeline_mode = #tpu.pipeline_mode<synchronous>, transform_indices = @transform_4, window_bounds = array<i64: 128, 128>}, {pipeline_mode = #tpu.pipeline_mode<synchronous>, transform_indices = @transform_5, window_bounds = array<i64: 1, 128>}, {pipeline_mode = #tpu.pipeline_mode<synchronous>, transform_indices = @transform_6, window_bounds = array<i64: 1, 128>}, {pipeline_mode = #tpu.pipeline_mode<synchronous>, transform_indices = @transform_7, window_bounds = array<i64: 128, 128>}, {pipeline_mode = #tpu.pipeline_mode<synchronous>, transform_indices = @transform_8, window_bounds = array<i64: 1, 128>}, {pipeline_mode = #tpu.pipeline_mode<synchronous>, transform_indices = @transform_9, window_bounds = array<i64: 1, 128>}, {transform_indices = @transform_10, window_bounds = array<i64: 256, 128>}]} {
    %c0 = arith.constant 0 : index
    %c0_0 = arith.constant 0 : index
    %0 = vector.load %arg1[%c0, %c0_0] : memref<256x128xf32, #tpu.memory_space<vmem>>, vector<256x128xf32>
    %c0_1 = arith.constant 0 : index
    %c0_2 = arith.constant 0 : index
    %1 = vector.load %arg2[%c0_1, %c0_2] : memref<128x128xf32, #tpu.memory_space<vmem>>, vector<128x128xf32>
    %cst = arith.constant dense<0.000000e+00> : vector<256x128xf32>
    %2 = tpu.matmul %0, %1, %cst {dimension_numbers = #tpu.dot_dimension_numbers<[1], [0], [0], [1], [0, 0, 1, 1], [], []>} : vector<256x128xf32>, vector<128x128xf32>, vector<256x128xf32> -> vector<256x128xf32>
    %c0_3 = arith.constant 0 : index
    %c0_4 = arith.constant 0 : index
    %3 = vector.load %arg3[%c0_3, %c0_4] : memref<1x128xf32, #tpu.memory_space<vmem>>, vector<1x128xf32>
    %4 = vector.broadcast %3 : vector<1x128xf32> to vector<256x128xf32>
    %5 = arith.addf %2, %4 : vector<256x128xf32>
    %cst_5 = arith.constant 0.000000e+00 : f32
    %6 = vector.broadcast %cst_5 : f32 to vector<256x128xf32>
    %7 = arith.cmpf ogt, %5, %6 : vector<256x128xf32>
    %c0_6 = arith.constant 0 : index
    %c0_7 = arith.constant 0 : index
    %8 = vector.load %arg4[%c0_6, %c0_7] : memref<1x128xf32, #tpu.memory_space<vmem>>, vector<1x128xf32>
    %9 = vector.broadcast %8 : vector<1x128xf32> to vector<256x128xf32>
    %10 = arith.mulf %9, %5 : vector<256x128xf32>
    %11 = arith.select %7, %5, %10 : vector<256x128xi1>, vector<256x128xf32>
    %c0_8 = arith.constant 0 : index
    %c0_9 = arith.constant 0 : index
    %12 = vector.load %arg5[%c0_8, %c0_9] : memref<128x128xf32, #tpu.memory_space<vmem>>, vector<128x128xf32>
    %cst_10 = arith.constant dense<0.000000e+00> : vector<256x128xf32>
    %13 = tpu.matmul %11, %12, %cst_10 {dimension_numbers = #tpu.dot_dimension_numbers<[1], [0], [0], [1], [0, 0, 1, 1], [], []>} : vector<256x128xf32>, vector<128x128xf32>, vector<256x128xf32> -> vector<256x128xf32>
    %c0_11 = arith.constant 0 : index
    %c0_12 = arith.constant 0 : index
    %14 = vector.load %arg6[%c0_11, %c0_12] : memref<1x128xf32, #tpu.memory_space<vmem>>, vector<1x128xf32>
    %15 = vector.broadcast %14 : vector<1x128xf32> to vector<256x128xf32>
    %16 = arith.addf %13, %15 : vector<256x128xf32>
    %cst_13 = arith.constant 0.000000e+00 : f32
    %17 = vector.broadcast %cst_13 : f32 to vector<256x128xf32>
    %18 = arith.cmpf ogt, %16, %17 : vector<256x128xf32>
    %c0_14 = arith.constant 0 : index
    %c0_15 = arith.constant 0 : index
    %19 = vector.load %arg7[%c0_14, %c0_15] : memref<1x128xf32, #tpu.memory_space<vmem>>, vector<1x128xf32>
    %20 = vector.broadcast %19 : vector<1x128xf32> to vector<256x128xf32>
    %21 = arith.mulf %20, %16 : vector<256x128xf32>
    %22 = arith.select %18, %16, %21 : vector<256x128xi1>, vector<256x128xf32>
    %c0_16 = arith.constant 0 : index
    %c0_17 = arith.constant 0 : index
    %23 = vector.load %arg8[%c0_16, %c0_17] : memref<128x128xf32, #tpu.memory_space<vmem>>, vector<128x128xf32>
    %cst_18 = arith.constant dense<0.000000e+00> : vector<256x128xf32>
    %24 = tpu.matmul %22, %23, %cst_18 {dimension_numbers = #tpu.dot_dimension_numbers<[1], [0], [0], [1], [0, 0, 1, 1], [], []>} : vector<256x128xf32>, vector<128x128xf32>, vector<256x128xf32> -> vector<256x128xf32>
    %c0_19 = arith.constant 0 : index
    %c0_20 = arith.constant 0 : index
    %25 = vector.load %arg9[%c0_19, %c0_20] : memref<1x128xf32, #tpu.memory_space<vmem>>, vector<1x128xf32>
    %26 = vector.broadcast %25 : vector<1x128xf32> to vector<256x128xf32>
    %27 = arith.addf %24, %26 : vector<256x128xf32>
    %cst_21 = arith.constant 0.000000e+00 : f32
    %28 = vector.broadcast %cst_21 : f32 to vector<256x128xf32>
    %29 = arith.cmpf ogt, %27, %28 : vector<256x128xf32>
    %c0_22 = arith.constant 0 : index
    %c0_23 = arith.constant 0 : index
    %30 = vector.load %arg10[%c0_22, %c0_23] : memref<1x128xf32, #tpu.memory_space<vmem>>, vector<1x128xf32>
    %31 = vector.broadcast %30 : vector<1x128xf32> to vector<256x128xf32>
    %32 = arith.mulf %31, %27 : vector<256x128xf32>
    %33 = arith.select %29, %27, %32 : vector<256x128xi1>, vector<256x128xf32>
    %34 = arith.addf %33, %11 : vector<256x128xf32>
    %c0_24 = arith.constant 0 : index
    %c0_25 = arith.constant 0 : index
    %35 = vector.load %arg11[%c0_24, %c0_25] : memref<256x128xf32, #tpu.memory_space<vmem>>, vector<256x128xf32>
    tpu.vector_store %arg11[%c0_24, %c0_25], %34 {strides = array<i32>} : memref<256x128xf32, #tpu.memory_space<vmem>>, vector<256x128xf32>,
    return
  }
  func.func @transform_0(%arg0: i32) -> (i32, i32) {
    %c0_i32 = arith.constant 0 : i32
    %c0_i32_0 = arith.constant 0 : i32
    return %arg0, %c0_i32 : i32, i32
  }
  func.func @transform_1(%arg0: i32) -> (i32, i32) {
    %c0_i32 = arith.constant 0 : i32
    %c0_i32_0 = arith.constant 0 : i32
    %c0_i32_1 = arith.constant 0 : i32
    return %c0_i32, %c0_i32_0 : i32, i32
  }
  func.func @transform_2(%arg0: i32) -> (i32, i32) {
    %c0_i32 = arith.constant 0 : i32
    %c0_i32_0 = arith.constant 0 : i32
    %c0_i32_1 = arith.constant 0 : i32
    return %c0_i32, %c0_i32_0 : i32, i32
  }
  func.func @transform_3(%arg0: i32) -> (i32, i32) {
    %c0_i32 = arith.constant 0 : i32
    %c0_i32_0 = arith.constant 0 : i32
    %c0_i32_1 = arith.constant 0 : i32
    return %c0_i32, %c0_i32_0 : i32, i32
  }
  func.func @transform_4(%arg0: i32) -> (i32, i32) {
    %c0_i32 = arith.constant 0 : i32
    %c0_i32_0 = arith.constant 0 : i32
    %c0_i32_1 = arith.constant 0 : i32
    return %c0_i32, %c0_i32_0 : i32, i32
  }
  func.func @transform_5(%arg0: i32) -> (i32, i32) {
    %c0_i32 = arith.constant 0 : i32
    %c0_i32_0 = arith.constant 0 : i32
    %c0_i32_1 = arith.constant 0 : i32
    return %c0_i32, %c0_i32_0 : i32, i32
  }
  func.func @transform_6(%arg0: i32) -> (i32, i32) {
    %c0_i32 = arith.constant 0 : i32
    %c0_i32_0 = arith.constant 0 : i32
    %c0_i32_1 = arith.constant 0 : i32
    return %c0_i32, %c0_i32_0 : i32, i32
  }
  func.func @transform_7(%arg0: i32) -> (i32, i32) {
    %c0_i32 = arith.constant 0 : i32
    %c0_i32_0 = arith.constant 0 : i32
    %c0_i32_1 = arith.constant 0 : i32
    return %c0_i32, %c0_i32_0 : i32, i32
  }
  func.func @transform_8(%arg0: i32) -> (i32, i32) {
    %c0_i32 = arith.constant 0 : i32
    %c0_i32_0 = arith.constant 0 : i32
    %c0_i32_1 = arith.constant 0 : i32
    return %c0_i32, %c0_i32_0 : i32, i32
  }
  func.func @transform_9(%arg0: i32) -> (i32, i32) {
    %c0_i32 = arith.constant 0 : i32
    %c0_i32_0 = arith.constant 0 : i32
    %c0_i32_1 = arith.constant 0 : i32
    return %c0_i32, %c0_i32_0 : i32, i32
  }
  func.func @transform_10(%arg0: i32) -> (i32, i32) {
    %c0_i32 = arith.constant 0 : i32
    %c0_i32_0 = arith.constant 0 : i32
    return %arg0, %c0_i32 : i32, i32
  }
}

</mosaic_0001>

<bundles_post_ra>
// kernel: tpu_custom_call.1
= control target key start
LH: loop header
LB: loop body
LE: loop exit
PB: predicated region body
PF: predicated region fallthrough
CT: control target
= control target key end

     0   :  { %s2270_s13 = smov 0   ;;  %s2888_s0 = inlined_call_operand.vmem [shape: f32[1024,16], index: 0, kind: input, shape index: {}]   ;;  %s2889_s1 = inlined_call_operand.vmem [shape: f32[16,16], index: 1, kind: input, shape index: {}]   ;;  %s2890_s2 = inlined_call_operand.vmem [shape: f32[1,16], index: 2, kind: input, shape index: {}]   ;;  %s2891_s3 = inlined_call_operand.vmem [shape: f32[1,16], index: 3, kind: input, shape index: {}]   ;;  %s2892_s4 = inlined_call_operand.vmem [shape: f32[16,32], index: 4, kind: input, shape index: {}]   ;;  %s2893_s5 = inlined_call_operand.vmem [shape: f32[1,32], index: 5, kind: input, shape index: {}]   ;;  %s2894_s6 = inlined_call_operand.vmem [shape: f32[1,32], index: 6, kind: input, shape index: {}]   ;;  %s2895_s7 = inlined_call_operand.vmem [shape: f32[32,16], index: 7, kind: input, shape index: {}]   ;;  %s2896_s8 = inlined_call_operand.vmem [shape: f32[1,16], index: 8, kind: input, shape index: {}]   ;;  %s2897_s9 = inlined_call_operand.vmem [shape: f32[1,16], index: 9, kind: input, shape index: {}]   ;;  %s2898_s10 = inlined_call_operand.vmem [shape: f32[1024,16], index: 10, kind: output, shape index: {}]  }
   0x1 LB: > { %s1818_s14 = sadd.s32 4294967295, %s2213_s13   ;;  %p1822_p0 = scmp.ge.s32.totalorder %s2213_s13, 1  ;;  %s2213_s13 = sphi %s2270_s13, %s20_s13  }
   0x2   : > { %p313_p1 = scmp.lt.s32.totalorder %s2213_s13, 5 }
   0x4   : > { %p314_p2 = pnand %p1822_p0, %p313_p1 }
   0x5   : > { %s1823_s19 = sshll.u32 (!%p314_p2), %s1818_s14, 5 }
   0x6   : > { %317 = sbr.rel (%p314_p2) target bundleno = 682 (0x2aa), region = 60  ;;  %p352_p3 = scmp.lt.s32.totalorder (!%p314_p2), %s1823_s19, 127 }
   0xb   : > { %v396_v0 = vld [vmem:[%s2889_s1 + $0x8] sm:$0xff]  ;;  %v395_v1 = vld [vmem:[%s2889_s1] sm:$0xff]  ;;  %s2900_s19 = smov (!%p352_p3, %s1823_s19), 127  ;;  %vm404_vm0 = vcmask 130048   ;;  %v1265_v36 = vld [vmem:[%s2895_s7 + $0x18] sm:$0xff] }
   0xc   : > { %2035 = vmatprep.subr.mxu0 %v396_v0  ;;  %2195 = vmatprep.subr.mxu1 %v396_v0  ;;  %v830_v2 = vld [vmem:[%s2892_s4 + $0x8] sm:$0xff]  ;;  %s1824_s22 = sshll.u32 %s2900_s19, 3  ;;  %v829_v11 = vld [vmem:[%s2892_s4] sm:$0xff]  ;;  %v1264_v37 = vld [vmem:[%s2895_s7 + $0x10] sm:$0xff] }
   0xd   : > { %2036 = vmatpush3.msra.mxu0 %v396_v0  ;;  %2197 = vmatpush3.msra.mxu1 %v396_v0  ;;  %s2295_s25 = scalar_lea.vmem %s2888_s0, %s1824_s22  ;;  %v1263_v38 = vld [vmem:[%s2895_s7 + $0x8] sm:$0xff]  ;;  %v2376_v39 = vld [vmem:[%s2890_s2] ss:$0 sm:$0xff]  ;;  %s2726_s14 = scalar_lea.vmem %s2898_s10, %s1824_s22 }
   0xe   : > { %2037 = vmatprep.subr.mxu0 %v395_v1  ;;  %2196 = vmatprep.subr.mxu1 %v395_v1  ;;  %v363_v3 = vld [vmem:[%s2295_s25] sm:$0xff]  ;;  %v364_v4 = vld [vmem:[%s2295_s25 + $0x8] sm:$0xff]  ;;  %v365_v5 = vld [vmem:[%s2295_s25 + $0x10] sm:$0xff] }
   0xf   : > { %2038 = vmatpush3.msra.mxu0 %v395_v1  ;;  %2198 = vmatpush3.msra.mxu1 %v395_v1  ;;  %v366_v6 = vld [vmem:[%s2295_s25 + $0x18] sm:$0xff]  ;;  %v367_v7 = vld [vmem:[%s2295_s25 + $0x20] sm:$0xff]  ;;  %v380_v9 = vld [vmem:[%s2295_s25 + $0x88] sm:$0xff] }
  0x10   : > { %2087 = vmatprep.subr.mxu1 %v830_v2  ;;  %2039 = vmatprep.mubr.msk.f32.mxu0 %vm404_vm0, %v363_v3  ;;  %v379_v8 = vld [vmem:[%s2295_s25 + $0x80] sm:$0xff]  ;;  %v381_v10 = vld [vmem:[%s2295_s25 + $0x90] sm:$0xff]  ;;  %v368_v12 = vld [vmem:[%s2295_s25 + $0x28] sm:$0xff] }
  0x11   : > { %2040 = vmatmul.mubr.msk.f32.vlgmr.msra.gmra.mxu0 %vm404_vm0, %v364_v4  ;;  %2063 = vmatprep.mubr.msk.f32.mxu1 %vm404_vm0, %v379_v8  ;;  %v369_v13 = vld [vmem:[%s2295_s25 + $0x30] sm:$0xff]  ;;  %v382_v14 = vld [vmem:[%s2295_s25 + $0x98] sm:$0xff]  ;;  %v383_v15 = vld [vmem:[%s2295_s25 + $0xa0] sm:$0xff] }
  0x12   : > { %2042 = vmatprep.mubr.msk.f32.mxu0 %vm404_vm0, %v365_v5  ;;  %2064 = vmatmul.mubr.msk.f32.vlgmr.msra.gmra.mxu1 %vm404_vm0, %v380_v9  ;;  %v370_v16 = vld [vmem:[%s2295_s25 + $0x38] sm:$0xff]  ;;  %v371_v17 = vld [vmem:[%s2295_s25 + $0x40] sm:$0xff]  ;;  %v384_v18 = vld [vmem:[%s2295_s25 + $0xa8] sm:$0xff] }
  0x13   : > { %2066 = vmatprep.mubr.msk.f32.mxu1 %vm404_vm0, %v381_v10  ;;  %2088 = vmatpush3.msra.mxu1 %v830_v2  ;;  %v385_v19 = vld [vmem:[%s2295_s25 + $0xb0] sm:$0xff]  ;;  %v372_v20 = vld [vmem:[%s2295_s25 + $0x48] sm:$0xff]  ;;  %v386_v22 = vld [vmem:[%s2295_s25 + $0xb8] sm:$0xff] }
  0x14   : > { %2089 = vmatprep.subr.mxu1 %v829_v11  ;;  %v373_v21 = vld [vmem:[%s2295_s25 + $0x50] sm:$0xff]  ;;  %v387_v23 = vld [vmem:[%s2295_s25 + $0xc0] sm:$0xff]  ;;  %v374_v24 = vld [vmem:[%s2295_s25 + $0x58] sm:$0xff]  ;;  %2139 = vmatprep.subr.mxu0 %v1265_v36 }
  0x15   : > { %2043 = vmatmul.mubr.msk.f32.gmra.mxu0 %vm404_vm0, %v366_v6  ;;  %2090 = vmatpush3.msra.mxu1 %v829_v11  ;;  %v375_v25 = vld [vmem:[%s2295_s25 + $0x60] sm:$0xff]  ;;  %v388_v26 = vld [vmem:[%s2295_s25 + $0xc8] sm:$0xff]  ;;  %v389_v27 = vld [vmem:[%s2295_s25 + $0xd0] sm:$0xff] }
  0x16   : > { %2045 = vmatprep.mubr.msk.f32.mxu0 %vm404_vm0, %v367_v7  ;;  %2067 = vmatmul.mubr.msk.f32.gmra.mxu1 %vm404_vm0, %v382_v14  ;;  %v376_v28 = vld [vmem:[%s2295_s25 + $0x68] sm:$0xff]  ;;  %v377_v29 = vld [vmem:[%s2295_s25 + $0x70] sm:$0xff]  ;;  %v390_v30 = vld [vmem:[%s2295_s25 + $0xd8] sm:$0xff] }
  0x17   : > { %2069 = vmatprep.mubr.msk.f32.mxu1 %vm404_vm0, %v383_v15  ;;  %v391_v31 = vld [vmem:[%s2295_s25 + $0xe0] sm:$0xff]  ;;  %v378_v32 = vld [vmem:[%s2295_s25 + $0x78] sm:$0xff]  ;;  %v392_v33 = vld [vmem:[%s2295_s25 + $0xe8] sm:$0xff]  ;;  %2140 = vmatpush3.msra.mxu0 %v1265_v36 }
  0x18   : > { %v393_v34 = vld [vmem:[%s2295_s25 + $0xf0] sm:$0xff]  ;;  %v394_v35 = vld [vmem:[%s2295_s25 + $0xf8] sm:$0xff]  ;;  %2141 = vmatprep.subr.mxu0 %v1264_v37  ;;  %v2382_v42 = vld [vmem:[%s2891_s3] ss:$0 sm:$0xff] }
  0x19   : > { %2046 = vmatmul.mubr.msk.f32.gmra.mxu0 %vm404_vm0, %v368_v12 }
  0x1a   : > { %2048 = vmatprep.mubr.msk.f32.mxu0 %vm404_vm0, %v369_v13  ;;  %2070 = vmatmul.mubr.msk.f32.gmra.mxu1 %vm404_vm0, %v384_v18 }
  0x1b   : > { %2072 = vmatprep.mubr.msk.f32.mxu1 %vm404_vm0, %v385_v19  ;;  %2142 = vmatpush3.msra.mxu0 %v1264_v37 }
  0x1c   : > { %2143 = vmatprep.subr.mxu0 %v1263_v38 }
  0x1d   : > { %2049 = vmatmul.mubr.msk.f32.gmra.mxu0 %vm404_vm0, %v370_v16 }
  0x1e   : > { %2051 = vmatprep.mubr.msk.f32.mxu0 %vm404_vm0, %v371_v17  ;;  %2073 = vmatmul.mubr.msk.f32.gmra.mxu1 %vm404_vm0, %v386_v22 }
  0x1f   : > { %2075 = vmatprep.mubr.msk.f32.mxu1 %vm404_vm0, %v387_v23  ;;  %2144 = vmatpush3.msra.mxu0 %v1263_v38 }
  0x21   : > { %2052 = vmatmul.mubr.msk.f32.gmra.mxu0 %vm404_vm0, %v372_v20 }
  0x22   : > { %2054 = vmatprep.mubr.msk.f32.mxu0 %vm404_vm0, %v373_v21  ;;  %2076 = vmatmul.mubr.msk.f32.gmra.mxu1 %vm404_vm0, %v388_v26 }
  0x23   : > { %2078 = vmatprep.mubr.msk.f32.mxu1 %vm404_vm0, %v389_v27 }
  0x25   : > { %2055 = vmatmul.mubr.msk.f32.gmra.mxu0 %vm404_vm0, %v374_v24 }
  0x26   : > { %2057 = vmatprep.mubr.msk.f32.mxu0 %vm404_vm0, %v375_v25  ;;  %2079 = vmatmul.mubr.msk.f32.gmra.mxu1 %vm404_vm0, %v390_v30 }
  0x27   : > { %2081 = vmatprep.mubr.msk.f32.mxu1 %vm404_vm0, %v391_v31 }
  0x29   : > { %2058 = vmatmul.mubr.msk.f32.gmra.mxu0 %vm404_vm0, %v376_v28 }
  0x2a   : > { %2060 = vmatprep.mubr.msk.f32.mxu0 %vm404_vm0, %v377_v29  ;;  %2082 = vmatmul.mubr.msk.f32.gmra.mxu1 %vm404_vm0, %v392_v33 }
  0x2b   : > { %2084 = vmatprep.mubr.msk.f32.mxu1 %vm404_vm0, %v393_v34 }
  0x2d   : > { %2061 = vmatmul.mubr.msk.f32.gmra.mxu0 %vm404_vm0, %v378_v32 }
  0x2e   : > { %2085 = vmatmul.mubr.msk.f32.gmra.mxu1 %vm404_vm0, %v394_v35 }
  0xd1   : > { %v2041_v40 = vpop.f32.mrf.mxu0 }
  0xd2   : > { %v573_v41 = vadd.f32 %v2041_v40, %v2376_v39  ;;  %v2388_v49 = vpop.f32.mrf.mxu1 }
  0xd3   : > { %v567_v43 = vpop.f32.mrf.mxu0 }
  0xd4   : > { %v568_v44 = vadd.f32 %v2376_v39, %v567_v43  ;;  %v766_v45 = vmul.f32 %v2382_v42, %v573_v41  ;;  %vm727_vm1 = vcmp.gt.f32.partialorder %v573_v41, 0.0  ;;  %v2393_v53 = vpop.f32.mrf.mxu1 }
  0xd5   : > { %v2044_v46 = vpop.f32.mrf.mxu0 }
  0xd6   : > { %vm726_vm2 = vcmp.gt.f32.partialorder %v568_v44, 0.0  ;;  %v765_v47 = vmul.f32 %v2382_v42, %v568_v44  ;;  %v583_v48 = vadd.f32 %v2044_v46, %v2376_v39  ;;  %v2395_v54 = vsel %vm727_vm1, %v573_v41, %v766_v45  ;;  %v2404_v59 = vpop.f32.mrf.mxu1 }
  0xd7   : > { %v577_v50 = vpop.f32.mrf.mxu0  ;;  %v648_v41 = vadd.f32 %v2376_v39, %v2393_v53 }
  0xd8   : > { %v578_v51 = vadd.f32 %v2376_v39, %v577_v50  ;;  %v2391_v52 = vsel %vm726_vm2, %v568_v44, %v765_v47  ;;  %v768_v55 = vmul.f32 %v2382_v42, %v583_v48  ;;  %vm729_vm3 = vcmp.gt.f32.partialorder %v583_v48, 0.0  ;;  %v2409_v63 = vpop.f32.mrf.mxu1 }
  0xd9   : > { %v2047_v56 = vpop.f32.mrf.mxu0  ;;  %2091 = vmatprep.mubr.msk.f32.mxu1 %vm404_vm0, %v2391_v52  ;;  %v781_v53 = vmul.f32 %v2382_v42, %v648_v41  ;;  %vm742_vm2 = vcmp.gt.f32.partialorder %v648_v41, 0.0 }
  0xda   : > { %vm728_vm4 = vcmp.gt.f32.partialorder %v578_v51, 0.0  ;;  %v767_v57 = vmul.f32 %v2382_v42, %v578_v51  ;;  %v593_v58 = vadd.f32 %v2047_v56, %v2376_v39  ;;  %2092 = vmatmul.mubr.msk.f32.vlgmr.msra.gmra.mxu1 %vm404_vm0, %v2395_v54  ;;  %v2414_v2 = vsel %vm729_vm3, %v583_v48, %v768_v55  ;;  %v2420_v5 = vpop.f32.mrf.mxu1 }
  0xdb   : > { %v587_v60 = vpop.f32.mrf.mxu0 }
  0xdc   : > { %v588_v61 = vadd.f32 %v2376_v39, %v587_v60  ;;  %v2407_v62 = vsel %vm728_vm4, %v578_v51, %v767_v57  ;;  %v770_v0 = vmul.f32 %v2382_v42, %v593_v58  ;;  %vm731_vm5 = vcmp.gt.f32.partialorder %v593_v58, 0.0  ;;  %v2425_v9 = vpop.f32.mrf.mxu1 }
  0xdd   : > { %v2050_v1 = vpop.f32.mrf.mxu0  ;;  %2094 = vmatprep.mubr.msk.f32.mxu1 %vm404_vm0, %v2407_v62  ;;  %v653_v51 = vadd.f32 %v2388_v49, %v2376_v39  ;;  %v658_v57 = vadd.f32 %v2376_v39, %v2409_v63  ;;  %v668_v63 = vadd.f32 %v2376_v39, %v2425_v9 }
  0xde   : > { %vm730_vm6 = vcmp.gt.f32.partialorder %v588_v61, 0.0  ;;  %v769_v3 = vmul.f32 %v2382_v42, %v588_v61  ;;  %v603_v4 = vadd.f32 %v2050_v1, %v2376_v39  ;;  %2095 = vmatmul.mubr.msk.f32.gmra.mxu1 %vm404_vm0, %v2414_v2  ;;  %v2430_v12 = vsel %vm731_vm5, %v593_v58, %v770_v0  ;;  %v2436_v16 = vpop.f32.mrf.mxu1 }
  0xdf   : > { %v597_v6 = vpop.f32.mrf.mxu0  ;;  %v782_v60 = vmul.f32 %v2382_v42, %v653_v51  ;;  %vm743_vm3 = vcmp.gt.f32.partialorder %v653_v51, 0.0  ;;  %v783_v1 = vmul.f32 %v2382_v42, %v658_v57  ;;  %vm744_vm4 = vcmp.gt.f32.partialorder %v658_v57, 0.0 }
  0xe0   : > { %v598_v7 = vadd.f32 %v2376_v39, %v597_v6  ;;  %v2423_v8 = vsel %vm730_vm6, %v588_v61, %v769_v3  ;;  %v772_v10 = vmul.f32 %v2382_v42, %v603_v4  ;;  %vm733_vm7 = vcmp.gt.f32.partialorder %v603_v4, 0.0  ;;  %v677_v25 = vpop.f32.mrf.mxu1 }
  0xe1   : > { %v2053_v11 = vpop.f32.mrf.mxu0  ;;  %2097 = vmatprep.mubr.msk.f32.mxu1 %vm404_vm0, %v2423_v8  ;;  %v663_v61 = vadd.f32 %v2404_v59, %v2376_v39  ;;  %v2508_v3 = vsel %vm742_vm2, %v648_v41, %v781_v53  ;;  %v673_v6 = vadd.f32 %v2420_v5, %v2376_v39  ;;  %v678_v9 = vadd.f32 %v2376_v39, %v677_v25 }
  0xe2   : > { %vm732_vm8 = vcmp.gt.f32.partialorder %v598_v7, 0.0  ;;  %v771_v13 = vmul.f32 %v2382_v42, %v598_v7  ;;  %v613_v14 = vadd.f32 %v2053_v11, %v2376_v39  ;;  %2098 = vmatmul.mubr.msk.f32.gmra.mxu1 %vm404_vm0, %v2430_v12  ;;  %v2444_v21 = vsel %vm733_vm7, %v603_v4, %v772_v10  ;;  %v2462_v34 = vpop.f32.mrf.mxu1 }
  0xe3   : > { %v607_v15 = vpop.f32.mrf.mxu0  ;;  %v784_v4 = vmul.f32 %v2382_v42, %v663_v61  ;;  %vm745_vm5 = vcmp.gt.f32.partialorder %v663_v61, 0.0  ;;  %v785_v10 = vmul.f32 %v2382_v42, %v668_v63  ;;  %v2521_v11 = vsel %vm744_vm4, %v658_v57, %v783_v1  ;;  %v2605_v1 = vld [vmem:[%s2893_s5] ss:$0 sm:$0xff] }
  0xe4   : > { %v608_v17 = vadd.f32 %v2376_v39, %v607_v15  ;;  %v2439_v18 = vsel %vm732_vm8, %v598_v7, %v771_v13  ;;  %v774_v19 = vmul.f32 %v2382_v42, %v613_v14  ;;  %vm735_vm9 = vcmp.gt.f32.partialorder %v613_v14, 0.0  ;;  %v687_v46 = vpop.f32.mrf.mxu1 }
  0xe5   : > { %v2056_v20 = vpop.f32.mrf.mxu0  ;;  %2100 = vmatprep.mubr.msk.f32.mxu1 %vm404_vm0, %v2439_v18  ;;  %v2515_v7 = vsel %vm743_vm3, %v653_v51, %v782_v60  ;;  %vm746_vm6 = vcmp.gt.f32.partialorder %v668_v63, 0.0  ;;  %v683_v5 = vadd.f32 %v2436_v16, %v2376_v39  ;;  %v2528_v15 = vsel %vm745_vm5, %v663_v61, %v784_v4  ;;  %v2611_v4 = vld [vmem:[%s2894_s6] ss:$0 sm:$0xff] }
  0xe6   : > { %vm734_vm10 = vcmp.gt.f32.partialorder %v608_v17, 0.0  ;;  %v773_v22 = vmul.f32 %v2382_v42, %v608_v17  ;;  %v623_v23 = vadd.f32 %v2056_v20, %v2376_v39  ;;  %2101 = vmatmul.mubr.msk.f32.gmra.mxu1 %vm404_vm0, %v2444_v21  ;;  %v2456_v30 = vsel %vm735_vm9, %v613_v14, %v774_v19  ;;  %v2080_v58 = vpop.f32.mrf.mxu1 }
  0xe7   : > { %v617_v24 = vpop.f32.mrf.mxu0  ;;  %v786_v14 = vmul.f32 %v2382_v42, %v673_v6  ;;  %vm747_vm7 = vcmp.gt.f32.partialorder %v673_v6, 0.0  ;;  %v688_v19 = vadd.f32 %v2376_v39, %v687_v46  ;;  %v2534_v20 = vsel %vm746_vm6, %v668_v63, %v785_v10 }
  0xe8   : > { %v618_v26 = vadd.f32 %v2376_v39, %v617_v24  ;;  %v2451_v27 = vsel %vm734_vm10, %v608_v17, %v773_v22  ;;  %v776_v28 = vmul.f32 %v2382_v42, %v623_v23  ;;  %vm737_vm11 = vcmp.gt.f32.partialorder %v623_v23, 0.0  ;;  %v697_v59 = vpop.f32.mrf.mxu1 }
  0xe9   : > { %v2059_v29 = vpop.f32.mrf.mxu0  ;;  %2103 = vmatprep.mubr.msk.f32.mxu1 %vm404_vm0, %v2451_v27  ;;  %v787_v17 = vmul.f32 %v2382_v42, %v678_v9  ;;  %vm748_vm8 = vcmp.gt.f32.partialorder %v678_v9, 0.0  ;;  %v693_v16 = vadd.f32 %v2462_v34, %v2376_v39  ;;  %v2541_v24 = vsel %vm747_vm7, %v673_v6, %v786_v14 }
  0xea   : > { %vm736_vm12 = vcmp.gt.f32.partialorder %v618_v26, 0.0  ;;  %v775_v31 = vmul.f32 %v2382_v42, %v618_v26  ;;  %v633_v32 = vadd.f32 %v2059_v29, %v2376_v39  ;;  %2104 = vmatmul.mubr.msk.f32.gmra.mxu1 %vm404_vm0, %v2456_v30  ;;  %v2470_v40 = vsel %vm737_vm11, %v623_v23, %v776_v28  ;;  %v2083_v13 = vpop.f32.mrf.mxu1 }
  0xeb   : > { %v627_v33 = vpop.f32.mrf.mxu0  ;;  %v788_v23 = vmul.f32 %v2382_v42, %v683_v5  ;;  %vm749_vm9 = vcmp.gt.f32.partialorder %v683_v5, 0.0  ;;  %v789_v25 = vmul.f32 %v2382_v42, %v688_v19  ;;  %v2547_v28 = vsel %vm748_vm8, %v678_v9, %v787_v17 }
  0xec   : > { %v628_v35 = vadd.f32 %v2376_v39, %v627_v33  ;;  %v2465_v36 = vsel %vm736_vm12, %v618_v26, %v775_v31  ;;  %v778_v37 = vmul.f32 %v2382_v42, %v633_v32  ;;  %vm739_vm13 = vcmp.gt.f32.partialorder %v633_v32, 0.0  ;;  %v707_v22 = vpop.f32.mrf.mxu1 }
  0xed   : > { %v2062_v38 = vpop.f32.mrf.mxu0  ;;  %2106 = vmatprep.mubr.msk.f32.mxu1 %vm404_vm0, %v2465_v36  ;;  %v698_v26 = vadd.f32 %v2376_v39, %v697_v59  ;;  %vm750_vm10 = vcmp.gt.f32.partialorder %v688_v19, 0.0  ;;  %v790_v31 = vmul.f32 %v2382_v42, %v693_v16  ;;  %v2553_v33 = vsel %vm749_vm9, %v683_v5, %v788_v23 }
  0xee   : > { %vm738_vm14 = vcmp.gt.f32.partialorder %v628_v35, 0.0  ;;  %v777_v43 = vmul.f32 %v2382_v42, %v628_v35  ;;  %v643_v44 = vadd.f32 %v2062_v38, %v2376_v39  ;;  %2107 = vmatmul.mubr.msk.f32.gmra.mxu1 %vm404_vm0, %v2470_v40  ;;  %v2487_v55 = vsel %vm739_vm13, %v633_v32, %v778_v37  ;;  %v2086_v29 = vpop.f32.mrf.mxu1 }
  0xef   : > { %v637_v45 = vpop.f32.mrf.mxu0  ;;  %v703_v32 = vadd.f32 %v2080_v58, %v2376_v39  ;;  %vm751_vm11 = vcmp.gt.f32.partialorder %v693_v16, 0.0  ;;  %v791_v34 = vmul.f32 %v2382_v42, %v698_v26  ;;  %v2559_v37 = vsel %vm750_vm10, %v688_v19, %v789_v25 }
  0xf0   : > { %v638_v47 = vadd.f32 %v2376_v39, %v637_v45  ;;  %v2479_v48 = vsel %vm738_vm14, %v628_v35, %v777_v43  ;;  %v780_v50 = vmul.f32 %v2382_v42, %v643_v44  ;;  %vm741_vm15 = vcmp.gt.f32.partialorder %v643_v44, 0.0  ;;  %v717_v38 = vpop.f32.mrf.mxu1 }
  0xf1   : > { %2109 = vmatprep.mubr.msk.f32.mxu1 %vm404_vm0, %v2479_v48  ;;  %v708_v35 = vadd.f32 %v2376_v39, %v707_v22  ;;  %vm752_vm12 = vcmp.gt.f32.partialorder %v698_v26, 0.0  ;;  %v792_v41 = vmul.f32 %v2382_v42, %v703_v32  ;;  %v713_v43 = vadd.f32 %v2083_v13, %v2376_v39 }
  0xf2   : > { %vm740_vm1 = vcmp.gt.f32.partialorder %v638_v47, 0.0  ;;  %v779_v56 = vmul.f32 %v2382_v42, %v638_v47  ;;  %2110 = vmatmul.mubr.msk.f32.gmra.mxu1 %vm404_vm0, %v2487_v55  ;;  %v2501_v0 = vsel %vm741_vm15, %v643_v44, %v780_v50  ;;  %v2565_v44 = vsel %vm751_vm11, %v693_v16, %v790_v31 }
  0xf3   : > { %vm753_vm13 = vcmp.gt.f32.partialorder %v703_v32, 0.0  ;;  %v793_v45 = vmul.f32 %v2382_v42, %v708_v35  ;;  %v718_v46 = vadd.f32 %v2376_v39, %v717_v38  ;;  %vm754_vm14 = vcmp.gt.f32.partialorder %v708_v35, 0.0 }
  0xf4   : > { %v2494_v49 = vsel %vm740_vm1, %v638_v47, %v779_v56  ;;  %v2571_v47 = vsel %vm752_vm12, %v698_v26, %v791_v34  ;;  %v794_v50 = vmul.f32 %v2382_v42, %v713_v43  ;;  %v723_v51 = vadd.f32 %v2086_v29, %v2376_v39 }
  0xf5   : > { %2112 = vmatprep.mubr.msk.f32.mxu1 %vm404_vm0, %v2494_v49  ;;  %v2577_v53 = vsel %vm753_vm13, %v703_v32, %v792_v41  ;;  %vm755_vm15 = vcmp.gt.f32.partialorder %v713_v43, 0.0  ;;  %v795_v56 = vmul.f32 %v2382_v42, %v718_v46  ;;  %v2582_v57 = vsel %vm754_vm14, %v708_v35, %v793_v45 }
  0xf6   : > { %2113 = vmatmul.mubr.msk.f32.gmra.mxu1 %vm404_vm0, %v2501_v0  ;;  %vm756_vm1 = vcmp.gt.f32.partialorder %v718_v46, 0.0  ;;  %v796_v58 = vmul.f32 %v2382_v42, %v723_v51  ;;  %v2587_v60 = vsel %vm755_vm15, %v713_v43, %v794_v50  ;;  %vm757_vm2 = vcmp.gt.f32.partialorder %v723_v51, 0.0  ;;  %v1262_v42 = vld [vmem:[%s2895_s7] sm:$0xff] }
  0xf7   : > { %2115 = vmatprep.mubr.msk.f32.mxu1 %vm404_vm0, %v2508_v3  ;;  %v2591_v39 = vsel %vm756_vm1, %v718_v46, %v795_v56  ;;  %2145 = vmatprep.subr.mxu0 %v1262_v42  ;;  %vm1273_vm3 = vcmask 261120  }
  0xf8   : > { %v2595_v61 = vsel %vm757_vm2, %v723_v51, %v796_v58  ;;  %2146 = vmatpush3.msra.mxu0 %v1262_v42 }
  0xfa   : > { %2116 = vmatmul.mubr.msk.f32.gmra.mxu1 %vm404_vm0, %v2515_v7 }
  0xfb   : > { %2118 = vmatprep.mubr.msk.f32.mxu1 %vm404_vm0, %v2521_v11 }
  0xfe   : > { %2119 = vmatmul.mubr.msk.f32.gmra.mxu1 %vm404_vm0, %v2528_v15 }
  0xff   : > { %2121 = vmatprep.mubr.msk.f32.mxu1 %vm404_vm0, %v2534_v20 }
 0x102   : > { %2122 = vmatmul.mubr.msk.f32.gmra.mxu1 %vm404_vm0, %v2541_v24 }
 0x103   : > { %2124 = vmatprep.mubr.msk.f32.mxu1 %vm404_vm0, %v2547_v28 }
 0x106   : > { %2125 = vmatmul.mubr.msk.f32.gmra.mxu1 %vm404_vm0, %v2553_v33 }
 0x107   : > { %2127 = vmatprep.mubr.msk.f32.mxu1 %vm404_vm0, %v2559_v37 }
 0x10a   : > { %2128 = vmatmul.mubr.msk.f32.gmra.mxu1 %vm404_vm0, %v2565_v44 }
 0x10b   : > { %2130 = vmatprep.mubr.msk.f32.mxu1 %vm404_vm0, %v2571_v47 }
 0x10e   : > { %2131 = vmatmul.mubr.msk.f32.gmra.mxu1 %vm404_vm0, %v2577_v53 }
 0x10f   : > { %2133 = vmatprep.mubr.msk.f32.mxu1 %vm404_vm0, %v2582_v57 }
 0x112   : > { %2134 = vmatmul.mubr.msk.f32.gmra.mxu1 %vm404_vm0, %v2587_v60 }
 0x113   : > { %2136 = vmatprep.mubr.msk.f32.mxu1 %vm404_vm0, %v2591_v39 }
 0x116   : > { %2137 = vmatmul.mubr.msk.f32.gmra.mxu1 %vm404_vm0, %v2595_v61 }
 0x19a   : > { %v2093_v63 = vpop.f32.mrf.mxu1 }
 0x19b   : > { %v1006_v59 = vadd.f32 %v2093_v63, %v2605_v1 }
 0x19c   : > { %v1000_v6 = vpop.f32.mrf.mxu1 }
 0x19d   : > { %v1001_v10 = vadd.f32 %v2605_v1, %v1000_v6  ;;  %v1199_v9 = vmul.f32 %v2611_v4, %v1006_v59  ;;  %vm1160_vm4 = vcmp.gt.f32.partialorder %v1006_v59, 0.0 }
 0x19e   : > { %v2096_v13 = vpop.f32.mrf.mxu1 }
 0x19f   : > { %vm1159_vm5 = vcmp.gt.f32.partialorder %v1001_v10, 0.0  ;;  %v1198_v14 = vmul.f32 %v2611_v4, %v1001_v10  ;;  %v1016_v5 = vadd.f32 %v2096_v13, %v2605_v1  ;;  %v1231_v23 = vsel %vm1160_vm4, %v1006_v59, %v1199_v9 }
 0x1a0   : > { %v1010_v17 = vpop.f32.mrf.mxu1 }
 0x1a1   : > { %v1011_v19 = vadd.f32 %v2605_v1, %v1010_v17  ;;  %v1230_v22 = vsel %vm1159_vm5, %v1001_v10, %v1198_v14  ;;  %v1201_v16 = vmul.f32 %v2611_v4, %v1016_v5  ;;  %vm1162_vm6 = vcmp.gt.f32.partialorder %v1016_v5, 0.0 }
 0x1a2   : > { %v2099_v25 = vpop.f32.mrf.mxu1  ;;  %2147 = vmatprep.mubr.msk.f32.mxu0 %vm1273_vm3, %v1230_v22 }
 0x1a3   : > { %vm1161_vm7 = vcmp.gt.f32.partialorder %v1011_v19, 0.0  ;;  %v1200_v26 = vmul.f32 %v2611_v4, %v1011_v19  ;;  %v1026_v29 = vadd.f32 %v2099_v25, %v2605_v1  ;;  %2148 = vmatmul.mubr.msk.f32.vlgmr.msra.gmra.mxu0 %vm1273_vm3, %v1231_v23  ;;  %v1233_v41 = vsel %vm1162_vm6, %v1016_v5, %v1201_v16 }
 0x1a4   : > { %v1020_v31 = vpop.f32.mrf.mxu1 }
 0x1a5   : > { %v1021_v32 = vadd.f32 %v2605_v1, %v1020_v31  ;;  %v1232_v34 = vsel %vm1161_vm7, %v1011_v19, %v1200_v26  ;;  %v1203_v35 = vmul.f32 %v2611_v4, %v1026_v29  ;;  %vm1164_vm8 = vcmp.gt.f32.partialorder %v1026_v29, 0.0 }
 0x1a6   : > { %v2102_v38 = vpop.f32.mrf.mxu1  ;;  %2150 = vmatprep.mubr.msk.f32.mxu0 %vm1273_vm3, %v1232_v34 }
 0x1a7   : > { %vm1163_vm9 = vcmp.gt.f32.partialorder %v1021_v32, 0.0  ;;  %v1202_v43 = vmul.f32 %v2611_v4, %v1021_v32  ;;  %v1036_v45 = vadd.f32 %v2102_v38, %v2605_v1  ;;  %2151 = vmatmul.mubr.msk.f32.gmra.mxu0 %vm1273_vm3, %v1233_v41  ;;  %v1235_v42 = vsel %vm1164_vm8, %v1026_v29, %v1203_v35 }
 0x1a8   : > { %v1030_v46 = vpop.f32.mrf.mxu1 }
 0x1a9   : > { %v1031_v50 = vadd.f32 %v2605_v1, %v1030_v46  ;;  %v1234_v51 = vsel %vm1163_vm9, %v1021_v32, %v1202_v43  ;;  %v1205_v56 = vmul.f32 %v2611_v4, %v1036_v45  ;;  %vm1166_vm10 = vcmp.gt.f32.partialorder %v1036_v45, 0.0 }
 0x1aa   : > { %v2105_v58 = vpop.f32.mrf.mxu1  ;;  %2153 = vmatprep.mubr.msk.f32.mxu0 %vm1273_vm3, %v1234_v51 }
 0x1ab   : > { %vm1165_vm11 = vcmp.gt.f32.partialorder %v1031_v50, 0.0  ;;  %v1204_v63 = vmul.f32 %v2611_v4, %v1031_v50  ;;  %v1046_v59 = vadd.f32 %v2105_v58, %v2605_v1  ;;  %2154 = vmatmul.mubr.msk.f32.gmra.mxu0 %vm1273_vm3, %v1235_v42  ;;  %v1237_v5 = vsel %vm1166_vm10, %v1036_v45, %v1205_v56 }
 0x1ac   : > { %v1040_v6 = vpop.f32.mrf.mxu1 }
 0x1ad   : > { %v1041_v10 = vadd.f32 %v2605_v1, %v1040_v6  ;;  %v1236_v9 = vsel %vm1165_vm11, %v1031_v50, %v1204_v63  ;;  %v1207_v13 = vmul.f32 %v2611_v4, %v1046_v59  ;;  %vm1168_vm12 = vcmp.gt.f32.partialorder %v1046_v59, 0.0 }
 0x1ae   : > { %v2108_v14 = vpop.f32.mrf.mxu1  ;;  %2156 = vmatprep.mubr.msk.f32.mxu0 %vm1273_vm3, %v1236_v9 }
 0x1af   : > { %vm1167_vm13 = vcmp.gt.f32.partialorder %v1041_v10, 0.0  ;;  %v1206_v17 = vmul.f32 %v2611_v4, %v1041_v10  ;;  %v1056_v19 = vadd.f32 %v2108_v14, %v2605_v1  ;;  %2157 = vmatmul.mubr.msk.f32.gmra.mxu0 %vm1273_vm3, %v1237_v5  ;;  %v1239_v29 = vsel %vm1168_vm12, %v1046_v59, %v1207_v13 }
 0x1b0   : > { %v1050_v22 = vpop.f32.mrf.mxu1 }
 0x1b1   : > { %v1051_v23 = vadd.f32 %v2605_v1, %v1050_v22  ;;  %v1238_v16 = vsel %vm1167_vm13, %v1041_v10, %v1206_v17  ;;  %v1209_v25 = vmul.f32 %v2611_v4, %v1056_v19  ;;  %vm1170_vm14 = vcmp.gt.f32.partialorder %v1056_v19, 0.0 }
 0x1b2   : > { %v2111_v26 = vpop.f32.mrf.mxu1  ;;  %2159 = vmatprep.mubr.msk.f32.mxu0 %vm1273_vm3, %v1238_v16 }
 0x1b3   : > { %vm1169_vm15 = vcmp.gt.f32.partialorder %v1051_v23, 0.0  ;;  %v1208_v31 = vmul.f32 %v2611_v4, %v1051_v23  ;;  %v1066_v32 = vadd.f32 %v2111_v26, %v2605_v1  ;;  %2160 = vmatmul.mubr.msk.f32.gmra.mxu0 %vm1273_vm3, %v1239_v29  ;;  %v1241_v45 = vsel %vm1170_vm14, %v1056_v19, %v1209_v25 }
 0x1b4   : > { %v1060_v34 = vpop.f32.mrf.mxu1 }
 0x1b5   : > { %v1061_v35 = vadd.f32 %v2605_v1, %v1060_v34  ;;  %v1240_v38 = vsel %vm1169_vm15, %v1051_v23, %v1208_v31  ;;  %v1211_v41 = vmul.f32 %v2611_v4, %v1066_v32  ;;  %vm1172_vm1 = vcmp.gt.f32.partialorder %v1066_v32, 0.0 }
 0x1b6   : > { %v2114_v43 = vpop.f32.mrf.mxu1  ;;  %2162 = vmatprep.mubr.msk.f32.mxu0 %vm1273_vm3, %v1240_v38 }
 0x1b7   : > { %vm1171_vm2 = vcmp.gt.f32.partialorder %v1061_v35, 0.0  ;;  %v1210_v46 = vmul.f32 %v2611_v4, %v1061_v35  ;;  %v1076_v50 = vadd.f32 %v2114_v43, %v2605_v1  ;;  %2163 = vmatmul.mubr.msk.f32.gmra.mxu0 %vm1273_vm3, %v1241_v45  ;;  %v1243_v59 = vsel %vm1172_vm1, %v1066_v32, %v1211_v41 }
 0x1b8   : > { %v1070_v51 = vpop.f32.mrf.mxu1 }
 0x1b9   : > { %v1071_v56 = vadd.f32 %v2605_v1, %v1070_v51  ;;  %v1242_v58 = vsel %vm1171_vm2, %v1061_v35, %v1210_v46  ;;  %v1213_v42 = vmul.f32 %v2611_v4, %v1076_v50  ;;  %vm1174_vm4 = vcmp.gt.f32.partialorder %v1076_v50, 0.0 }
 0x1ba   : > { %v2117_v63 = vpop.f32.mrf.mxu1  ;;  %2165 = vmatprep.mubr.msk.f32.mxu0 %vm1273_vm3, %v1242_v58 }
 0x1bb   : > { %vm1173_vm5 = vcmp.gt.f32.partialorder %v1071_v56, 0.0  ;;  %v1212_v6 = vmul.f32 %v2611_v4, %v1071_v56  ;;  %v1086_v10 = vadd.f32 %v2117_v63, %v2605_v1  ;;  %2166 = vmatmul.mubr.msk.f32.gmra.mxu0 %vm1273_vm3, %v1243_v59  ;;  %v1245_v19 = vsel %vm1174_vm4, %v1076_v50, %v1213_v42 }
 0x1bc   : > { %v1080_v9 = vpop.f32.mrf.mxu1 }
 0x1bd   : > { %v1081_v13 = vadd.f32 %v2605_v1, %v1080_v9  ;;  %v1244_v14 = vsel %vm1173_vm5, %v1071_v56, %v1212_v6  ;;  %v1215_v5 = vmul.f32 %v2611_v4, %v1086_v10  ;;  %vm1176_vm6 = vcmp.gt.f32.partialorder %v1086_v10, 0.0 }
 0x1be   : > { %v2120_v17 = vpop.f32.mrf.mxu1  ;;  %2168 = vmatprep.mubr.msk.f32.mxu0 %vm1273_vm3, %v1244_v14 }
 0x1bf   : > { %vm1175_vm7 = vcmp.gt.f32.partialorder %v1081_v13, 0.0  ;;  %v1214_v22 = vmul.f32 %v2611_v4, %v1081_v13  ;;  %v1096_v23 = vadd.f32 %v2120_v17, %v2605_v1  ;;  %2169 = vmatmul.mubr.msk.f32.gmra.mxu0 %vm1273_vm3, %v1245_v19  ;;  %v1247_v32 = vsel %vm1176_vm6, %v1086_v10, %v1215_v5 }
 0x1c0   : > { %v1090_v16 = vpop.f32.mrf.mxu1 }
 0x1c1   : > { %v1091_v25 = vadd.f32 %v2605_v1, %v1090_v16  ;;  %v1246_v26 = vsel %vm1175_vm7, %v1081_v13, %v1214_v22  ;;  %v1217_v29 = vmul.f32 %v2611_v4, %v1096_v23  ;;  %vm1178_vm8 = vcmp.gt.f32.partialorder %v1096_v23, 0.0 }
 0x1c2   : > { %v2123_v31 = vpop.f32.mrf.mxu1  ;;  %2171 = vmatprep.mubr.msk.f32.mxu0 %vm1273_vm3, %v1246_v26 }
 0x1c3   : > { %vm1177_vm9 = vcmp.gt.f32.partialorder %v1091_v25, 0.0  ;;  %v1216_v34 = vmul.f32 %v2611_v4, %v1091_v25  ;;  %v1106_v35 = vadd.f32 %v2123_v31, %v2605_v1  ;;  %2172 = vmatmul.mubr.msk.f32.gmra.mxu0 %vm1273_vm3, %v1247_v32  ;;  %v1249_v50 = vsel %vm1178_vm8, %v1096_v23, %v1217_v29 }
 0x1c4   : > { %v1100_v38 = vpop.f32.mrf.mxu1 }
 0x1c5   : > { %v1101_v41 = vadd.f32 %v2605_v1, %v1100_v38  ;;  %v1248_v43 = vsel %vm1177_vm9, %v1091_v25, %v1216_v34  ;;  %v1219_v45 = vmul.f32 %v2611_v4, %v1106_v35  ;;  %vm1180_vm10 = vcmp.gt.f32.partialorder %v1106_v35, 0.0 }
 0x1c6   : > { %v2126_v46 = vpop.f32.mrf.mxu1  ;;  %2174 = vmatprep.mubr.msk.f32.mxu0 %vm1273_vm3, %v1248_v43 }
 0x1c7   : > { %vm1179_vm11 = vcmp.gt.f32.partialorder %v1101_v41, 0.0  ;;  %v1218_v51 = vmul.f32 %v2611_v4, %v1101_v41  ;;  %v1116_v56 = vadd.f32 %v2126_v46, %v2605_v1  ;;  %2175 = vmatmul.mubr.msk.f32.gmra.mxu0 %vm1273_vm3, %v1249_v50  ;;  %v1251_v10 = vsel %vm1180_vm10, %v1106_v35, %v1219_v45 }
 0x1c8   : > { %v1110_v58 = vpop.f32.mrf.mxu1 }
 0x1c9   : > { %v1111_v42 = vadd.f32 %v2605_v1, %v1110_v58  ;;  %v1250_v63 = vsel %vm1179_vm11, %v1101_v41, %v1218_v51  ;;  %v1221_v59 = vmul.f32 %v2611_v4, %v1116_v56  ;;  %vm1182_vm12 = vcmp.gt.f32.partialorder %v1116_v56, 0.0 }
 0x1ca   : > { %v2129_v6 = vpop.f32.mrf.mxu1  ;;  %2177 = vmatprep.mubr.msk.f32.mxu0 %vm1273_vm3, %v1250_v63 }
 0x1cb   : > { %vm1181_vm13 = vcmp.gt.f32.partialorder %v1111_v42, 0.0  ;;  %v1220_v9 = vmul.f32 %v2611_v4, %v1111_v42  ;;  %v1126_v13 = vadd.f32 %v2129_v6, %v2605_v1  ;;  %2178 = vmatmul.mubr.msk.f32.gmra.mxu0 %vm1273_vm3, %v1251_v10  ;;  %v1253_v23 = vsel %vm1182_vm12, %v1116_v56, %v1221_v59 }
 0x1cc   : > { %v1120_v14 = vpop.f32.mrf.mxu1 }
 0x1cd   : > { %v1121_v5 = vadd.f32 %v2605_v1, %v1120_v14  ;;  %v1252_v17 = vsel %vm1181_vm13, %v1111_v42, %v1220_v9  ;;  %v1223_v19 = vmul.f32 %v2611_v4, %v1126_v13  ;;  %vm1184_vm14 = vcmp.gt.f32.partialorder %v1126_v13, 0.0 }
 0x1ce   : > { %v2132_v22 = vpop.f32.mrf.mxu1  ;;  %2180 = vmatprep.mubr.msk.f32.mxu0 %vm1273_vm3, %v1252_v17 }
 0x1cf   : > { %vm1183_vm15 = vcmp.gt.f32.partialorder %v1121_v5, 0.0  ;;  %v1222_v16 = vmul.f32 %v2611_v4, %v1121_v5  ;;  %v1136_v25 = vadd.f32 %v2132_v22, %v2605_v1  ;;  %2181 = vmatmul.mubr.msk.f32.gmra.mxu0 %vm1273_vm3, %v1253_v23  ;;  %v1255_v35 = vsel %vm1184_vm14, %v1126_v13, %v1223_v19  ;;  %v2716_v19 = vld [vmem:[%s2897_s9] ss:$0 sm:$0xff] }
 0x1d0   : > { %v1130_v26 = vpop.f32.mrf.mxu1 }
 0x1d1   : > { %v1131_v29 = vadd.f32 %v2605_v1, %v1130_v26  ;;  %v1254_v31 = vsel %vm1183_vm15, %v1121_v5, %v1222_v16  ;;  %v1225_v32 = vmul.f32 %v2611_v4, %v1136_v25  ;;  %vm1186_vm1 = vcmp.gt.f32.partialorder %v1136_v25, 0.0 }
 0x1d2   : > { %v2135_v34 = vpop.f32.mrf.mxu1  ;;  %2183 = vmatprep.mubr.msk.f32.mxu0 %vm1273_vm3, %v1254_v31 }
 0x1d3   : > { %vm1185_vm2 = vcmp.gt.f32.partialorder %v1131_v29, 0.0  ;;  %v1224_v38 = vmul.f32 %v2611_v4, %v1131_v29  ;;  %v1146_v41 = vadd.f32 %v2135_v34, %v2605_v1  ;;  %2184 = vmatmul.mubr.msk.f32.gmra.mxu0 %vm1273_vm3, %v1255_v35  ;;  %v1257_v56 = vsel %vm1186_vm1, %v1136_v25, %v1225_v32 }
 0x1d4   : > { %v1140_v43 = vpop.f32.mrf.mxu1 }
 0x1d5   : > { %v1141_v45 = vadd.f32 %v2605_v1, %v1140_v43  ;;  %v1256_v46 = vsel %vm1185_vm2, %v1131_v29, %v1224_v38  ;;  %v1227_v50 = vmul.f32 %v2611_v4, %v1146_v41  ;;  %vm1188_vm4 = vcmp.gt.f32.partialorder %v1146_v41, 0.0 }
 0x1d6   : > { %v2138_v51 = vpop.f32.mrf.mxu1  ;;  %2186 = vmatprep.mubr.msk.f32.mxu0 %vm1273_vm3, %v1256_v46 }
 0x1d7   : > { %vm1187_vm5 = vcmp.gt.f32.partialorder %v1141_v45, 0.0  ;;  %v1226_v58 = vmul.f32 %v2611_v4, %v1141_v45  ;;  %v1156_v42 = vadd.f32 %v2138_v51, %v2605_v1  ;;  %2187 = vmatmul.mubr.msk.f32.gmra.mxu0 %vm1273_vm3, %v1257_v56  ;;  %v1259_v9 = vsel %vm1188_vm4, %v1146_v41, %v1227_v50 }
 0x1d8   : > { %v1150_v63 = vpop.f32.mrf.mxu1 }
 0x1d9   : > { %v1151_v59 = vadd.f32 %v2605_v1, %v1150_v63  ;;  %v1258_v6 = vsel %vm1187_vm5, %v1141_v45, %v1226_v58  ;;  %v1229_v10 = vmul.f32 %v2611_v4, %v1156_v42  ;;  %vm1190_vm6 = vcmp.gt.f32.partialorder %v1156_v42, 0.0  ;;  %v2711_v1 = vld [vmem:[%s2896_s8] ss:$0 sm:$0xff] }
 0x1da   : > { %2189 = vmatprep.mubr.msk.f32.mxu0 %vm1273_vm3, %v1258_v6 }
 0x1db   : > { %vm1189_vm7 = vcmp.gt.f32.partialorder %v1151_v59, 0.0  ;;  %v1228_v13 = vmul.f32 %v2611_v4, %v1151_v59  ;;  %2190 = vmatmul.mubr.msk.f32.gmra.mxu0 %vm1273_vm3, %v1259_v9  ;;  %v1261_v5 = vsel %vm1190_vm6, %v1156_v42, %v1229_v10 }
 0x1dd   : > { %v1260_v14 = vsel %vm1189_vm7, %v1151_v59, %v1228_v13 }
 0x1de   : > { %2192 = vmatprep.mubr.msk.f32.mxu0 %vm1273_vm3, %v1260_v14 }
 0x1df   : > { %2193 = vmatmul.mubr.msk.f32.gmra.mxu0 %vm1273_vm3, %v1261_v5 }
 0x263   : > { %v2149_v17 = vpop.f32.mrf.mxu0 }
 0x264   : > { %v1442_v4 = vadd.f32 %v2149_v17, %v2711_v1 }
 0x265   : > { %v1436_v22 = vpop.f32.mrf.mxu0 }
 0x266   : > { %vm1596_vm8 = vcmp.gt.f32.partialorder %v1442_v4, 0.0  ;;  %v1635_v23 = vmul.f32 %v2716_v19, %v1442_v4  ;;  %v1437_v16 = vadd.f32 %v2711_v1, %v1436_v22 }
 0x267   : > { %v2152_v25 = vpop.f32.mrf.mxu0 }
 0x268   : > { %v1667_v26 = vsel %vm1596_vm8, %v1442_v4, %v1635_v23  ;;  %vm1595_vm3 = vcmp.gt.f32.partialorder %v1437_v16, 0.0  ;;  %v1634_v29 = vmul.f32 %v2716_v19, %v1437_v16  ;;  %v1452_v31 = vadd.f32 %v2152_v25, %v2711_v1 }
 0x269   : > { %v1699_v32 = vadd.f32 %v1667_v26, %v2395_v54  ;;  %v1446_v34 = vpop.f32.mrf.mxu0 }
 0x26a   : > { %v1666_v35 = vsel %vm1595_vm3, %v1437_v16, %v1634_v29  ;;  %vm1598_vm9 = vcmp.gt.f32.partialorder %v1452_v31, 0.0  ;;  %v1637_v38 = vmul.f32 %v2716_v19, %v1452_v31  ;;  %v1447_v41 = vadd.f32 %v2711_v1, %v1446_v34 }
 0x26b   : > { %1731 = vst.msk [vmem:[%s2726_s14 + $0x8] sm:$0xff] %vm404_vm0, %v1699_v32  ;;  %v1698_v43 = vadd.f32 %v1666_v35, %v2391_v52  ;;  %v2155_v45 = vpop.f32.mrf.mxu0 }
 0x26c   : > { %v1669_v46 = vsel %vm1598_vm9, %v1452_v31, %v1637_v38  ;;  %vm1597_vm10 = vcmp.gt.f32.partialorder %v1447_v41, 0.0  ;;  %v1636_v50 = vmul.f32 %v2716_v19, %v1447_v41  ;;  %v1462_v54 = vadd.f32 %v2155_v45, %v2711_v1 }
 0x26d   : > { %1730 = vst.msk [vmem:[%s2726_s14] sm:$0xff] %vm404_vm0, %v1698_v43  ;;  %v1701_v51 = vadd.f32 %v1669_v46, %v2414_v2  ;;  %v1456_v56 = vpop.f32.mrf.mxu0 }
 0x26e   : > { %v1668_v58 = vsel %vm1597_vm10, %v1447_v41, %v1636_v50  ;;  %vm1600_vm11 = vcmp.gt.f32.partialorder %v1462_v54, 0.0  ;;  %v1639_v42 = vmul.f32 %v2716_v19, %v1462_v54  ;;  %v1457_v52 = vadd.f32 %v2711_v1, %v1456_v56 }
 0x26f   : > { %1733 = vst.msk [vmem:[%s2726_s14 + $0x18] sm:$0xff] %vm404_vm0, %v1701_v51  ;;  %v1700_v63 = vadd.f32 %v1668_v58, %v2407_v62  ;;  %v2158_v59 = vpop.f32.mrf.mxu0 }
 0x270   : > { %v1671_v6 = vsel %vm1600_vm11, %v1462_v54, %v1639_v42  ;;  %vm1599_vm12 = vcmp.gt.f32.partialorder %v1457_v52, 0.0  ;;  %v1638_v10 = vmul.f32 %v2716_v19, %v1457_v52  ;;  %v1472_v2 = vadd.f32 %v2158_v59, %v2711_v1 }
 0x271   : > { %1732 = vst.msk [vmem:[%s2726_s14 + $0x10] sm:$0xff] %vm404_vm0, %v1700_v63  ;;  %v1703_v9 = vadd.f32 %v1671_v6, %v2430_v12  ;;  %v1466_v13 = vpop.f32.mrf.mxu0 }
 0x272   : > { %v1670_v14 = vsel %vm1599_vm12, %v1457_v52, %v1638_v10  ;;  %vm1602_vm13 = vcmp.gt.f32.partialorder %v1472_v2, 0.0  ;;  %v1641_v5 = vmul.f32 %v2716_v19, %v1472_v2  ;;  %v1467_v62 = vadd.f32 %v2711_v1, %v1466_v13 }
 0x273   : > { %1735 = vst.msk [vmem:[%s2726_s14 + $0x28] sm:$0xff] %vm404_vm0, %v1703_v9  ;;  %v1702_v17 = vadd.f32 %v1670_v14, %v2423_v8  ;;  %v2161_v4 = vpop.f32.mrf.mxu0 }
 0x274   : > { %v1673_v22 = vsel %vm1602_vm13, %v1472_v2, %v1641_v5  ;;  %vm1601_vm14 = vcmp.gt.f32.partialorder %v1467_v62, 0.0  ;;  %v1640_v23 = vmul.f32 %v2716_v19, %v1467_v62  ;;  %v1482_v12 = vadd.f32 %v2161_v4, %v2711_v1 }
 0x275   : > { %1734 = vst.msk [vmem:[%s2726_s14 + $0x20] sm:$0xff] %vm404_vm0, %v1702_v17  ;;  %v1705_v16 = vadd.f32 %v1673_v22, %v2444_v21  ;;  %v1476_v25 = vpop.f32.mrf.mxu0 }
 0x276   : > { %v1672_v26 = vsel %vm1601_vm14, %v1467_v62, %v1640_v23  ;;  %vm1604_vm15 = vcmp.gt.f32.partialorder %v1482_v12, 0.0  ;;  %v1643_v29 = vmul.f32 %v2716_v19, %v1482_v12  ;;  %v1477_v8 = vadd.f32 %v2711_v1, %v1476_v25 }
 0x277   : > { %1737 = vst.msk [vmem:[%s2726_s14 + $0x38] sm:$0xff] %vm404_vm0, %v1705_v16  ;;  %v1704_v31 = vadd.f32 %v1672_v26, %v2439_v18  ;;  %v2164_v32 = vpop.f32.mrf.mxu0 }
 0x278   : > { %v1675_v34 = vsel %vm1604_vm15, %v1482_v12, %v1643_v29  ;;  %vm1603_vm1 = vcmp.gt.f32.partialorder %v1477_v8, 0.0  ;;  %v1642_v35 = vmul.f32 %v2716_v19, %v1477_v8  ;;  %v1492_v21 = vadd.f32 %v2164_v32, %v2711_v1 }
 0x279   : > { %1736 = vst.msk [vmem:[%s2726_s14 + $0x30] sm:$0xff] %vm404_vm0, %v1704_v31  ;;  %v1707_v38 = vadd.f32 %v1675_v34, %v2456_v30  ;;  %v1486_v41 = vpop.f32.mrf.mxu0 }
 0x27a   : > { %v1674_v43 = vsel %vm1603_vm1, %v1477_v8, %v1642_v35  ;;  %vm1606_vm2 = vcmp.gt.f32.partialorder %v1492_v21, 0.0  ;;  %v1645_v45 = vmul.f32 %v2716_v19, %v1492_v21  ;;  %v1487_v18 = vadd.f32 %v2711_v1, %v1486_v41 }
 0x27b   : > { %1739 = vst.msk [vmem:[%s2726_s14 + $0x48] sm:$0xff] %vm404_vm0, %v1707_v38  ;;  %v1706_v46 = vadd.f32 %v1674_v43, %v2451_v27  ;;  %v2167_v50 = vpop.f32.mrf.mxu0 }
 0x27c   : > { %v1677_v54 = vsel %vm1606_vm2, %v1492_v21, %v1645_v45  ;;  %vm1605_vm4 = vcmp.gt.f32.partialorder %v1487_v18, 0.0  ;;  %v1644_v51 = vmul.f32 %v2716_v19, %v1487_v18  ;;  %v1502_v30 = vadd.f32 %v2167_v50, %v2711_v1 }
 0x27d   : > { %1738 = vst.msk [vmem:[%s2726_s14 + $0x40] sm:$0xff] %vm404_vm0, %v1706_v46  ;;  %v1709_v56 = vadd.f32 %v1677_v54, %v2470_v40  ;;  %v1496_v58 = vpop.f32.mrf.mxu0 }
 0x27e   : > { %v1676_v42 = vsel %vm1605_vm4, %v1487_v18, %v1644_v51  ;;  %vm1608_vm5 = vcmp.gt.f32.partialorder %v1502_v30, 0.0  ;;  %v1647_v52 = vmul.f32 %v2716_v19, %v1502_v30  ;;  %v1497_v27 = vadd.f32 %v2711_v1, %v1496_v58 }
 0x27f   : > { %1741 = vst.msk [vmem:[%s2726_s14 + $0x58] sm:$0xff] %vm404_vm0, %v1709_v56  ;;  %v1708_v63 = vadd.f32 %v1676_v42, %v2465_v36  ;;  %v2170_v59 = vpop.f32.mrf.mxu0 }
 0x280   : > { %v1679_v6 = vsel %vm1608_vm5, %v1502_v30, %v1647_v52  ;;  %vm1607_vm6 = vcmp.gt.f32.partialorder %v1497_v27, 0.0  ;;  %v1646_v10 = vmul.f32 %v2716_v19, %v1497_v27  ;;  %v1512_v40 = vadd.f32 %v2170_v59, %v2711_v1 }
 0x281   : > { %1740 = vst.msk [vmem:[%s2726_s14 + $0x50] sm:$0xff] %vm404_vm0, %v1708_v63  ;;  %v1711_v2 = vadd.f32 %v1679_v6, %v2487_v55  ;;  %v1506_v9 = vpop.f32.mrf.mxu0 }
 0x282   : > { %v1678_v13 = vsel %vm1607_vm6, %v1497_v27, %v1646_v10  ;;  %vm1610_vm7 = vcmp.gt.f32.partialorder %v1512_v40, 0.0  ;;  %v1649_v14 = vmul.f32 %v2716_v19, %v1512_v40  ;;  %v1507_v36 = vadd.f32 %v2711_v1, %v1506_v9 }
 0x283   : > { %1743 = vst.msk [vmem:[%s2726_s14 + $0x68] sm:$0xff] %vm404_vm0, %v1711_v2  ;;  %v1710_v5 = vadd.f32 %v1678_v13, %v2479_v48  ;;  %v2173_v62 = vpop.f32.mrf.mxu0 }
 0x284   : > { %v1681_v17 = vsel %vm1610_vm7, %v1512_v40, %v1649_v14  ;;  %vm1609_vm8 = vcmp.gt.f32.partialorder %v1507_v36, 0.0  ;;  %v1648_v4 = vmul.f32 %v2716_v19, %v1507_v36  ;;  %v1522_v55 = vadd.f32 %v2173_v62, %v2711_v1 }
 0x285   : > { %1742 = vst.msk [vmem:[%s2726_s14 + $0x60] sm:$0xff] %vm404_vm0, %v1710_v5  ;;  %v1713_v22 = vadd.f32 %v1681_v17, %v2501_v0  ;;  %v1516_v23 = vpop.f32.mrf.mxu0 }
 0x286   : > { %v1680_v12 = vsel %vm1609_vm8, %v1507_v36, %v1648_v4  ;;  %vm1612_vm3 = vcmp.gt.f32.partialorder %v1522_v55, 0.0  ;;  %v1651_v16 = vmul.f32 %v2716_v19, %v1522_v55  ;;  %v1517_v48 = vadd.f32 %v2711_v1, %v1516_v23 }
 0x287   : > { %1745 = vst.msk [vmem:[%s2726_s14 + $0x78] sm:$0xff] %vm404_vm0, %v1713_v22  ;;  %v1712_v25 = vadd.f32 %v1680_v12, %v2494_v49  ;;  %v2176_v26 = vpop.f32.mrf.mxu0 }
 0x288   : > { %v1683_v29 = vsel %vm1612_vm3, %v1522_v55, %v1651_v16  ;;  %vm1611_vm9 = vcmp.gt.f32.partialorder %v1517_v48, 0.0  ;;  %v1650_v8 = vmul.f32 %v2716_v19, %v1517_v48  ;;  %v1532_v0 = vadd.f32 %v2176_v26, %v2711_v1 }
 0x289   : > { %1744 = vst.msk [vmem:[%s2726_s14 + $0x70] sm:$0xff] %vm404_vm0, %v1712_v25  ;;  %v1715_v31 = vadd.f32 %v1683_v29, %v2515_v7  ;;  %v1526_v32 = vpop.f32.mrf.mxu0 }
 0x28a   : > { %v1682_v34 = vsel %vm1611_vm9, %v1517_v48, %v1650_v8  ;;  %vm1614_vm10 = vcmp.gt.f32.partialorder %v1532_v0, 0.0  ;;  %v1653_v35 = vmul.f32 %v2716_v19, %v1532_v0  ;;  %v1527_v49 = vadd.f32 %v2711_v1, %v1526_v32 }
 0x28b   : > { %1747 = vst.msk [vmem:[%s2726_s14 + $0x88] sm:$0xff] %vm404_vm0, %v1715_v31  ;;  %v1714_v21 = vadd.f32 %v1682_v34, %v2508_v3  ;;  %v2179_v38 = vpop.f32.mrf.mxu0 }
 0x28c   : > { %v1685_v41 = vsel %vm1614_vm10, %v1532_v0, %v1653_v35  ;;  %vm1613_vm11 = vcmp.gt.f32.partialorder %v1527_v49, 0.0  ;;  %v1652_v43 = vmul.f32 %v2716_v19, %v1527_v49  ;;  %v1542_v7 = vadd.f32 %v2179_v38, %v2711_v1 }
 0x28d   : > { %1746 = vst.msk [vmem:[%s2726_s14 + $0x80] sm:$0xff] %vm404_vm0, %v1714_v21  ;;  %v1717_v45 = vadd.f32 %v1685_v41, %v2528_v15  ;;  %v1536_v18 = vpop.f32.mrf.mxu0 }
 0x28e   : > { %v1684_v46 = vsel %vm1613_vm11, %v1527_v49, %v1652_v43  ;;  %vm1616_vm12 = vcmp.gt.f32.partialorder %v1542_v7, 0.0  ;;  %v1655_v50 = vmul.f32 %v2716_v19, %v1542_v7  ;;  %v1537_v3 = vadd.f32 %v2711_v1, %v1536_v18 }
 0x28f   : > { %1749 = vst.msk [vmem:[%s2726_s14 + $0x98] sm:$0xff] %vm404_vm0, %v1717_v45  ;;  %v1716_v54 = vadd.f32 %v1684_v46, %v2521_v11  ;;  %v2182_v51 = vpop.f32.mrf.mxu0 }
 0x290   : > { %v1687_v30 = vsel %vm1616_vm12, %v1542_v7, %v1655_v50  ;;  %vm1615_vm13 = vcmp.gt.f32.partialorder %v1537_v3, 0.0  ;;  %v1654_v56 = vmul.f32 %v2716_v19, %v1537_v3  ;;  %v1552_v15 = vadd.f32 %v2182_v51, %v2711_v1 }
 0x291   : > { %1748 = vst.msk [vmem:[%s2726_s14 + $0x90] sm:$0xff] %vm404_vm0, %v1716_v54  ;;  %v1719_v58 = vadd.f32 %v1687_v30, %v2541_v24  ;;  %v1546_v42 = vpop.f32.mrf.mxu0 }
 0x292   : > { %v1686_v52 = vsel %vm1615_vm13, %v1537_v3, %v1654_v56  ;;  %vm1618_vm14 = vcmp.gt.f32.partialorder %v1552_v15, 0.0  ;;  %v1657_v27 = vmul.f32 %v2716_v19, %v1552_v15  ;;  %v1547_v11 = vadd.f32 %v2711_v1, %v1546_v42 }
 0x293   : > { %1751 = vst.msk [vmem:[%s2726_s14 + $0xa8] sm:$0xff] %vm404_vm0, %v1719_v58  ;;  %v1718_v63 = vadd.f32 %v1686_v52, %v2534_v20  ;;  %v2185_v59 = vpop.f32.mrf.mxu0 }
 0x294   : > { %v1689_v6 = vsel %vm1618_vm14, %v1552_v15, %v1657_v27  ;;  %vm1617_vm15 = vcmp.gt.f32.partialorder %v1547_v11, 0.0  ;;  %v1656_v10 = vmul.f32 %v2716_v19, %v1547_v11  ;;  %v1562_v24 = vadd.f32 %v2185_v59, %v2711_v1 }
 0x295   : > { %1750 = vst.msk [vmem:[%s2726_s14 + $0xa0] sm:$0xff] %vm404_vm0, %v1718_v63  ;;  %v1721_v40 = vadd.f32 %v1689_v6, %v2553_v33  ;;  %v1556_v2 = vpop.f32.mrf.mxu0 }
 0x296   : > { %v1688_v9 = vsel %vm1617_vm15, %v1547_v11, %v1656_v10  ;;  %vm1620_vm1 = vcmp.gt.f32.partialorder %v1562_v24, 0.0  ;;  %v1659_v13 = vmul.f32 %v2716_v19, %v1562_v24  ;;  %v1557_v20 = vadd.f32 %v2711_v1, %v1556_v2 }
 0x297   : > { %1753 = vst.msk [vmem:[%s2726_s14 + $0xb8] sm:$0xff] %vm404_vm0, %v1721_v40  ;;  %v1720_v14 = vadd.f32 %v1688_v9, %v2547_v28  ;;  %v2188_v36 = vpop.f32.mrf.mxu0 }
 0x298   : > { %v1691_v5 = vsel %vm1620_vm1, %v1562_v24, %v1659_v13  ;;  %vm1619_vm2 = vcmp.gt.f32.partialorder %v1557_v20, 0.0  ;;  %v1658_v62 = vmul.f32 %v2716_v19, %v1557_v20  ;;  %v1572_v33 = vadd.f32 %v2188_v36, %v2711_v1 }
 0x299   : > { %1752 = vst.msk [vmem:[%s2726_s14 + $0xb0] sm:$0xff] %vm404_vm0, %v1720_v14  ;;  %v1723_v17 = vadd.f32 %v1691_v5, %v2565_v44  ;;  %v1566_v4 = vpop.f32.mrf.mxu0 }
 0x29a   : > { %v1690_v55 = vsel %vm1619_vm2, %v1557_v20, %v1658_v62  ;;  %vm1622_vm4 = vcmp.gt.f32.partialorder %v1572_v33, 0.0  ;;  %v1661_v22 = vmul.f32 %v2716_v19, %v1572_v33  ;;  %v1567_v28 = vadd.f32 %v2711_v1, %v1566_v4 }
 0x29b   : > { %1755 = vst.msk [vmem:[%s2726_s14 + $0xc8] sm:$0xff] %vm404_vm0, %v1723_v17  ;;  %v1722_v23 = vadd.f32 %v1690_v55, %v2559_v37  ;;  %v2191_v12 = vpop.f32.mrf.mxu0 }
 0x29c   : > { %v1693_v16 = vsel %vm1622_vm4, %v1572_v33, %v1661_v22  ;;  %vm1621_vm5 = vcmp.gt.f32.partialorder %v1567_v28, 0.0  ;;  %v1660_v48 = vmul.f32 %v2716_v19, %v1567_v28  ;;  %v1582_v44 = vadd.f32 %v2191_v12, %v2711_v1 }
 0x29d   : > { %1754 = vst.msk [vmem:[%s2726_s14 + $0xc0] sm:$0xff] %vm404_vm0, %v1722_v23  ;;  %v1725_v25 = vadd.f32 %v1693_v16, %v2577_v53  ;;  %v1576_v26 = vpop.f32.mrf.mxu0 }
 0x29e   : > { %v1692_v29 = vsel %vm1621_vm5, %v1567_v28, %v1660_v48  ;;  %vm1624_vm6 = vcmp.gt.f32.partialorder %v1582_v44, 0.0  ;;  %v1663_v8 = vmul.f32 %v2716_v19, %v1582_v44  ;;  %v1577_v37 = vadd.f32 %v2711_v1, %v1576_v26 }
 0x29f   : > { %1757 = vst.msk [vmem:[%s2726_s14 + $0xd8] sm:$0xff] %vm404_vm0, %v1725_v25  ;;  %v1724_v0 = vadd.f32 %v1692_v29, %v2571_v47  ;;  %v2194_v31 = vpop.f32.mrf.mxu0 }
 0x2a0   : > { %v1695_v32 = vsel %vm1624_vm6, %v1582_v44, %v1663_v8  ;;  %vm1623_vm7 = vcmp.gt.f32.partialorder %v1577_v37, 0.0  ;;  %v1662_v34 = vmul.f32 %v2716_v19, %v1577_v37  ;;  %v1592_v53 = vadd.f32 %v2194_v31, %v2711_v1 }
 0x2a1   : > { %1756 = vst.msk [vmem:[%s2726_s14 + $0xd0] sm:$0xff] %vm404_vm0, %v1724_v0  ;;  %v1727_v35 = vadd.f32 %v1695_v32, %v2587_v60  ;;  %v1586_v49 = vpop.f32.mrf.mxu0 }
 0x2a2   : > { %v1694_v21 = vsel %vm1623_vm7, %v1577_v37, %v1662_v34  ;;  %vm1626_vm8 = vcmp.gt.f32.partialorder %v1592_v53, 0.0  ;;  %v1665_v38 = vmul.f32 %v2716_v19, %v1592_v53  ;;  %v1587_v47 = vadd.f32 %v2711_v1, %v1586_v49 }
 0x2a3   : > { %1759 = vst.msk [vmem:[%s2726_s14 + $0xe8] sm:$0xff] %vm404_vm0, %v1727_v35  ;;  %v1726_v41 = vadd.f32 %v1694_v21, %v2582_v57 }
 0x2a4   : > { %v1697_v43 = vsel %vm1626_vm8, %v1592_v53, %v1665_v38  ;;  %vm1625_vm3 = vcmp.gt.f32.partialorder %v1587_v47, 0.0  ;;  %v1664_v7 = vmul.f32 %v2716_v19, %v1587_v47 }
 0x2a5   : > { %1758 = vst.msk [vmem:[%s2726_s14 + $0xe0] sm:$0xff] %vm404_vm0, %v1726_v41  ;;  %v1729_v60 = vadd.f32 %v1697_v43, %v2595_v61 }
 0x2a6   : > { %v1696_v45 = vsel %vm1625_vm3, %v1587_v47, %v1664_v7 }
 0x2a7   : > { %1761 = vst.msk [vmem:[%s2726_s14 + $0xf8] sm:$0xff] %vm404_vm0, %v1729_v60  ;;  %v1728_v18 = vadd.f32 %v1696_v45, %v2591_v39 }
 0x2a9   : > { %1760 = vst.msk [vmem:[%s2726_s14 + $0xf0] sm:$0xff] %vm404_vm0, %v1728_v18 }
 0x2aa PF: > { %s20_s13 = sadd.s32 1, %s2213_s13  }
 0x2ab   : > { %p17_p4 = scmp.ge.s32.totalorder %s20_s13, 6  }
 0x2ad   :  { %19 = sbr.rel (!%p17_p4) target bundleno = 1 (0x1), region = 90 }

// kernel: tpu_custom_call.1
= control target key start
LH: loop header
LB: loop body
LE: loop exit
PB: predicated region body
PF: predicated region fallthrough
CT: control target
= control target key end

     0   :  { %s3115_s0 = inlined_call_operand.hbm [shape: f32[1024,128], index: 0, kind: input, shape index: {}]   ;;  %s3116_s1 = inlined_call_operand.hbm [shape: f32[128,128], index: 1, kind: input, shape index: {}]   ;;  %s3117_s2 = inlined_call_operand.vmem [shape: f32[1,128], index: 2, kind: input, shape index: {}]   ;;  %s3118_s3 = inlined_call_operand.vmem [shape: f32[1,128], index: 3, kind: input, shape index: {}]   ;;  %s3119_s4 = inlined_call_operand.hbm [shape: f32[128,128], index: 4, kind: input, shape index: {}]   ;;  %s3120_s5 = inlined_call_operand.vmem [shape: f32[1,128], index: 5, kind: input, shape index: {}]   ;;  %s3121_s6 = inlined_call_operand.vmem [shape: f32[1,128], index: 6, kind: input, shape index: {}]   ;;  %s3122_s7 = inlined_call_operand.hbm [shape: f32[128,128], index: 7, kind: input, shape index: {}]   ;;  %s3123_s8 = inlined_call_operand.vmem [shape: f32[1,128], index: 8, kind: input, shape index: {}]   ;;  %s3124_s9 = inlined_call_operand.vmem [shape: f32[1,128], index: 9, kind: input, shape index: {}]   ;;  %s3125_s10 = inlined_call_operand.hbm [shape: f32[1024,128], index: 10, kind: output, shape index: {}]  }
   0x1   :  { %3132 = sst [smem:[#allocation16_spill]] %s3116_s1 }
   0x2   :  { %3133 = sst [smem:[#allocation17_spill]] %s3119_s4 }
   0x3   :  { %3134 = sst [smem:[#allocation18_spill]] %s3122_s7 }
   0x4   :  { %15 = vsyncpa [#allocation3], 0 }
   0x5   :  { %17 = vsyncpa [#allocation3 + $0x1], 0 }
   0x6   :  { %18 = vsyncpa [#allocation6], 0 }
   0x7   :  { %19 = vsyncpa [#allocation9], 0 }
   0x8   :  { %20 = vsyncpa [#allocation4], 0 }
   0x9   :  { %22 = vsyncpa [#allocation4 + $0x1], 0  ;;  %s2458_s13 = smov 0   ;;  %s2460_s14 = smov 0  }
   0xa   :  { %s2462_s15 = smov 0   ;;  %s2464_s16 = smov 0  }
   0xb LB: > { %s2479_s17 = sadd.s32 4294967295, %s2392_s16   ;;  %s1689_s18 = sadd.s32 4294967294, %s2392_s16   ;;  %s2392_s16 = sphi %s2464_s16, %s3159_s16   ;;  %s2388_s15 = sphi %s2462_s15, %s3158_s15   ;;  %s2384_s14 = sphi %s2460_s14, %s3157_s14   ;;  %s2380_s13 = sphi %s2458_s13, %s3156_s13  }
   0xc   : > { %p48_p0 = scmp.ne.s32.totalorder %s2384_s14, %s2380_s13  ;;  %p3126_p1 = scmp.eq.s32.totalorder %s2479_s17, 0 }
   0xd   : > { %p261_p2 = scmp.eq.s32.totalorder %s2479_s17, 3  ;;  %p267_p3 = scmp.eq.s32.totalorder %s1689_s18, 3 }
   0xe   : > { %p2488_p4 = por %p3126_p1, %p48_p0  ;;  %p1690_p5 = scmp.ge.s32.totalorder %s2392_s16, 1 }
   0xf   : > { %p2493_p6 = por %p267_p3, %p48_p0  ;;  %p274_p7 = scmp.lt.s32.totalorder %s2392_s16, 5 }
  0x10   : > { %s3135_s19 = scalar_select %p2488_p4, 1, 0 }
  0x11   : > { %s3136_s20 = scalar_select %p2493_p6, 1, 0 }
  0x12   : > { %p2498_p8 = pnand %p1690_p5, %p274_p7  ;;  %s2394_s22 = smov [#allocation5]  }
  0x13   : > { %s286_s23 = sshll.u32 %s2394_s22, 4  ;;  %s2395_s25 = smov [#allocation7]   ;;  %s287_s23 = int_to_ptr.vmem [resolvable:$true] %s286_s23 }
  0x14   : > { %s3137_s21 = scalar_select %p2498_p8, 1, 0 }
  0x15   : > { %p2149_p9 = pneg %p2498_p8  ;;  %s305_s26 = sshll.u32 %s2395_s25, 4  ;;  %s306_s26 = int_to_ptr.vmem [resolvable:$true] %s305_s26 }
  0x16   : > { %s2396_s27 = smov [#allocation8]   ;;  %s2225_s29 = scalar_lea.vmem %s287_s23, 2048 }
  0x17   : > { %p2506_p10 = pnand %p2149_p9, %p3126_p1  ;;  %s324_s28 = sshll.u32 %s2396_s27, 4  ;;  %s325_s28 = int_to_ptr.vmem [resolvable:$true] %s324_s28 }
  0x18   : > { %p2226_p12 = scmp.ne.s32.totalorder %s287_s23, %s2225_s29  ;;  %p2233_p3 = scmp.lt.s32.totalorder %s287_s23, %s287_s23 }
  0x19   : > { %p2216_p11 = pneg %p2506_p10  ;;  %p2234_p5 = scmp.lt.s32.totalorder %s2225_s29, %s2225_s29 }
  0x1b   : > { %p2228_p13 = pnand %p2226_p12, %p2216_p11  ;;  %p2235_p7 = por %p2234_p5, %p2233_p3 }
  0x1d   : > { %p2229_p0 = pneg %p2228_p13 }
  0x1f   : > { %p2236_p9 = pnand %p2235_p7, %p2229_p0 }
  0x21   : > { %2239 = shalt.err (!%p2236_p9)
}
  0x22   : > { %s3127_s30 = smov 128   ;;  %s3128_s11 = smov 8  }
  0x23   : > { %s3139_s1 = sld [smem:[#allocation16_spill]]  ;;  %s2251_s22 = scalar_lea.vmem %s306_s26, 2048 }
  0x24   : > { %p2252_p12 = scmp.ne.s32.totalorder %s306_s26, %s2251_s22  ;;  %p2259_p0 = scmp.lt.s32.totalorder %s306_s26, %s306_s26 }
  0x25   : > { %p2260_p5 = scmp.lt.s32.totalorder %s2251_s22, %s2251_s22 }
  0x26   : > { %p2254_p13 = pnand %p2252_p12, %p2216_p11 }
  0x27   : > { %p2261_p7 = por %p2260_p5, %p2259_p0 }
  0x28   : > { %p2255_p3 = pneg %p2254_p13 }
  0x29   : > { %2152 = dma.hbm_to_vmem [thread:$0]  (!%p2506_p10), %s3139_s1, 2048, %s287_s23, [#allocation6], %s3127_s30, %s3127_s30, %s3128_s11  }
  0x2a   : > { %p2262_p9 = pnand %p2261_p7, %p2255_p3 }
  0x2c   : > { %2265 = shalt.err (!%p2262_p9)
}
  0x2d   : > { %s3140_s4 = sld [smem:[#allocation17_spill]]  ;;  %s2277_s23 = scalar_lea.vmem %s325_s28, 2048 }
  0x2e   : > { %p2278_p1 = scmp.ne.s32.totalorder %s325_s28, %s2277_s23  ;;  %p2285_p0 = scmp.lt.s32.totalorder %s325_s28, %s325_s28 }
  0x2f   : > { %p2286_p3 = scmp.lt.s32.totalorder %s2277_s23, %s2277_s23 }
  0x30   : > { %p2280_p12 = pnand %p2278_p1, %p2216_p11 }
  0x31   : > { %p2287_p5 = por %p2286_p3, %p2285_p0 }
  0x32   : > { %p2281_p13 = pneg %p2280_p12 }
  0x33   : > { %2155 = dma.hbm_to_vmem [thread:$0]  (!%p2506_p10), %s3140_s4, 2048, %s306_s26, [#allocation6], %s3127_s30, %s3127_s30, %s3128_s11  }
  0x34   : > { %p2288_p7 = pnand %p2287_p5, %p2281_p13 }
  0x36   : > { %2291 = shalt.err (!%p2288_p7)
}
  0x37   : > { %s3141_s7 = sld [smem:[#allocation18_spill]]  ;;  %s2546_s26 = sadd.s32 1, %s2392_s16  }
  0x38   : > { %s32_s24 = ssub.s32 %s2392_s16, %s2546_s26  ;;  %s35_s18 = sadd.s32 1, %s2388_s15 }
  0x39   : > { %p33_p1 = scmp.eq.s32.totalorder %s32_s24, 0  ;;  %p42_p11 = scmp.ne.s32.totalorder %s2388_s15, %s2384_s14 }
  0x3a   : > { %p43_p9 = scmp.eq.s32.totalorder %s2392_s16, 0  ;;  %p2170_p12 = scmp.lt.s32.totalorder %s2392_s16, 4 }
  0x3b   : > { %s2556_s22 = scalar_select %p33_p1, %s2388_s15, %s35_s18  }
  0x3c   : > { %p44_p13 = por %p43_p9, %p42_p11  ;;  %p2560_p0 = por %p261_p2, %p42_p11 }
  0x3d   : > { %2158 = dma.hbm_to_vmem [thread:$0]  (!%p2506_p10), %s3141_s7, 2048, %s325_s28, [#allocation9], %s3127_s30, %s3127_s30, %s3128_s11  }
  0x3e   : > { %3142 = sst [smem:[#allocation15_spill]] %s2556_s22  ;;  %s344_s27 = sand.u32 1, %s2388_s15  }
  0x3f   : > { %s3143_s25 = scalar_select %p2560_p0, 1, 0 }
  0x40   : > { %s1715_s23 = sshll.u32 %s2392_s16, 12  ;;  %s1695_s28 = sshll.u32 %s344_s27, 8 }
  0x41   : > { %s2569_s30 = scalar_lea.hbm %s3115_s0, %s1715_s23  ;;  %s348_s24 = scalar_lea.vmem [#allocation2], %s1695_s28 }
  0x42   : > { %s355_s18 = sshll.u32 %s348_s24, 4  ;;  %p2571_p10 = pnand %p2170_p12, %p44_p13  ;;  %s2575_s18 = int_to_ptr.vmem [resolvable:$true] %s355_s18 }
  0x43   : > { %s2577_s1 = scalar_lea.sflag [#allocation3], %s344_s27  ;;  %s2292_s4 = scalar_lea.hbm %s2569_s30, 4096 }
  0x44   : > { %p2293_p2 = scmp.ne.s32.totalorder %s2569_s30, %s2292_s4  ;;  %p2294_p3 = pneg %p2571_p10 }
  0x45   : > { %s2297_s28 = scalar_lea.hbm %s3115_s0, 16384  ;;  %p2298_p1 = scmp.lt.s32.totalorder %s2569_s30, %s3115_s0 }
  0x46   : > { %p2295_p5 = pnand %p2294_p3, %p2293_p2  ;;  %p2299_p11 = scmp.lt.s32.totalorder %s2297_s28, %s2292_s4 }
  0x48   : > { %p2296_p7 = pneg %p2295_p5  ;;  %p2300_p9 = por %p2299_p11, %p2298_p1 }
  0x4a   : > { %p2301_p12 = pnand %p2300_p9, %p2296_p7 }
  0x4c   : > { %2304 = shalt.err (!%p2301_p12)
}
  0x4d   : > { %s2305_s27 = scalar_lea.vmem %s2575_s18, 4096  ;;  %s2399_s7 = smov [#allocation2]  }
  0x4e   : > { %p2306_p13 = scmp.ne.s32.totalorder %s2575_s18, %s2305_s27  ;;  %s2310_s22 = sshll.u32 %s2399_s7, 4  ;;  %s2311_s22 = int_to_ptr.vmem [resolvable:$false] %s2310_s22 }
  0x4f   : > { %s2312_s23 = scalar_lea.vmem %s2311_s22, 8192  ;;  %p2313_p5 = scmp.lt.s32.totalorder %s2575_s18, %s2311_s22 }
  0x50   : > { %p2308_p6 = pnand %p2306_p13, %p2294_p3  ;;  %p2314_p0 = scmp.lt.s32.totalorder %s2312_s23, %s2305_s27 }
  0x52   : > { %p2309_p2 = pneg %p2308_p6  ;;  %p2315_p4 = por %p2314_p0, %p2313_p5 }
  0x54   : > { %p2316_p8 = pnand %p2315_p4, %p2309_p2 }
  0x56   : > { %2319 = shalt.err (!%p2316_p8)
}
  0x57   : > { %s3145_s4 = smov 8   ;;  %s3146_s29 = smov 128  }
  0x58   : > { %2162 = dma.hbm_to_vmem [thread:$0]  (!%p2571_p10), %s2569_s30, 4096, %s2575_s18, %s2577_s1, %s3146_s29, %s3146_s29, %s3145_s4  }
  0x59   : > { %p3147_p6 = scmp.ne.s32.totalorder %s3137_s21, 0 }
  0x5a   : > { %s2604_s7 = sand.u32 (!%p3147_p6), 1, %s2384_s14   ;;  %p3148_p4 = scmp.ne.s32.totalorder (!%p3147_p6), %s3135_s19, 0 }
  0x5b   : > { %367 = sbr.rel (%p3147_p6) target bundleno = 815 (0x32f), region = 60  ;;  %s1699_s22 = sshll.u32 (!%p3147_p6), %s2604_s7, 8 }
  0x5c   : > { %s370_s28 = scalar_lea.sflag (!%p3147_p6), [#allocation3], %s2604_s7  ;;  %s2610_s11 = scalar_lea.vmem (!%p3147_p6), [#allocation2], %s1699_s22 }
  0x60   : > { %2363 = dma.done.wait (%p3148_p4), %s370_s28, 4096  }
  0x61   : > { %2365 = vsyncadd (%p3148_p4), %s370_s28, 4294963200  ;;  %p3149_p8 = scmp.eq.s32.totalorder %s2479_s17, 0 }
  0x63   : > { %2367 = dma.done.wait (%p3149_p8), [#allocation6], 4096   ;;  %p3150_p0 = pmov %p3149_p8 }
  0x65   : > { %2369 = vsyncadd (%p3150_p0), [#allocation6], 4294963200  ;;  %p3151_p10 = pmov %p3150_p0 }
  0x66   : > { %p3152_p3 = pmov %p3150_p0 }
  0x67   : > { %2371 = dma.done.wait (%p3151_p10), [#allocation9], 2048  }
  0x68   : > { %2373 = vsyncadd (%p3152_p3), [#allocation9], 4294965248  ;;  %v471_v0 = vld [vmem:[#allocation5 + $0x78] sm:$0xff]  ;;  %v470_v1 = vld [vmem:[#allocation5 + $0x70] sm:$0xff]  ;;  %p3153_p1 = scmp.ne.s32.totalorder %s3143_s25, 0  ;;  %s2400_s12 = smov [#allocation10]  }
  0x69   : > { %1861 = vmatprep.subr.mxu0 %v471_v0  ;;  %2101 = vmatprep.subr.mxu1 %v471_v0  ;;  %v469_v2 = vld [vmem:[#allocation5 + $0x68] sm:$0xff]  ;;  %v468_v3 = vld [vmem:[#allocation5 + $0x60] sm:$0xff]  ;;  %v467_v5 = vld [vmem:[#allocation5 + $0x58] sm:$0xff]  ;;  %s2324_s24 = sshll.u32 %s2400_s12, 4  ;;  %s2325_s24 = int_to_ptr.vmem [resolvable:$false] %s2324_s24 }
  0x6a   : > { %1862 = vmatpush3.msra.mxu0 %v471_v0  ;;  %2117 = vmatpush3.msra.mxu1 %v471_v0  ;;  %v424_v4 = vld [vmem:[%s2610_s11] sm:$0xff]  ;;  %v466_v6 = vld [vmem:[#allocation5 + $0x50] sm:$0xff]  ;;  %v465_v7 = vld [vmem:[#allocation5 + $0x48] sm:$0xff]  ;;  %s2326_s27 = scalar_lea.vmem %s2325_s24, 8192 }
  0x6b   : > { %1863 = vmatprep.subr.mxu0 %v470_v1  ;;  %2102 = vmatprep.subr.mxu1 %v470_v1  ;;  %v464_v8 = vld [vmem:[#allocation5 + $0x40] sm:$0xff]  ;;  %v463_v9 = vld [vmem:[#allocation5 + $0x38] sm:$0xff]  ;;  %v462_v10 = vld [vmem:[#allocation5 + $0x30] sm:$0xff] }
  0x6c   : > { %1864 = vmatpush3.msra.mxu0 %v470_v1  ;;  %2118 = vmatpush3.msra.mxu1 %v470_v1  ;;  %v461_v11 = vld [vmem:[#allocation5 + $0x28] sm:$0xff]  ;;  %v460_v12 = vld [vmem:[#allocation5 + $0x20] sm:$0xff]  ;;  %v459_v13 = vld [vmem:[#allocation5 + $0x18] sm:$0xff] }
  0x6d   : > { %1865 = vmatprep.subr.mxu0 %v469_v2  ;;  %2103 = vmatprep.subr.mxu1 %v469_v2  ;;  %v458_v14 = vld [vmem:[#allocation5 + $0x10] sm:$0xff]  ;;  %v457_v15 = vld [vmem:[#allocation5 + $0x8] sm:$0xff]  ;;  %v456_v16 = vld [vmem:[#allocation5] sm:$0xff] }
  0x6e   : > { %1866 = vmatpush3.msra.mxu0 %v469_v2  ;;  %1893 = vmatprep.mubr.f32.mxu0 %v424_v4  ;;  %v425_v17 = vld [vmem:[%s2610_s11 + $0x8] sm:$0xff]  ;;  %v426_v18 = vld [vmem:[%s2610_s11 + $0x10] sm:$0xff]  ;;  %v440_v19 = vld [vmem:[%s2610_s11 + $0x80] sm:$0xff] }
  0x6f   : > { %1867 = vmatprep.subr.mxu0 %v468_v3  ;;  %2119 = vmatpush3.msra.mxu1 %v469_v2  ;;  %v441_v20 = vld [vmem:[%s2610_s11 + $0x88] sm:$0xff]  ;;  %v822_v21 = vld [vmem:[#allocation7 + $0x78] sm:$0xff]  ;;  %v442_v22 = vld [vmem:[%s2610_s11 + $0x90] sm:$0xff] }
  0x70   : > { %1868 = vmatpush3.msra.mxu0 %v468_v3  ;;  %2104 = vmatprep.subr.mxu1 %v468_v3  ;;  %v427_v23 = vld [vmem:[%s2610_s11 + $0x18] sm:$0xff]  ;;  %v821_v24 = vld [vmem:[#allocation7 + $0x70] sm:$0xff]  ;;  %v428_v25 = vld [vmem:[%s2610_s11 + $0x20] sm:$0xff] }
  0x71   : > { %1869 = vmatprep.subr.mxu0 %v467_v5  ;;  %2120 = vmatpush3.msra.mxu1 %v468_v3  ;;  %v443_v26 = vld [vmem:[%s2610_s11 + $0x98] sm:$0xff]  ;;  %v820_v27 = vld [vmem:[#allocation7 + $0x68] sm:$0xff]  ;;  %v444_v28 = vld [vmem:[%s2610_s11 + $0xa0] sm:$0xff] }
  0x72   : > { %1870 = vmatpush3.msra.mxu0 %v467_v5  ;;  %2105 = vmatprep.subr.mxu1 %v467_v5  ;;  %v429_v29 = vld [vmem:[%s2610_s11 + $0x28] sm:$0xff]  ;;  %v819_v30 = vld [vmem:[#allocation7 + $0x60] sm:$0xff]  ;;  %v430_v31 = vld [vmem:[%s2610_s11 + $0x30] sm:$0xff] }
  0x73   : > { %1871 = vmatprep.subr.mxu0 %v466_v6  ;;  %2121 = vmatpush3.msra.mxu1 %v467_v5  ;;  %v445_v32 = vld [vmem:[%s2610_s11 + $0xa8] sm:$0xff]  ;;  %v818_v33 = vld [vmem:[#allocation7 + $0x58] sm:$0xff]  ;;  %v446_v34 = vld [vmem:[%s2610_s11 + $0xb0] sm:$0xff] }
  0x74   : > { %1872 = vmatpush3.msra.mxu0 %v466_v6  ;;  %2106 = vmatprep.subr.mxu1 %v466_v6  ;;  %v431_v35 = vld [vmem:[%s2610_s11 + $0x38] sm:$0xff]  ;;  %v817_v36 = vld [vmem:[#allocation7 + $0x50] sm:$0xff]  ;;  %v432_v37 = vld [vmem:[%s2610_s11 + $0x40] sm:$0xff] }
  0x75   : > { %1873 = vmatprep.subr.mxu0 %v465_v7  ;;  %2122 = vmatpush3.msra.mxu1 %v466_v6  ;;  %v447_v38 = vld [vmem:[%s2610_s11 + $0xb8] sm:$0xff]  ;;  %v816_v39 = vld [vmem:[#allocation7 + $0x48] sm:$0xff]  ;;  %v448_v40 = vld [vmem:[%s2610_s11 + $0xc0] sm:$0xff] }
  0x76   : > { %1874 = vmatpush3.msra.mxu0 %v465_v7  ;;  %2107 = vmatprep.subr.mxu1 %v465_v7  ;;  %v433_v41 = vld [vmem:[%s2610_s11 + $0x48] sm:$0xff]  ;;  %v815_v42 = vld [vmem:[#allocation7 + $0x40] sm:$0xff]  ;;  %v434_v43 = vld [vmem:[%s2610_s11 + $0x50] sm:$0xff] }
  0x77   : > { %1875 = vmatprep.subr.mxu0 %v464_v8  ;;  %2123 = vmatpush3.msra.mxu1 %v465_v7  ;;  %v449_v44 = vld [vmem:[%s2610_s11 + $0xc8] sm:$0xff]  ;;  %v814_v45 = vld [vmem:[#allocation7 + $0x38] sm:$0xff]  ;;  %v450_v46 = vld [vmem:[%s2610_s11 + $0xd0] sm:$0xff] }
  0x78   : > { %1876 = vmatpush3.msra.mxu0 %v464_v8  ;;  %2108 = vmatprep.subr.mxu1 %v464_v8  ;;  %v435_v47 = vld [vmem:[%s2610_s11 + $0x58] sm:$0xff]  ;;  %v813_v48 = vld [vmem:[#allocation7 + $0x30] sm:$0xff]  ;;  %v436_v49 = vld [vmem:[%s2610_s11 + $0x60] sm:$0xff] }
  0x79   : > { %1877 = vmatprep.subr.mxu0 %v463_v9  ;;  %2124 = vmatpush3.msra.mxu1 %v464_v8  ;;  %v451_v50 = vld [vmem:[%s2610_s11 + $0xd8] sm:$0xff]  ;;  %v812_v51 = vld [vmem:[#allocation7 + $0x28] sm:$0xff]  ;;  %v452_v52 = vld [vmem:[%s2610_s11 + $0xe0] sm:$0xff] }
  0x7a   : > { %1878 = vmatpush3.msra.mxu0 %v463_v9  ;;  %2109 = vmatprep.subr.mxu1 %v463_v9  ;;  %v437_v53 = vld [vmem:[%s2610_s11 + $0x68] sm:$0xff]  ;;  %v811_v54 = vld [vmem:[#allocation7 + $0x20] sm:$0xff]  ;;  %v438_v55 = vld [vmem:[%s2610_s11 + $0x70] sm:$0xff] }
  0x7b   : > { %1879 = vmatprep.subr.mxu0 %v462_v10  ;;  %2125 = vmatpush3.msra.mxu1 %v463_v9  ;;  %v453_v56 = vld [vmem:[%s2610_s11 + $0xe8] sm:$0xff]  ;;  %v454_v57 = vld [vmem:[%s2610_s11 + $0xf0] sm:$0xff]  ;;  %v439_v58 = vld [vmem:[%s2610_s11 + $0x78] sm:$0xff] }
  0x7c   : > { %1880 = vmatpush3.msra.mxu0 %v462_v10  ;;  %2110 = vmatprep.subr.mxu1 %v462_v10  ;;  %v455_v59 = vld [vmem:[%s2610_s11 + $0xf8] sm:$0xff]  ;;  %v809_v61 = vld [vmem:[#allocation7 + $0x10] sm:$0xff]  ;;  %v808_v62 = vld [vmem:[#allocation7 + $0x8] sm:$0xff]  ;;  %s2944_s11 = scalar_lea.vmem [#allocation10], %s1699_s22  ;;  %s1716_s22 = sshll.u32 %s2479_s17, 12 }
  0x7d   : > { %1881 = vmatprep.subr.mxu0 %v461_v11  ;;  %2126 = vmatpush3.msra.mxu1 %v462_v10  ;;  %v810_v60 = vld [vmem:[#allocation7 + $0x18] sm:$0xff]  ;;  %v807_v63 = vld [vmem:[#allocation7] sm:$0xff]  ;;  %v1172_v1 = vld [vmem:[#allocation8 + $0x70] sm:$0xff]  ;;  %s1587_s1 = sshll.u32 %s2944_s11, 4  ;;  %s3068_s30 = scalar_lea.hbm %s3125_s10, %s1716_s22  ;;  %s3070_s1 = int_to_ptr.vmem [resolvable:$true] %s1587_s1 }
  0x7e   : > { %1882 = vmatpush3.msra.mxu0 %v461_v11  ;;  %2111 = vmatprep.subr.mxu1 %v461_v11  ;;  %v1173_v0 = vld [vmem:[#allocation8 + $0x78] sm:$0xff]  ;;  %v1171_v2 = vld [vmem:[#allocation8 + $0x68] sm:$0xff]  ;;  %v1170_v3 = vld [vmem:[#allocation8 + $0x60] sm:$0xff]  ;;  %s1574_s17 = scalar_lea.sflag [#allocation4], %s2604_s7  ;;  %s2320_s18 = scalar_lea.vmem %s3070_s1, 4096 }
  0x7f   : > { %1883 = vmatprep.subr.mxu0 %v460_v12  ;;  %2127 = vmatpush3.msra.mxu1 %v461_v11  ;;  %v1169_v4 = vld [vmem:[#allocation8 + $0x58] sm:$0xff]  ;;  %v1168_v5 = vld [vmem:[#allocation8 + $0x50] sm:$0xff]  ;;  %v1167_v6 = vld [vmem:[#allocation8 + $0x48] sm:$0xff]  ;;  %p2321_p7 = scmp.ne.s32.totalorder %s3070_s1, %s2320_s18  ;;  %p2327_p12 = scmp.lt.s32.totalorder %s3070_s1, %s2325_s24 }
  0x80   : > { %1884 = vmatpush3.msra.mxu0 %v460_v12  ;;  %2112 = vmatprep.subr.mxu1 %v460_v12  ;;  %v1166_v7 = vld [vmem:[#allocation8 + $0x40] sm:$0xff]  ;;  %v1165_v8 = vld [vmem:[#allocation8 + $0x38] sm:$0xff]  ;;  %v1164_v9 = vld [vmem:[#allocation8 + $0x30] sm:$0xff]  ;;  %p2328_p13 = scmp.lt.s32.totalorder %s2326_s27, %s2320_s18 }
  0x81   : > { %1885 = vmatprep.subr.mxu0 %v459_v13  ;;  %2128 = vmatpush3.msra.mxu1 %v460_v12  ;;  %v1163_v10 = vld [vmem:[#allocation8 + $0x28] sm:$0xff]  ;;  %v1162_v11 = vld [vmem:[#allocation8 + $0x20] sm:$0xff]  ;;  %p2322_p11 = pnand %p2321_p7, %p3153_p1 }
  0x82   : > { %1886 = vmatpush3.msra.mxu0 %v459_v13  ;;  %2113 = vmatprep.subr.mxu1 %v459_v13  ;;  %v2659_v12 = vld [vmem:[%s3117_s2] ss:$0 sm:$0xff]  ;;  %p2329_p2 = por %p2328_p13, %p2327_p12 }
  0x83   : > { %1887 = vmatprep.subr.mxu0 %v458_v14  ;;  %2129 = vmatpush3.msra.mxu1 %v459_v13  ;;  %p2323_p9 = pneg %p2322_p11 }
  0x84   : > { %1888 = vmatpush3.msra.mxu0 %v458_v14  ;;  %2114 = vmatprep.subr.mxu1 %v458_v14 }
  0x85   : > { %1889 = vmatprep.subr.mxu0 %v457_v15  ;;  %2130 = vmatpush3.msra.mxu1 %v458_v14  ;;  %p2330_p5 = pnand %p2329_p2, %p2323_p9 }
  0x86   : > { %1890 = vmatpush3.msra.mxu0 %v457_v15  ;;  %2115 = vmatprep.subr.mxu1 %v457_v15 }
  0x87   : > { %1891 = vmatprep.subr.mxu0 %v456_v16  ;;  %2131 = vmatpush3.msra.mxu1 %v457_v15  ;;  %v2665_v15 = vld [vmem:[%s3118_s3] ss:$0 sm:$0xff] }
  0x88   : > { %1892 = vmatpush3.msra.mxu0 %v456_v16  ;;  %2116 = vmatprep.subr.mxu1 %v456_v16 }
  0x89   : > { %1894 = vmatmul.mubr.f32.vlgmr.msra.gmra.mxu0 %v425_v17  ;;  %2132 = vmatpush3.msra.mxu1 %v456_v16 }
  0x8a   : > { %1896 = vmatprep.mubr.f32.mxu0 %v426_v18  ;;  %1917 = vmatprep.mubr.f32.mxu1 %v440_v19 }
  0x8b   : > { %1918 = vmatmul.mubr.f32.vlgmr.msra.gmra.mxu1 %v441_v20  ;;  %1941 = vmatprep.subr.mxu1 %v822_v21 }
  0x8c   : > { %1920 = vmatprep.mubr.f32.mxu1 %v442_v22  ;;  %1942 = vmatpush3.msra.mxu1 %v822_v21 }
  0x8d   : > { %1897 = vmatmul.mubr.f32.gmra.mxu0 %v427_v23  ;;  %1943 = vmatprep.subr.mxu1 %v821_v24 }
  0x8e   : > { %1899 = vmatprep.mubr.f32.mxu0 %v428_v25  ;;  %1944 = vmatpush3.msra.mxu1 %v821_v24 }
  0x8f   : > { %1921 = vmatmul.mubr.f32.gmra.mxu1 %v443_v26  ;;  %1945 = vmatprep.subr.mxu1 %v820_v27 }
  0x90   : > { %1923 = vmatprep.mubr.f32.mxu1 %v444_v28  ;;  %1946 = vmatpush3.msra.mxu1 %v820_v27 }
  0x91   : > { %1900 = vmatmul.mubr.f32.gmra.mxu0 %v429_v29  ;;  %1947 = vmatprep.subr.mxu1 %v819_v30 }
  0x92   : > { %1902 = vmatprep.mubr.f32.mxu0 %v430_v31  ;;  %1948 = vmatpush3.msra.mxu1 %v819_v30 }
  0x93   : > { %1924 = vmatmul.mubr.f32.gmra.mxu1 %v445_v32  ;;  %1949 = vmatprep.subr.mxu1 %v818_v33 }
  0x94   : > { %1926 = vmatprep.mubr.f32.mxu1 %v446_v34  ;;  %1950 = vmatpush3.msra.mxu1 %v818_v33 }
  0x95   : > { %1903 = vmatmul.mubr.f32.gmra.mxu0 %v431_v35  ;;  %1951 = vmatprep.subr.mxu1 %v817_v36 }
  0x96   : > { %1905 = vmatprep.mubr.f32.mxu0 %v432_v37  ;;  %1952 = vmatpush3.msra.mxu1 %v817_v36 }
  0x97   : > { %1927 = vmatmul.mubr.f32.gmra.mxu1 %v447_v38  ;;  %1953 = vmatprep.subr.mxu1 %v816_v39 }
  0x98   : > { %1929 = vmatprep.mubr.f32.mxu1 %v448_v40  ;;  %1954 = vmatpush3.msra.mxu1 %v816_v39 }
  0x99   : > { %1906 = vmatmul.mubr.f32.gmra.mxu0 %v433_v41  ;;  %1955 = vmatprep.subr.mxu1 %v815_v42 }
  0x9a   : > { %1908 = vmatprep.mubr.f32.mxu0 %v434_v43  ;;  %1956 = vmatpush3.msra.mxu1 %v815_v42 }
  0x9b   : > { %1930 = vmatmul.mubr.f32.gmra.mxu1 %v449_v44  ;;  %1957 = vmatprep.subr.mxu1 %v814_v45 }
  0x9c   : > { %1932 = vmatprep.mubr.f32.mxu1 %v450_v46  ;;  %1958 = vmatpush3.msra.mxu1 %v814_v45 }
  0x9d   : > { %1909 = vmatmul.mubr.f32.gmra.mxu0 %v435_v47  ;;  %1959 = vmatprep.subr.mxu1 %v813_v48 }
  0x9e   : > { %1911 = vmatprep.mubr.f32.mxu0 %v436_v49  ;;  %1960 = vmatpush3.msra.mxu1 %v813_v48 }
  0x9f   : > { %1933 = vmatmul.mubr.f32.gmra.mxu1 %v451_v50  ;;  %1961 = vmatprep.subr.mxu1 %v812_v51 }
  0xa0   : > { %1935 = vmatprep.mubr.f32.mxu1 %v452_v52  ;;  %1962 = vmatpush3.msra.mxu1 %v812_v51 }
  0xa1   : > { %1912 = vmatmul.mubr.f32.gmra.mxu0 %v437_v53  ;;  %1963 = vmatprep.subr.mxu1 %v811_v54 }
  0xa2   : > { %1914 = vmatprep.mubr.f32.mxu0 %v438_v55  ;;  %1964 = vmatpush3.msra.mxu1 %v811_v54 }
  0xa3   : > { %1936 = vmatmul.mubr.f32.gmra.mxu1 %v453_v56  ;;  %1965 = vmatprep.subr.mxu1 %v810_v60 }
  0xa4   : > { %1938 = vmatprep.mubr.f32.mxu1 %v454_v57  ;;  %1966 = vmatpush3.msra.mxu1 %v810_v60 }
  0xa5   : > { %1915 = vmatmul.mubr.f32.gmra.mxu0 %v439_v58  ;;  %1967 = vmatprep.subr.mxu1 %v809_v61 }
  0xa6   : > { %1968 = vmatpush3.msra.mxu1 %v809_v61  ;;  %2021 = vmatprep.subr.mxu0 %v1173_v0 }
  0xa7   : > { %1939 = vmatmul.mubr.f32.gmra.mxu1 %v455_v59  ;;  %1969 = vmatprep.subr.mxu1 %v808_v62 }
  0xa8   : > { %1970 = vmatpush3.msra.mxu1 %v808_v62  ;;  %2022 = vmatpush3.msra.mxu0 %v1173_v0 }
  0xa9   : > { %1971 = vmatprep.subr.mxu1 %v807_v63  ;;  %2023 = vmatprep.subr.mxu0 %v1172_v1 }
  0xaa   : > { %1972 = vmatpush3.msra.mxu1 %v807_v63  ;;  %2024 = vmatpush3.msra.mxu0 %v1172_v1 }
  0xab   : > { %2025 = vmatprep.subr.mxu0 %v1171_v2 }
  0xac   : > { %2026 = vmatpush3.msra.mxu0 %v1171_v2 }
  0xad   : > { %2027 = vmatprep.subr.mxu0 %v1170_v3 }
  0xae   : > { %2028 = vmatpush3.msra.mxu0 %v1170_v3 }
  0xaf   : > { %2029 = vmatprep.subr.mxu0 %v1169_v4 }
  0xb0   : > { %2030 = vmatpush3.msra.mxu0 %v1169_v4 }
  0xb1   : > { %2031 = vmatprep.subr.mxu0 %v1168_v5 }
  0xb2   : > { %2032 = vmatpush3.msra.mxu0 %v1168_v5 }
  0xb3   : > { %2033 = vmatprep.subr.mxu0 %v1167_v6 }
  0xb4   : > { %2034 = vmatpush3.msra.mxu0 %v1167_v6 }
  0xb5   : > { %2035 = vmatprep.subr.mxu0 %v1166_v7 }
  0xb6   : > { %2036 = vmatpush3.msra.mxu0 %v1166_v7 }
  0xb7   : > { %2037 = vmatprep.subr.mxu0 %v1165_v8 }
  0xb8   : > { %2038 = vmatpush3.msra.mxu0 %v1165_v8 }
  0xb9   : > { %2039 = vmatprep.subr.mxu0 %v1164_v9 }
  0xba   : > { %2040 = vmatpush3.msra.mxu0 %v1164_v9 }
  0xbb   : > { %2041 = vmatprep.subr.mxu0 %v1163_v10 }
  0xbc   : > { %2042 = vmatpush3.msra.mxu0 %v1163_v10 }
  0xbd   : > { %2043 = vmatprep.subr.mxu0 %v1162_v11 }
  0xbe   : > { %2044 = vmatpush3.msra.mxu0 %v1162_v11 }
 0x149   : > { %v1895_v13 = vpop.f32.mrf.mxu0 }
 0x14a   : > { %v551_v14 = vadd.f32 %v1895_v13, %v2659_v12 }
 0x14b   : > { %v545_v16 = vpop.f32.mrf.mxu0  ;;  %v2667_v17 = vpop.f32.mrf.mxu1 }
 0x14c   : > { %v546_v18 = vadd.f32 %v2659_v12, %v545_v16  ;;  %v744_v19 = vmul.f32 %v2665_v15, %v551_v14  ;;  %vm705_vm0 = vcmp.gt.f32.partialorder %v551_v14, 0.0 }
 0x14d   : > { %v1898_v20 = vpop.f32.mrf.mxu0  ;;  %v2671_v21 = vpop.f32.mrf.mxu1 }
 0x14e   : > { %v743_v22 = vmul.f32 %v2665_v15, %v546_v18  ;;  %v561_v23 = vadd.f32 %v1898_v20, %v2659_v12  ;;  %vm704_vm1 = vcmp.gt.f32.partialorder %v546_v18, 0.0  ;;  %v2680_v28 = vsel %vm705_vm0, %v551_v14, %v744_v19 }
 0x14f   : > { %v555_v24 = vpop.f32.mrf.mxu0  ;;  %v2675_v25 = vpop.f32.mrf.mxu1  ;;  %v626_v14 = vadd.f32 %v2659_v12, %v2671_v21 }
 0x150   : > { %v556_v26 = vadd.f32 %v2659_v12, %v555_v24  ;;  %v2678_v27 = vsel %vm704_vm1, %v546_v18, %v743_v22  ;;  %v746_v29 = vmul.f32 %v2665_v15, %v561_v23  ;;  %vm707_vm3 = vcmp.gt.f32.partialorder %v561_v23, 0.0 }
 0x151   : > { %v1901_v30 = vpop.f32.mrf.mxu0  ;;  %1973 = vmatprep.mubr.f32.mxu1 %v2678_v27  ;;  %v2684_v31 = vpop.f32.mrf.mxu1  ;;  %v759_v21 = vmul.f32 %v2665_v15, %v626_v14  ;;  %vm720_vm0 = vcmp.gt.f32.partialorder %v626_v14, 0.0 }
 0x152   : > { %v745_v32 = vmul.f32 %v2665_v15, %v556_v26  ;;  %v571_v33 = vadd.f32 %v1901_v30, %v2659_v12  ;;  %1974 = vmatmul.mubr.f32.vlgmr.msra.gmra.mxu1 %v2680_v28  ;;  %vm706_vm2 = vcmp.gt.f32.partialorder %v556_v26, 0.0  ;;  %v2696_v40 = vsel %vm707_vm3, %v561_v23, %v746_v29 }
 0x153   : > { %v565_v34 = vpop.f32.mrf.mxu0  ;;  %v2689_v35 = vpop.f32.mrf.mxu1 }
 0x154   : > { %v566_v36 = vadd.f32 %v2659_v12, %v565_v34  ;;  %v2692_v37 = vsel %vm706_vm2, %v556_v26, %v745_v32  ;;  %v748_v38 = vmul.f32 %v2665_v15, %v571_v33  ;;  %vm709_vm5 = vcmp.gt.f32.partialorder %v571_v33, 0.0 }
 0x155   : > { %v1904_v39 = vpop.f32.mrf.mxu0  ;;  %1976 = vmatprep.mubr.f32.mxu1 %v2692_v37  ;;  %v2701_v44 = vpop.f32.mrf.mxu1  ;;  %v631_v26 = vadd.f32 %v2667_v17, %v2659_v12  ;;  %v636_v32 = vadd.f32 %v2659_v12, %v2684_v31 }
 0x156   : > { %v747_v41 = vmul.f32 %v2665_v15, %v566_v36  ;;  %v581_v42 = vadd.f32 %v1904_v39, %v2659_v12  ;;  %1977 = vmatmul.mubr.f32.gmra.mxu1 %v2696_v40  ;;  %vm708_vm4 = vcmp.gt.f32.partialorder %v566_v36, 0.0  ;;  %v2708_v49 = vsel %vm709_vm5, %v571_v33, %v748_v38 }
 0x157   : > { %v575_v43 = vpop.f32.mrf.mxu0  ;;  %v2713_v53 = vpop.f32.mrf.mxu1  ;;  %v760_v17 = vmul.f32 %v2665_v15, %v631_v26  ;;  %v761_v39 = vmul.f32 %v2665_v15, %v636_v32  ;;  %v646_v31 = vadd.f32 %v2659_v12, %v2701_v44  ;;  %vm721_vm1 = vcmp.gt.f32.partialorder %v631_v26, 0.0 }
 0x158   : > { %v576_v45 = vadd.f32 %v2659_v12, %v575_v43  ;;  %v2704_v46 = vsel %vm708_vm4, %v566_v36, %v747_v41  ;;  %v750_v47 = vmul.f32 %v2665_v15, %v581_v42  ;;  %vm711_vm7 = vcmp.gt.f32.partialorder %v581_v42, 0.0 }
 0x159   : > { %v1907_v48 = vpop.f32.mrf.mxu0  ;;  %1979 = vmatprep.mubr.f32.mxu1 %v2704_v46  ;;  %v655_v62 = vpop.f32.mrf.mxu1  ;;  %v641_v36 = vadd.f32 %v2675_v25, %v2659_v12  ;;  %v2775_v41 = vsel %vm720_vm0, %v626_v14, %v759_v21  ;;  %vm722_vm2 = vcmp.gt.f32.partialorder %v636_v32, 0.0  ;;  %v651_v43 = vadd.f32 %v2689_v35, %v2659_v12 }
 0x15a   : > { %v749_v50 = vmul.f32 %v2665_v15, %v576_v45  ;;  %v591_v51 = vadd.f32 %v1907_v48, %v2659_v12  ;;  %1980 = vmatmul.mubr.f32.gmra.mxu1 %v2708_v49  ;;  %vm710_vm6 = vcmp.gt.f32.partialorder %v576_v45, 0.0  ;;  %v2720_v58 = vsel %vm711_vm7, %v581_v42, %v750_v47 }
 0x15b   : > { %v585_v52 = vpop.f32.mrf.mxu0  ;;  %v2735_v7 = vpop.f32.mrf.mxu1  ;;  %v762_v25 = vmul.f32 %v2665_v15, %v641_v36  ;;  %v763_v47 = vmul.f32 %v2665_v15, %v646_v31  ;;  %v656_v44 = vadd.f32 %v2659_v12, %v655_v62  ;;  %v2786_v48 = vsel %vm722_vm2, %v636_v32, %v761_v39  ;;  %v1161_v39 = vld [vmem:[#allocation8 + $0x18] sm:$0xff] }
 0x15c   : > { %v586_v54 = vadd.f32 %v2659_v12, %v585_v52  ;;  %v2716_v55 = vsel %vm710_vm6, %v576_v45, %v749_v50  ;;  %v752_v56 = vmul.f32 %v2665_v15, %v591_v51  ;;  %vm713_vm9 = vcmp.gt.f32.partialorder %v591_v51, 0.0  ;;  %2045 = vmatprep.subr.mxu0 %v1161_v39 }
 0x15d   : > { %v1910_v57 = vpop.f32.mrf.mxu0  ;;  %1982 = vmatprep.mubr.f32.mxu1 %v2716_v55  ;;  %v665_v20 = vpop.f32.mrf.mxu1  ;;  %v2781_v45 = vsel %vm721_vm1, %v631_v26, %v760_v17  ;;  %vm723_vm3 = vcmp.gt.f32.partialorder %v641_v36, 0.0  ;;  %vm724_vm4 = vcmp.gt.f32.partialorder %v646_v31, 0.0  ;;  %v661_v35 = vadd.f32 %v2713_v53, %v2659_v12  ;;  %2046 = vmatpush3.msra.mxu0 %v1161_v39 }
 0x15e   : > { %v751_v59 = vmul.f32 %v2665_v15, %v586_v54  ;;  %v601_v60 = vadd.f32 %v1910_v57, %v2659_v12  ;;  %1983 = vmatmul.mubr.f32.gmra.mxu1 %v2720_v58  ;;  %vm712_vm8 = vcmp.gt.f32.partialorder %v586_v54, 0.0  ;;  %v2730_v3 = vsel %vm713_vm9, %v591_v51, %v752_v56 }
 0x15f   : > { %v595_v61 = vpop.f32.mrf.mxu0  ;;  %v1934_v33 = vpop.f32.mrf.mxu1  ;;  %v764_v51 = vmul.f32 %v2665_v15, %v651_v43  ;;  %v2792_v52 = vsel %vm723_vm3, %v641_v36, %v762_v25  ;;  %v666_v56 = vadd.f32 %v2659_v12, %v665_v20  ;;  %v2797_v57 = vsel %vm724_vm4, %v646_v31, %v763_v47  ;;  %v1160_v31 = vld [vmem:[#allocation8 + $0x10] sm:$0xff]  ;;  %v2853_v25 = vld [vmem:[%s3120_s5] ss:$0 sm:$0xff] }
 0x160   : > { %v596_v63 = vadd.f32 %v2659_v12, %v595_v61  ;;  %v2726_v0 = vsel %vm712_vm8, %v586_v54, %v751_v59  ;;  %v754_v1 = vmul.f32 %v2665_v15, %v601_v60  ;;  %vm715_vm11 = vcmp.gt.f32.partialorder %v601_v60, 0.0  ;;  %2047 = vmatprep.subr.mxu0 %v1160_v31 }
 0x161   : > { %v1913_v2 = vpop.f32.mrf.mxu0  ;;  %1985 = vmatprep.mubr.f32.mxu1 %v2726_v0  ;;  %v675_v42 = vpop.f32.mrf.mxu1  ;;  %v765_v54 = vmul.f32 %v2665_v15, %v656_v44  ;;  %vm725_vm5 = vcmp.gt.f32.partialorder %v651_v43, 0.0  ;;  %vm726_vm6 = vcmp.gt.f32.partialorder %v656_v44, 0.0  ;;  %v671_v53 = vadd.f32 %v2735_v7, %v2659_v12  ;;  %2048 = vmatpush3.msra.mxu0 %v1160_v31 }
 0x162   : > { %v753_v4 = vmul.f32 %v2665_v15, %v596_v63  ;;  %v611_v5 = vadd.f32 %v1913_v2, %v2659_v12  ;;  %1986 = vmatmul.mubr.f32.gmra.mxu1 %v2730_v3  ;;  %vm714_vm10 = vcmp.gt.f32.partialorder %v596_v63, 0.0  ;;  %v2742_v13 = vsel %vm715_vm11, %v601_v60, %v754_v1 }
 0x163   : > { %v605_v6 = vpop.f32.mrf.mxu0  ;;  %v1937_v50 = vpop.f32.mrf.mxu1  ;;  %v766_v60 = vmul.f32 %v2665_v15, %v661_v35  ;;  %v2803_v61 = vsel %vm725_vm5, %v651_v43, %v764_v51  ;;  %v767_v62 = vmul.f32 %v2665_v15, %v666_v56  ;;  %v2808_v1 = vsel %vm726_vm6, %v656_v44, %v765_v54  ;;  %v2859_v44 = vld [vmem:[%s3121_s6] ss:$0 sm:$0xff] }
 0x164   : > { %v606_v8 = vadd.f32 %v2659_v12, %v605_v6  ;;  %v2738_v9 = vsel %vm714_vm10, %v596_v63, %v753_v4  ;;  %v756_v10 = vmul.f32 %v2665_v15, %v611_v5  ;;  %vm717_vm13 = vcmp.gt.f32.partialorder %v611_v5, 0.0 }
 0x165   : > { %v1916_v11 = vpop.f32.mrf.mxu0  ;;  %1988 = vmatprep.mubr.f32.mxu1 %v2738_v9  ;;  %v685_v59 = vpop.f32.mrf.mxu1  ;;  %v676_v63 = vadd.f32 %v2659_v12, %v675_v42  ;;  %vm727_vm7 = vcmp.gt.f32.partialorder %v661_v35, 0.0  ;;  %vm728_vm8 = vcmp.gt.f32.partialorder %v666_v56, 0.0  ;;  %v768_v4 = vmul.f32 %v2665_v15, %v671_v53  ;;  %v1158_v42 = vld [vmem:[#allocation8] sm:$0xff] }
 0x166   : > { %v755_v16 = vmul.f32 %v2665_v15, %v606_v8  ;;  %v621_v18 = vadd.f32 %v1916_v11, %v2659_v12  ;;  %1989 = vmatmul.mubr.f32.gmra.mxu1 %v2742_v13  ;;  %vm716_vm12 = vcmp.gt.f32.partialorder %v606_v8, 0.0  ;;  %v2757_v29 = vsel %vm717_vm13, %v611_v5, %v756_v10 }
 0x167   : > { %v615_v19 = vpop.f32.mrf.mxu0  ;;  %v1940_v2 = vpop.f32.mrf.mxu1  ;;  %v681_v5 = vadd.f32 %v1934_v33, %v2659_v12  ;;  %v2813_v6 = vsel %vm727_vm7, %v661_v35, %v766_v60  ;;  %v769_v7 = vmul.f32 %v2665_v15, %v676_v63  ;;  %v2818_v10 = vsel %vm728_vm8, %v666_v56, %v767_v62 }
 0x168   : > { %v616_v22 = vadd.f32 %v2659_v12, %v615_v19  ;;  %v2750_v23 = vsel %vm716_vm12, %v606_v8, %v755_v16  ;;  %v758_v24 = vmul.f32 %v2665_v15, %v621_v18  ;;  %vm719_vm15 = vcmp.gt.f32.partialorder %v621_v18, 0.0 }
 0x169   : > { %1991 = vmatprep.mubr.f32.mxu1 %v2750_v23  ;;  %v686_v8 = vadd.f32 %v2659_v12, %v685_v59  ;;  %vm729_vm9 = vcmp.gt.f32.partialorder %v671_v53, 0.0  ;;  %v695_v11 = vpop.f32.mrf.mxu1  ;;  %vm730_vm10 = vcmp.gt.f32.partialorder %v676_v63, 0.0  ;;  %v770_v14 = vmul.f32 %v2665_v15, %v681_v5 }
 0x16a   : > { %v757_v30 = vmul.f32 %v2665_v15, %v616_v22  ;;  %1992 = vmatmul.mubr.f32.gmra.mxu1 %v2757_v29  ;;  %vm718_vm14 = vcmp.gt.f32.partialorder %v616_v22, 0.0  ;;  %v2769_v38 = vsel %vm719_vm15, %v621_v18, %v758_v24  ;;  %v691_v16 = vadd.f32 %v1937_v50, %v2659_v12 }
 0x16b   : > { %v2823_v18 = vsel %vm729_vm9, %v671_v53, %v768_v4  ;;  %v771_v19 = vmul.f32 %v2665_v15, %v686_v8  ;;  %v696_v20 = vadd.f32 %v2659_v12, %v695_v11  ;;  %vm731_vm11 = vcmp.gt.f32.partialorder %v681_v5, 0.0 }
 0x16c   : > { %v2763_v34 = vsel %vm718_vm14, %v616_v22, %v757_v30  ;;  %v2828_v22 = vsel %vm730_vm10, %v676_v63, %v769_v7  ;;  %vm732_vm12 = vcmp.gt.f32.partialorder %v686_v8, 0.0  ;;  %v772_v24 = vmul.f32 %v2665_v15, %v691_v16 }
 0x16d   : > { %1994 = vmatprep.mubr.f32.mxu1 %v2763_v34  ;;  %v701_v26 = vadd.f32 %v1940_v2, %v2659_v12  ;;  %v2833_v21 = vsel %vm731_vm11, %v681_v5, %v770_v14  ;;  %v773_v30 = vmul.f32 %v2665_v15, %v696_v20  ;;  %v2837_v32 = vsel %vm732_vm12, %v686_v8, %v771_v19 }
 0x16e   : > { %1995 = vmatmul.mubr.f32.gmra.mxu1 %v2769_v38  ;;  %vm733_vm13 = vcmp.gt.f32.partialorder %v691_v16, 0.0  ;;  %vm734_vm14 = vcmp.gt.f32.partialorder %v696_v20, 0.0 }
 0x16f   : > { %1997 = vmatprep.mubr.f32.mxu1 %v2775_v41  ;;  %v774_v33 = vmul.f32 %v2665_v15, %v701_v26  ;;  %v2841_v17 = vsel %vm733_vm13, %v691_v16, %v772_v24  ;;  %v2844_v36 = vsel %vm734_vm14, %v696_v20, %v773_v30  ;;  %vm735_vm15 = vcmp.gt.f32.partialorder %v701_v26, 0.0  ;;  %v1159_v15 = vld [vmem:[#allocation8 + $0x8] sm:$0xff] }
 0x170   : > { %2049 = vmatprep.subr.mxu0 %v1159_v15 }
 0x171   : > { %v2847_v12 = vsel %vm735_vm15, %v701_v26, %v774_v33  ;;  %2050 = vmatpush3.msra.mxu0 %v1159_v15 }
 0x172   : > { %1998 = vmatmul.mubr.f32.gmra.mxu1 %v2781_v45  ;;  %2051 = vmatprep.subr.mxu0 %v1158_v42 }
 0x173   : > { %2000 = vmatprep.mubr.f32.mxu1 %v2786_v48  ;;  %2052 = vmatpush3.msra.mxu0 %v1158_v42 }
 0x176   : > { %2001 = vmatmul.mubr.f32.gmra.mxu1 %v2792_v52 }
 0x177   : > { %2003 = vmatprep.mubr.f32.mxu1 %v2797_v57 }
 0x17a   : > { %2004 = vmatmul.mubr.f32.gmra.mxu1 %v2803_v61 }
 0x17b   : > { %2006 = vmatprep.mubr.f32.mxu1 %v2808_v1 }
 0x17e   : > { %2007 = vmatmul.mubr.f32.gmra.mxu1 %v2813_v6 }
 0x17f   : > { %2009 = vmatprep.mubr.f32.mxu1 %v2818_v10 }
 0x182   : > { %2010 = vmatmul.mubr.f32.gmra.mxu1 %v2823_v18 }
 0x183   : > { %2012 = vmatprep.mubr.f32.mxu1 %v2828_v22 }
 0x186   : > { %2013 = vmatmul.mubr.f32.gmra.mxu1 %v2833_v21 }
 0x187   : > { %2015 = vmatprep.mubr.f32.mxu1 %v2837_v32 }
 0x18a   : > { %2016 = vmatmul.mubr.f32.gmra.mxu1 %v2841_v17 }
 0x18b   : > { %2018 = vmatprep.mubr.f32.mxu1 %v2844_v36 }
 0x18e   : > { %2019 = vmatmul.mubr.f32.gmra.mxu1 %v2847_v12 }
 0x212   : > { %v1975_v43 = vpop.f32.mrf.mxu1 }
 0x213   : > { %v902_v47 = vadd.f32 %v1975_v43, %v2853_v25 }
 0x214   : > { %v896_v50 = vpop.f32.mrf.mxu1 }
 0x215   : > { %v897_v51 = vadd.f32 %v2853_v25, %v896_v50  ;;  %v1095_v35 = vmul.f32 %v2859_v44, %v902_v47  ;;  %vm1056_vm0 = vcmp.gt.f32.partialorder %v902_v47, 0.0 }
 0x216   : > { %v1978_v54 = vpop.f32.mrf.mxu1 }
 0x217   : > { %v1094_v56 = vmul.f32 %v2859_v44, %v897_v51  ;;  %v912_v59 = vadd.f32 %v1978_v54, %v2853_v25  ;;  %vm1055_vm1 = vcmp.gt.f32.partialorder %v897_v51, 0.0  ;;  %v1127_v63 = vsel %vm1056_vm0, %v902_v47, %v1095_v35 }
 0x218   : > { %v906_v60 = vpop.f32.mrf.mxu1 }
 0x219   : > { %v907_v53 = vadd.f32 %v2853_v25, %v906_v60  ;;  %v1126_v62 = vsel %vm1055_vm1, %v897_v51, %v1094_v56  ;;  %v1097_v2 = vmul.f32 %v2859_v44, %v912_v59  ;;  %vm1058_vm3 = vcmp.gt.f32.partialorder %v912_v59, 0.0 }
 0x21a   : > { %v1981_v4 = vpop.f32.mrf.mxu1  ;;  %2053 = vmatprep.mubr.f32.mxu0 %v1126_v62 }
 0x21b   : > { %v1096_v5 = vmul.f32 %v2859_v44, %v907_v53  ;;  %v922_v7 = vadd.f32 %v1981_v4, %v2853_v25  ;;  %2054 = vmatmul.mubr.f32.vlgmr.msra.gmra.mxu0 %v1127_v63  ;;  %vm1057_vm2 = vcmp.gt.f32.partialorder %v907_v53, 0.0  ;;  %v1129_v20 = vsel %vm1058_vm3, %v912_v59, %v1097_v2 }
 0x21c   : > { %v916_v8 = vpop.f32.mrf.mxu1 }
 0x21d   : > { %v917_v11 = vadd.f32 %v2853_v25, %v916_v8  ;;  %v1128_v14 = vsel %vm1057_vm2, %v907_v53, %v1096_v5  ;;  %v1099_v16 = vmul.f32 %v2859_v44, %v922_v7  ;;  %vm1060_vm5 = vcmp.gt.f32.partialorder %v922_v7, 0.0 }
 0x21e   : > { %v1984_v19 = vpop.f32.mrf.mxu1  ;;  %2056 = vmatprep.mubr.f32.mxu0 %v1128_v14 }
 0x21f   : > { %v1098_v24 = vmul.f32 %v2859_v44, %v917_v11  ;;  %v932_v26 = vadd.f32 %v1984_v19, %v2853_v25  ;;  %2057 = vmatmul.mubr.f32.gmra.mxu0 %v1129_v20  ;;  %vm1059_vm4 = vcmp.gt.f32.partialorder %v917_v11, 0.0  ;;  %v1131_v42 = vsel %vm1060_vm5, %v922_v7, %v1099_v16 }
 0x220   : > { %v926_v30 = vpop.f32.mrf.mxu1 }
 0x221   : > { %v927_v33 = vadd.f32 %v2853_v25, %v926_v30  ;;  %v1130_v39 = vsel %vm1059_vm4, %v917_v11, %v1098_v24  ;;  %v1101_v31 = vmul.f32 %v2859_v44, %v932_v26  ;;  %vm1062_vm7 = vcmp.gt.f32.partialorder %v932_v26, 0.0 }
 0x222   : > { %v1987_v15 = vpop.f32.mrf.mxu1  ;;  %2059 = vmatprep.mubr.f32.mxu0 %v1130_v39 }
 0x223   : > { %v1100_v43 = vmul.f32 %v2859_v44, %v927_v33  ;;  %v942_v47 = vadd.f32 %v1987_v15, %v2853_v25  ;;  %2060 = vmatmul.mubr.f32.gmra.mxu0 %v1131_v42  ;;  %vm1061_vm6 = vcmp.gt.f32.partialorder %v927_v33, 0.0  ;;  %v1133_v59 = vsel %vm1062_vm7, %v932_v26, %v1101_v31 }
 0x224   : > { %v936_v50 = vpop.f32.mrf.mxu1 }
 0x225   : > { %v937_v51 = vadd.f32 %v2853_v25, %v936_v50  ;;  %v1132_v35 = vsel %vm1061_vm6, %v927_v33, %v1100_v43  ;;  %v1103_v54 = vmul.f32 %v2859_v44, %v942_v47  ;;  %vm1064_vm9 = vcmp.gt.f32.partialorder %v942_v47, 0.0 }
 0x226   : > { %v1990_v56 = vpop.f32.mrf.mxu1  ;;  %2062 = vmatprep.mubr.f32.mxu0 %v1132_v35 }
 0x227   : > { %v1102_v60 = vmul.f32 %v2859_v44, %v937_v51  ;;  %v952_v53 = vadd.f32 %v1990_v56, %v2853_v25  ;;  %2063 = vmatmul.mubr.f32.gmra.mxu0 %v1133_v59  ;;  %vm1063_vm8 = vcmp.gt.f32.partialorder %v937_v51, 0.0  ;;  %v1135_v7 = vsel %vm1064_vm9, %v942_v47, %v1103_v54 }
 0x228   : > { %v946_v62 = vpop.f32.mrf.mxu1 }
 0x229   : > { %v947_v63 = vadd.f32 %v2853_v25, %v946_v62  ;;  %v1134_v2 = vsel %vm1063_vm8, %v937_v51, %v1102_v60  ;;  %v1105_v4 = vmul.f32 %v2859_v44, %v952_v53  ;;  %vm1066_vm11 = vcmp.gt.f32.partialorder %v952_v53, 0.0 }
 0x22a   : > { %v1993_v5 = vpop.f32.mrf.mxu1  ;;  %2065 = vmatprep.mubr.f32.mxu0 %v1134_v2 }
 0x22b   : > { %v1104_v8 = vmul.f32 %v2859_v44, %v947_v63  ;;  %v962_v11 = vadd.f32 %v1993_v5, %v2853_v25  ;;  %2066 = vmatmul.mubr.f32.gmra.mxu0 %v1135_v7  ;;  %vm1065_vm10 = vcmp.gt.f32.partialorder %v947_v63, 0.0  ;;  %v1137_v26 = vsel %vm1066_vm11, %v952_v53, %v1105_v4 }
 0x22c   : > { %v956_v14 = vpop.f32.mrf.mxu1 }
 0x22d   : > { %v957_v16 = vadd.f32 %v2853_v25, %v956_v14  ;;  %v1136_v19 = vsel %vm1065_vm10, %v947_v63, %v1104_v8  ;;  %v1107_v20 = vmul.f32 %v2859_v44, %v962_v11  ;;  %vm1068_vm13 = vcmp.gt.f32.partialorder %v962_v11, 0.0 }
 0x22e   : > { %v1996_v24 = vpop.f32.mrf.mxu1  ;;  %2068 = vmatprep.mubr.f32.mxu0 %v1136_v19 }
 0x22f   : > { %v1106_v30 = vmul.f32 %v2859_v44, %v957_v16  ;;  %v972_v33 = vadd.f32 %v1996_v24, %v2853_v25  ;;  %2069 = vmatmul.mubr.f32.gmra.mxu0 %v1137_v26  ;;  %vm1067_vm12 = vcmp.gt.f32.partialorder %v957_v16, 0.0  ;;  %v1139_v47 = vsel %vm1068_vm13, %v962_v11, %v1107_v20 }
 0x230   : > { %v966_v39 = vpop.f32.mrf.mxu1 }
 0x231   : > { %v967_v31 = vadd.f32 %v2853_v25, %v966_v39  ;;  %v1138_v15 = vsel %vm1067_vm12, %v957_v16, %v1106_v30  ;;  %v1109_v42 = vmul.f32 %v2859_v44, %v972_v33  ;;  %vm1070_vm15 = vcmp.gt.f32.partialorder %v972_v33, 0.0 }
 0x232   : > { %v1999_v43 = vpop.f32.mrf.mxu1  ;;  %2071 = vmatprep.mubr.f32.mxu0 %v1138_v15 }
 0x233   : > { %v1108_v50 = vmul.f32 %v2859_v44, %v967_v31  ;;  %v982_v51 = vadd.f32 %v1999_v43, %v2853_v25  ;;  %2072 = vmatmul.mubr.f32.gmra.mxu0 %v1139_v47  ;;  %vm1069_vm14 = vcmp.gt.f32.partialorder %v967_v31, 0.0  ;;  %v1141_v53 = vsel %vm1070_vm15, %v972_v33, %v1109_v42 }
 0x234   : > { %v976_v35 = vpop.f32.mrf.mxu1 }
 0x235   : > { %v977_v54 = vadd.f32 %v2853_v25, %v976_v35  ;;  %v1140_v56 = vsel %vm1069_vm14, %v967_v31, %v1108_v50  ;;  %v1111_v59 = vmul.f32 %v2859_v44, %v982_v51  ;;  %vm1072_vm1 = vcmp.gt.f32.partialorder %v982_v51, 0.0 }
 0x236   : > { %v2002_v60 = vpop.f32.mrf.mxu1  ;;  %2074 = vmatprep.mubr.f32.mxu0 %v1140_v56 }
 0x237   : > { %v1110_v62 = vmul.f32 %v2859_v44, %v977_v54  ;;  %v992_v63 = vadd.f32 %v2002_v60, %v2853_v25  ;;  %2075 = vmatmul.mubr.f32.gmra.mxu0 %v1141_v53  ;;  %vm1071_vm0 = vcmp.gt.f32.partialorder %v977_v54, 0.0  ;;  %v1143_v11 = vsel %vm1072_vm1, %v982_v51, %v1111_v59 }
 0x238   : > { %v986_v2 = vpop.f32.mrf.mxu1 }
 0x239   : > { %v987_v4 = vadd.f32 %v2853_v25, %v986_v2  ;;  %v1142_v5 = vsel %vm1071_vm0, %v977_v54, %v1110_v62  ;;  %v1113_v7 = vmul.f32 %v2859_v44, %v992_v63  ;;  %vm1074_vm3 = vcmp.gt.f32.partialorder %v992_v63, 0.0 }
 0x23a   : > { %v2005_v8 = vpop.f32.mrf.mxu1  ;;  %2077 = vmatprep.mubr.f32.mxu0 %v1142_v5 }
 0x23b   : > { %v1112_v14 = vmul.f32 %v2859_v44, %v987_v4  ;;  %v1002_v16 = vadd.f32 %v2005_v8, %v2853_v25  ;;  %2078 = vmatmul.mubr.f32.gmra.mxu0 %v1143_v11  ;;  %vm1073_vm2 = vcmp.gt.f32.partialorder %v987_v4, 0.0  ;;  %v1145_v33 = vsel %vm1074_vm3, %v992_v63, %v1113_v7 }
 0x23c   : > { %v996_v19 = vpop.f32.mrf.mxu1 }
 0x23d   : > { %v997_v20 = vadd.f32 %v2853_v25, %v996_v19  ;;  %v1144_v24 = vsel %vm1073_vm2, %v987_v4, %v1112_v14  ;;  %v1115_v26 = vmul.f32 %v2859_v44, %v1002_v16  ;;  %vm1076_vm5 = vcmp.gt.f32.partialorder %v1002_v16, 0.0 }
 0x23e   : > { %v2008_v30 = vpop.f32.mrf.mxu1  ;;  %2080 = vmatprep.mubr.f32.mxu0 %v1144_v24 }
 0x23f   : > { %v1114_v39 = vmul.f32 %v2859_v44, %v997_v20  ;;  %v1012_v31 = vadd.f32 %v2008_v30, %v2853_v25  ;;  %2081 = vmatmul.mubr.f32.gmra.mxu0 %v1145_v33  ;;  %vm1075_vm4 = vcmp.gt.f32.partialorder %v997_v20, 0.0  ;;  %v1147_v51 = vsel %vm1076_vm5, %v1002_v16, %v1115_v26 }
 0x240   : > { %v1006_v15 = vpop.f32.mrf.mxu1 }
 0x241   : > { %v1007_v42 = vadd.f32 %v2853_v25, %v1006_v15  ;;  %v1146_v43 = vsel %vm1075_vm4, %v997_v20, %v1114_v39  ;;  %v1117_v47 = vmul.f32 %v2859_v44, %v1012_v31  ;;  %vm1078_vm7 = vcmp.gt.f32.partialorder %v1012_v31, 0.0 }
 0x242   : > { %v2011_v50 = vpop.f32.mrf.mxu1  ;;  %2083 = vmatprep.mubr.f32.mxu0 %v1146_v43 }
 0x243   : > { %v1116_v35 = vmul.f32 %v2859_v44, %v1007_v42  ;;  %v1022_v54 = vadd.f32 %v2011_v50, %v2853_v25  ;;  %2084 = vmatmul.mubr.f32.gmra.mxu0 %v1147_v51  ;;  %vm1077_vm6 = vcmp.gt.f32.partialorder %v1007_v42, 0.0  ;;  %v1149_v63 = vsel %vm1078_vm7, %v1012_v31, %v1117_v47 }
 0x244   : > { %v1016_v56 = vpop.f32.mrf.mxu1 }
 0x245   : > { %v1017_v59 = vadd.f32 %v2853_v25, %v1016_v56  ;;  %v1148_v60 = vsel %vm1077_vm6, %v1007_v42, %v1116_v35  ;;  %v1119_v53 = vmul.f32 %v2859_v44, %v1022_v54  ;;  %vm1080_vm9 = vcmp.gt.f32.partialorder %v1022_v54, 0.0 }
 0x246   : > { %v2014_v62 = vpop.f32.mrf.mxu1  ;;  %2086 = vmatprep.mubr.f32.mxu0 %v1148_v60  ;;  %v2927_v60 = vld [vmem:[%s3123_s8] ss:$0 sm:$0xff] }
 0x247   : > { %v1118_v2 = vmul.f32 %v2859_v44, %v1017_v59  ;;  %v1032_v4 = vadd.f32 %v2014_v62, %v2853_v25  ;;  %2087 = vmatmul.mubr.f32.gmra.mxu0 %v1149_v63  ;;  %vm1079_vm8 = vcmp.gt.f32.partialorder %v1017_v59, 0.0  ;;  %v1151_v16 = vsel %vm1080_vm9, %v1022_v54, %v1119_v53  ;;  %v2932_v53 = vld [vmem:[%s3124_s9] ss:$0 sm:$0xff] }
 0x248   : > { %v1026_v5 = vpop.f32.mrf.mxu1 }
 0x249   : > { %v1027_v7 = vadd.f32 %v2853_v25, %v1026_v5  ;;  %v1150_v8 = vsel %vm1079_vm8, %v1017_v59, %v1118_v2  ;;  %v1121_v11 = vmul.f32 %v2859_v44, %v1032_v4  ;;  %vm1082_vm11 = vcmp.gt.f32.partialorder %v1032_v4, 0.0 }
 0x24a   : > { %v2017_v14 = vpop.f32.mrf.mxu1  ;;  %2089 = vmatprep.mubr.f32.mxu0 %v1150_v8 }
 0x24b   : > { %v1120_v19 = vmul.f32 %v2859_v44, %v1027_v7  ;;  %v1042_v20 = vadd.f32 %v2017_v14, %v2853_v25  ;;  %2090 = vmatmul.mubr.f32.gmra.mxu0 %v1151_v16  ;;  %vm1081_vm10 = vcmp.gt.f32.partialorder %v1027_v7, 0.0  ;;  %v1153_v31 = vsel %vm1082_vm11, %v1032_v4, %v1121_v11 }
 0x24c   : > { %v1036_v24 = vpop.f32.mrf.mxu1 }
 0x24d   : > { %v1037_v26 = vadd.f32 %v2853_v25, %v1036_v24  ;;  %v1152_v30 = vsel %vm1081_vm10, %v1027_v7, %v1120_v19  ;;  %v1123_v33 = vmul.f32 %v2859_v44, %v1042_v20  ;;  %vm1084_vm13 = vcmp.gt.f32.partialorder %v1042_v20, 0.0 }
 0x24e   : > { %v2020_v39 = vpop.f32.mrf.mxu1  ;;  %2092 = vmatprep.mubr.f32.mxu0 %v1152_v30 }
 0x24f   : > { %v1122_v15 = vmul.f32 %v2859_v44, %v1037_v26  ;;  %v1052_v42 = vadd.f32 %v2020_v39, %v2853_v25  ;;  %2093 = vmatmul.mubr.f32.gmra.mxu0 %v1153_v31  ;;  %vm1083_vm12 = vcmp.gt.f32.partialorder %v1037_v26, 0.0  ;;  %v1155_v35 = vsel %vm1084_vm13, %v1042_v20, %v1123_v33 }
 0x250   : > { %v1046_v43 = vpop.f32.mrf.mxu1 }
 0x251   : > { %v1047_v47 = vadd.f32 %v2853_v25, %v1046_v43  ;;  %v1154_v50 = vsel %vm1083_vm12, %v1037_v26, %v1122_v15  ;;  %v1125_v51 = vmul.f32 %v2859_v44, %v1052_v42  ;;  %vm1086_vm15 = vcmp.gt.f32.partialorder %v1052_v42, 0.0 }
 0x252   : > { %2095 = vmatprep.mubr.f32.mxu0 %v1154_v50 }
 0x253   : > { %v1124_v54 = vmul.f32 %v2859_v44, %v1047_v47  ;;  %2096 = vmatmul.mubr.f32.gmra.mxu0 %v1155_v35  ;;  %vm1085_vm14 = vcmp.gt.f32.partialorder %v1047_v47, 0.0  ;;  %v1157_v59 = vsel %vm1086_vm15, %v1052_v42, %v1125_v51 }
 0x255   : > { %v1156_v56 = vsel %vm1085_vm14, %v1047_v47, %v1124_v54 }
 0x256   : > { %2098 = vmatprep.mubr.f32.mxu0 %v1156_v56 }
 0x257   : > { %2099 = vmatmul.mubr.f32.gmra.mxu0 %v1157_v59 }
 0x2db   : > { %v2055_v25 = vpop.f32.mrf.mxu0 }
 0x2dc   : > { %v1253_v44 = vadd.f32 %v2055_v25, %v2927_v60 }
 0x2dd   : > { %v1247_v62 = vpop.f32.mrf.mxu0 }
 0x2de   : > { %vm1407_vm0 = vcmp.gt.f32.partialorder %v1253_v44, 0.0  ;;  %v1446_v63 = vmul.f32 %v2932_v53, %v1253_v44  ;;  %v1248_v2 = vadd.f32 %v2927_v60, %v1247_v62 }
 0x2df   : > { %v2058_v4 = vpop.f32.mrf.mxu0 }
 0x2e0   : > { %v1478_v5 = vsel %vm1407_vm0, %v1253_v44, %v1446_v63  ;;  %vm1406_vm1 = vcmp.gt.f32.partialorder %v1248_v2, 0.0  ;;  %v1445_v7 = vmul.f32 %v2932_v53, %v1248_v2  ;;  %v1263_v8 = vadd.f32 %v2058_v4, %v2927_v60 }
 0x2e1   : > { %v1510_v11 = vadd.f32 %v1478_v5, %v2680_v28  ;;  %v1257_v14 = vpop.f32.mrf.mxu0 }
 0x2e2   : > { %v1477_v16 = vsel %vm1406_vm1, %v1248_v2, %v1445_v7  ;;  %vm1409_vm2 = vcmp.gt.f32.partialorder %v1263_v8, 0.0  ;;  %v1448_v19 = vmul.f32 %v2932_v53, %v1263_v8  ;;  %v1258_v20 = vadd.f32 %v2927_v60, %v1257_v14 }
 0x2e3   : > { %1542 = vst [vmem:[%s2944_s11 + $0x8] sm:$0xff] %v1510_v11  ;;  %v1509_v24 = vadd.f32 %v1477_v16, %v2678_v27  ;;  %v2061_v26 = vpop.f32.mrf.mxu0 }
 0x2e4   : > { %v1480_v30 = vsel %vm1409_vm2, %v1263_v8, %v1448_v19  ;;  %vm1408_vm3 = vcmp.gt.f32.partialorder %v1258_v20, 0.0  ;;  %v1447_v28 = vmul.f32 %v2932_v53, %v1258_v20  ;;  %v1273_v33 = vadd.f32 %v2061_v26, %v2927_v60 }
 0x2e5   : > { %1541 = vst [vmem:[%s2944_s11] sm:$0xff] %v1509_v24  ;;  %v1512_v39 = vadd.f32 %v1480_v30, %v2696_v40  ;;  %v1267_v31 = vpop.f32.mrf.mxu0 }
 0x2e6   : > { %v1479_v15 = vsel %vm1408_vm3, %v1258_v20, %v1447_v28  ;;  %vm1411_vm4 = vcmp.gt.f32.partialorder %v1273_v33, 0.0  ;;  %v1450_v42 = vmul.f32 %v2932_v53, %v1273_v33  ;;  %v1268_v43 = vadd.f32 %v2927_v60, %v1267_v31 }
 0x2e7   : > { %1544 = vst [vmem:[%s2944_s11 + $0x18] sm:$0xff] %v1512_v39  ;;  %v1511_v27 = vadd.f32 %v1479_v15, %v2692_v37  ;;  %v2064_v47 = vpop.f32.mrf.mxu0 }
 0x2e8   : > { %v1482_v50 = vsel %vm1411_vm4, %v1273_v33, %v1450_v42  ;;  %vm1410_vm5 = vcmp.gt.f32.partialorder %v1268_v43, 0.0  ;;  %v1449_v51 = vmul.f32 %v2932_v53, %v1268_v43  ;;  %v1283_v35 = vadd.f32 %v2064_v47, %v2927_v60 }
 0x2e9   : > { %1543 = vst [vmem:[%s2944_s11 + $0x10] sm:$0xff] %v1511_v27  ;;  %v1514_v40 = vadd.f32 %v1482_v50, %v2708_v49  ;;  %v1277_v54 = vpop.f32.mrf.mxu0 }
 0x2ea   : > { %v1481_v56 = vsel %vm1410_vm5, %v1268_v43, %v1449_v51  ;;  %vm1413_vm6 = vcmp.gt.f32.partialorder %v1283_v35, 0.0  ;;  %v1452_v59 = vmul.f32 %v2932_v53, %v1283_v35  ;;  %v1278_v25 = vadd.f32 %v2927_v60, %v1277_v54 }
 0x2eb   : > { %1546 = vst [vmem:[%s2944_s11 + $0x28] sm:$0xff] %v1514_v40  ;;  %v1513_v37 = vadd.f32 %v1481_v56, %v2704_v46  ;;  %v2067_v44 = vpop.f32.mrf.mxu0 }
 0x2ec   : > { %v1484_v62 = vsel %vm1413_vm6, %v1283_v35, %v1452_v59  ;;  %vm1412_vm7 = vcmp.gt.f32.partialorder %v1278_v25, 0.0  ;;  %v1451_v63 = vmul.f32 %v2932_v53, %v1278_v25  ;;  %v1293_v2 = vadd.f32 %v2067_v44, %v2927_v60 }
 0x2ed   : > { %1545 = vst [vmem:[%s2944_s11 + $0x20] sm:$0xff] %v1513_v37  ;;  %v1516_v49 = vadd.f32 %v1484_v62, %v2720_v58  ;;  %v1287_v4 = vpop.f32.mrf.mxu0 }
 0x2ee   : > { %v1483_v5 = vsel %vm1412_vm7, %v1278_v25, %v1451_v63  ;;  %vm1415_vm8 = vcmp.gt.f32.partialorder %v1293_v2, 0.0  ;;  %v1454_v7 = vmul.f32 %v2932_v53, %v1293_v2  ;;  %v1288_v8 = vadd.f32 %v2927_v60, %v1287_v4 }
 0x2ef   : > { %1548 = vst [vmem:[%s2944_s11 + $0x38] sm:$0xff] %v1516_v49  ;;  %v1515_v46 = vadd.f32 %v1483_v5, %v2716_v55  ;;  %v2070_v11 = vpop.f32.mrf.mxu0 }
 0x2f0   : > { %v1486_v14 = vsel %vm1415_vm8, %v1293_v2, %v1454_v7  ;;  %vm1414_vm9 = vcmp.gt.f32.partialorder %v1288_v8, 0.0  ;;  %v1453_v16 = vmul.f32 %v2932_v53, %v1288_v8  ;;  %v1303_v19 = vadd.f32 %v2070_v11, %v2927_v60 }
 0x2f1   : > { %1547 = vst [vmem:[%s2944_s11 + $0x30] sm:$0xff] %v1515_v46  ;;  %v1518_v58 = vadd.f32 %v1486_v14, %v2730_v3  ;;  %v1297_v20 = vpop.f32.mrf.mxu0 }
 0x2f2   : > { %v1485_v24 = vsel %vm1414_vm9, %v1288_v8, %v1453_v16  ;;  %vm1417_vm10 = vcmp.gt.f32.partialorder %v1303_v19, 0.0  ;;  %v1456_v26 = vmul.f32 %v2932_v53, %v1303_v19  ;;  %v1298_v30 = vadd.f32 %v2927_v60, %v1297_v20 }
 0x2f3   : > { %1550 = vst [vmem:[%s2944_s11 + $0x48] sm:$0xff] %v1518_v58  ;;  %v1517_v55 = vadd.f32 %v1485_v24, %v2726_v0  ;;  %v2073_v28 = vpop.f32.mrf.mxu0 }
 0x2f4   : > { %v1488_v33 = vsel %vm1417_vm10, %v1303_v19, %v1456_v26  ;;  %vm1416_vm11 = vcmp.gt.f32.partialorder %v1298_v30, 0.0  ;;  %v1455_v39 = vmul.f32 %v2932_v53, %v1298_v30  ;;  %v1313_v31 = vadd.f32 %v2073_v28, %v2927_v60 }
 0x2f5   : > { %1549 = vst [vmem:[%s2944_s11 + $0x40] sm:$0xff] %v1517_v55  ;;  %v1520_v3 = vadd.f32 %v1488_v33, %v2742_v13  ;;  %v1307_v15 = vpop.f32.mrf.mxu0 }
 0x2f6   : > { %v1487_v42 = vsel %vm1416_vm11, %v1298_v30, %v1455_v39  ;;  %vm1419_vm12 = vcmp.gt.f32.partialorder %v1313_v31, 0.0  ;;  %v1458_v43 = vmul.f32 %v2932_v53, %v1313_v31  ;;  %v1308_v27 = vadd.f32 %v2927_v60, %v1307_v15 }
 0x2f7   : > { %1552 = vst [vmem:[%s2944_s11 + $0x58] sm:$0xff] %v1520_v3  ;;  %v1519_v0 = vadd.f32 %v1487_v42, %v2738_v9  ;;  %v2076_v47 = vpop.f32.mrf.mxu0 }
 0x2f8   : > { %v1490_v50 = vsel %vm1419_vm12, %v1313_v31, %v1458_v43  ;;  %vm1418_vm13 = vcmp.gt.f32.partialorder %v1308_v27, 0.0  ;;  %v1457_v51 = vmul.f32 %v2932_v53, %v1308_v27  ;;  %v1323_v35 = vadd.f32 %v2076_v47, %v2927_v60 }
 0x2f9   : > { %1551 = vst [vmem:[%s2944_s11 + $0x50] sm:$0xff] %v1519_v0  ;;  %v1522_v13 = vadd.f32 %v1490_v50, %v2757_v29  ;;  %v1317_v40 = vpop.f32.mrf.mxu0 }
 0x2fa   : > { %v1489_v54 = vsel %vm1418_vm13, %v1308_v27, %v1457_v51  ;;  %vm1421_vm14 = vcmp.gt.f32.partialorder %v1323_v35, 0.0  ;;  %v1460_v56 = vmul.f32 %v2932_v53, %v1323_v35  ;;  %v1318_v59 = vadd.f32 %v2927_v60, %v1317_v40 }
 0x2fb   : > { %1554 = vst [vmem:[%s2944_s11 + $0x68] sm:$0xff] %v1522_v13  ;;  %v1521_v9 = vadd.f32 %v1489_v54, %v2750_v23  ;;  %v2079_v25 = vpop.f32.mrf.mxu0 }
 0x2fc   : > { %v1492_v37 = vsel %vm1421_vm14, %v1323_v35, %v1460_v56  ;;  %vm1420_vm15 = vcmp.gt.f32.partialorder %v1318_v59, 0.0  ;;  %v1459_v44 = vmul.f32 %v2932_v53, %v1318_v59  ;;  %v1333_v62 = vadd.f32 %v2079_v25, %v2927_v60 }
 0x2fd   : > { %1553 = vst [vmem:[%s2944_s11 + $0x60] sm:$0xff] %v1521_v9  ;;  %v1524_v29 = vadd.f32 %v1492_v37, %v2769_v38  ;;  %v1327_v63 = vpop.f32.mrf.mxu0 }
 0x2fe   : > { %v1491_v2 = vsel %vm1420_vm15, %v1318_v59, %v1459_v44  ;;  %vm1423_vm0 = vcmp.gt.f32.partialorder %v1333_v62, 0.0  ;;  %v1462_v49 = vmul.f32 %v2932_v53, %v1333_v62  ;;  %v1328_v4 = vadd.f32 %v2927_v60, %v1327_v63 }
 0x2ff   : > { %1556 = vst [vmem:[%s2944_s11 + $0x78] sm:$0xff] %v1524_v29  ;;  %v1523_v23 = vadd.f32 %v1491_v2, %v2763_v34  ;;  %v2082_v5 = vpop.f32.mrf.mxu0 }
 0x300   : > { %v1494_v7 = vsel %vm1423_vm0, %v1333_v62, %v1462_v49  ;;  %vm1422_vm1 = vcmp.gt.f32.partialorder %v1328_v4, 0.0  ;;  %v1461_v8 = vmul.f32 %v2932_v53, %v1328_v4  ;;  %v1343_v46 = vadd.f32 %v2082_v5, %v2927_v60 }
 0x301   : > { %1555 = vst [vmem:[%s2944_s11 + $0x70] sm:$0xff] %v1523_v23  ;;  %v1526_v38 = vadd.f32 %v1494_v7, %v2781_v45  ;;  %v1337_v11 = vpop.f32.mrf.mxu0 }
 0x302   : > { %v1493_v14 = vsel %vm1422_vm1, %v1328_v4, %v1461_v8  ;;  %vm1425_vm2 = vcmp.gt.f32.partialorder %v1343_v46, 0.0  ;;  %v1464_v16 = vmul.f32 %v2932_v53, %v1343_v46  ;;  %v1338_v19 = vadd.f32 %v2927_v60, %v1337_v11 }
 0x303   : > { %1558 = vst [vmem:[%s2944_s11 + $0x88] sm:$0xff] %v1526_v38  ;;  %v1525_v34 = vadd.f32 %v1493_v14, %v2775_v41  ;;  %v2085_v58 = vpop.f32.mrf.mxu0 }
 0x304   : > { %v1496_v20 = vsel %vm1425_vm2, %v1343_v46, %v1464_v16  ;;  %vm1424_vm3 = vcmp.gt.f32.partialorder %v1338_v19, 0.0  ;;  %v1463_v24 = vmul.f32 %v2932_v53, %v1338_v19  ;;  %v1353_v26 = vadd.f32 %v2085_v58, %v2927_v60 }
 0x305   : > { %1557 = vst [vmem:[%s2944_s11 + $0x80] sm:$0xff] %v1525_v34  ;;  %v1528_v45 = vadd.f32 %v1496_v20, %v2792_v52  ;;  %v1347_v30 = vpop.f32.mrf.mxu0 }
 0x306   : > { %v1495_v55 = vsel %vm1424_vm3, %v1338_v19, %v1463_v24  ;;  %vm1427_vm4 = vcmp.gt.f32.partialorder %v1353_v26, 0.0  ;;  %v1466_v28 = vmul.f32 %v2932_v53, %v1353_v26  ;;  %v1348_v33 = vadd.f32 %v2927_v60, %v1347_v30 }
 0x307   : > { %1560 = vst [vmem:[%s2944_s11 + $0x98] sm:$0xff] %v1528_v45  ;;  %v1527_v41 = vadd.f32 %v1495_v55, %v2786_v48  ;;  %v2088_v39 = vpop.f32.mrf.mxu0 }
 0x308   : > { %v1498_v31 = vsel %vm1427_vm4, %v1353_v26, %v1466_v28  ;;  %vm1426_vm5 = vcmp.gt.f32.partialorder %v1348_v33, 0.0  ;;  %v1465_v3 = vmul.f32 %v2932_v53, %v1348_v33  ;;  %v1363_v15 = vadd.f32 %v2088_v39, %v2927_v60 }
 0x309   : > { %1559 = vst [vmem:[%s2944_s11 + $0x90] sm:$0xff] %v1527_v41  ;;  %v1530_v52 = vadd.f32 %v1498_v31, %v2803_v61  ;;  %v1357_v42 = vpop.f32.mrf.mxu0 }
 0x30a   : > { %v1497_v43 = vsel %vm1426_vm5, %v1348_v33, %v1465_v3  ;;  %vm1429_vm6 = vcmp.gt.f32.partialorder %v1363_v15, 0.0  ;;  %v1468_v27 = vmul.f32 %v2932_v53, %v1363_v15  ;;  %v1358_v0 = vadd.f32 %v2927_v60, %v1357_v42 }
 0x30b   : > { %1562 = vst [vmem:[%s2944_s11 + $0xa8] sm:$0xff] %v1530_v52  ;;  %v1529_v48 = vadd.f32 %v1497_v43, %v2797_v57  ;;  %v2091_v47 = vpop.f32.mrf.mxu0 }
 0x30c   : > { %v1500_v50 = vsel %vm1429_vm6, %v1363_v15, %v1468_v27  ;;  %vm1428_vm7 = vcmp.gt.f32.partialorder %v1358_v0, 0.0  ;;  %v1467_v51 = vmul.f32 %v2932_v53, %v1358_v0  ;;  %v1373_v35 = vadd.f32 %v2091_v47, %v2927_v60 }
 0x30d   : > { %1561 = vst [vmem:[%s2944_s11 + $0xa0] sm:$0xff] %v1529_v48  ;;  %v1532_v61 = vadd.f32 %v1500_v50, %v2813_v6  ;;  %v1367_v13 = vpop.f32.mrf.mxu0 }
 0x30e   : > { %v1499_v40 = vsel %vm1428_vm7, %v1358_v0, %v1467_v51  ;;  %vm1431_vm8 = vcmp.gt.f32.partialorder %v1373_v35, 0.0  ;;  %v1470_v54 = vmul.f32 %v2932_v53, %v1373_v35  ;;  %v1368_v56 = vadd.f32 %v2927_v60, %v1367_v13 }
 0x30f   : > { %1564 = vst [vmem:[%s2944_s11 + $0xb8] sm:$0xff] %v1532_v61  ;;  %v1531_v57 = vadd.f32 %v1499_v40, %v2808_v1  ;;  %v2094_v59 = vpop.f32.mrf.mxu0 }
 0x310   : > { %v1502_v9 = vsel %vm1431_vm8, %v1373_v35, %v1470_v54  ;;  %vm1430_vm9 = vcmp.gt.f32.partialorder %v1368_v56, 0.0  ;;  %v1469_v25 = vmul.f32 %v2932_v53, %v1368_v56  ;;  %v1383_v37 = vadd.f32 %v2094_v59, %v2927_v60 }
 0x311   : > { %1563 = vst [vmem:[%s2944_s11 + $0xb0] sm:$0xff] %v1531_v57  ;;  %v1534_v6 = vadd.f32 %v1502_v9, %v2823_v18  ;;  %v1377_v44 = vpop.f32.mrf.mxu0 }
 0x312   : > { %v1501_v62 = vsel %vm1430_vm9, %v1368_v56, %v1469_v25  ;;  %vm1433_vm10 = vcmp.gt.f32.partialorder %v1383_v37, 0.0  ;;  %v1472_v29 = vmul.f32 %v2932_v53, %v1383_v37  ;;  %v1378_v63 = vadd.f32 %v2927_v60, %v1377_v44 }
 0x313   : > { %1566 = vst [vmem:[%s2944_s11 + $0xc8] sm:$0xff] %v1534_v6  ;;  %v1533_v1 = vadd.f32 %v1501_v62, %v2818_v10  ;;  %v2097_v2 = vpop.f32.mrf.mxu0 }
 0x314   : > { %v1504_v49 = vsel %vm1433_vm10, %v1383_v37, %v1472_v29  ;;  %vm1432_vm11 = vcmp.gt.f32.partialorder %v1378_v63, 0.0  ;;  %v1471_v4 = vmul.f32 %v2932_v53, %v1378_v63  ;;  %v1393_v23 = vadd.f32 %v2097_v2, %v2927_v60 }
 0x315   : > { %1565 = vst [vmem:[%s2944_s11 + $0xc0] sm:$0xff] %v1533_v1  ;;  %v1536_v18 = vadd.f32 %v1504_v49, %v2833_v21  ;;  %v1387_v5 = vpop.f32.mrf.mxu0 }
 0x316   : > { %v1503_v7 = vsel %vm1432_vm11, %v1378_v63, %v1471_v4  ;;  %vm1435_vm12 = vcmp.gt.f32.partialorder %v1393_v23, 0.0  ;;  %v1474_v8 = vmul.f32 %v2932_v53, %v1393_v23  ;;  %v1388_v46 = vadd.f32 %v2927_v60, %v1387_v5 }
 0x317   : > { %1568 = vst [vmem:[%s2944_s11 + $0xd8] sm:$0xff] %v1536_v18  ;;  %v1535_v10 = vadd.f32 %v1503_v7, %v2828_v22  ;;  %v2100_v38 = vpop.f32.mrf.mxu0 }
 0x318   : > { %v1506_v11 = vsel %vm1435_vm12, %v1393_v23, %v1474_v8  ;;  %vm1434_vm13 = vcmp.gt.f32.partialorder %v1388_v46, 0.0  ;;  %v1473_v14 = vmul.f32 %v2932_v53, %v1388_v46  ;;  %v1403_v21 = vadd.f32 %v2100_v38, %v2927_v60 }
 0x319   : > { %1567 = vst [vmem:[%s2944_s11 + $0xd0] sm:$0xff] %v1535_v10  ;;  %v1538_v16 = vadd.f32 %v1506_v11, %v2841_v17  ;;  %v1397_v19 = vpop.f32.mrf.mxu0 }
 0x31a   : > { %v1505_v34 = vsel %vm1434_vm13, %v1388_v46, %v1473_v14  ;;  %vm1437_vm14 = vcmp.gt.f32.partialorder %v1403_v21, 0.0  ;;  %v1476_v58 = vmul.f32 %v2932_v53, %v1403_v21  ;;  %v1398_v22 = vadd.f32 %v2927_v60, %v1397_v19 }
 0x31b   : > { %1570 = vst [vmem:[%s2944_s11 + $0xe8] sm:$0xff] %v1538_v16  ;;  %v1537_v20 = vadd.f32 %v1505_v34, %v2837_v32 }
 0x31c   : > { %v1508_v24 = vsel %vm1437_vm14, %v1403_v21, %v1476_v58  ;;  %vm1436_vm15 = vcmp.gt.f32.partialorder %v1398_v22, 0.0  ;;  %v1475_v17 = vmul.f32 %v2932_v53, %v1398_v22 }
 0x31d   : > { %1569 = vst [vmem:[%s2944_s11 + $0xe0] sm:$0xff] %v1537_v20  ;;  %v1540_v26 = vadd.f32 %v1508_v24, %v2847_v12 }
 0x31e   : > { %v1507_v45 = vsel %vm1436_vm15, %v1398_v22, %v1475_v17 }
 0x31f   : > { %1572 = vst [vmem:[%s2944_s11 + $0xf8] sm:$0xff] %v1540_v26  ;;  %v1539_v32 = vadd.f32 %v1507_v45, %v2844_v36 }
 0x321   : > { %1571 = vst [vmem:[%s2944_s11 + $0xf0] sm:$0xff] %v1539_v32 }
 0x322   : > { %2333 = shalt.err (!%p2330_p5)
}
 0x323   : > { %s2334_s23 = scalar_lea.hbm %s3068_s30, 4096  ;;  %s2338_s28 = scalar_lea.hbm %s3125_s10, 16384 }
 0x324   : > { %p2335_p6 = scmp.ne.s32.totalorder %s3068_s30, %s2334_s23  ;;  %p2339_p0 = scmp.lt.s32.totalorder %s3068_s30, %s3125_s10 }
 0x325   : > { %p2340_p10 = scmp.lt.s32.totalorder %s2338_s28, %s2334_s23 }
 0x326   : > { %p2336_p4 = pnand %p2335_p6, %p3153_p1 }
 0x327   : > { %p2341_p3 = por %p2340_p10, %p2339_p0 }
 0x328   : > { %p2337_p8 = pneg %p2336_p4 }
 0x32a   : > { %p2342_p7 = pnand %p2341_p3, %p2337_p8 }
 0x32c   : > { %2345 = shalt.err (!%p2342_p7)
}
 0x32d   : > { %s2401_s19 = smov 128   ;;  %s2402_s21 = smov 8  }
 0x32e   : > { %2147 = dma.vmem_to_hbm [thread:$0]  (%p3153_p1), %s3070_s1, 4096, %s3068_s30, %s1574_s17, %s2401_s19, %s2401_s19, %s2402_s21  }
 0x32f PF: > { %p2174_p11 = scmp.ge.s32.totalorder %s2392_s16, 2  ;;  %s1602_s18 = sand.u32 1, %s2380_s13  }
 0x330   : > { %p3154_p9 = scmp.ne.s32.totalorder %s3136_s20, 0  ;;  %s1603_s12 = scalar_lea.sflag [#allocation4], %s1602_s18 }
 0x332   : > { %p2164_p12 = pnand %p2174_p11, %p3154_p9 }
 0x334   : > { %p2165_p13 = pneg %p2164_p12 }
 0x336   : > { %2375 = dma.done.wait (%p2165_p13), %s1603_s12, 4096  }
 0x337   : > { %2377 = vsyncadd (%p2165_p13), %s1603_s12, 4294963200  ;;  %s3155_s24 = sld [smem:[#allocation15_spill]]  ;;  %p25_p2 = scmp.ge.s32.totalorder %s2546_s26, 6  }
 0x338   : > { %s3156_s13 = smov %s2384_s14  ;;  %s3157_s14 = smov %s2388_s15 }
 0x339   : > { %s3159_s16 = smov %s2546_s26  ;;  %27 = sbr.rel (!%p25_p2) target bundleno = 11 (0xb), region = 117 }
 0x33d   : > { %s3158_s15 = smov %s3155_s24 }
 0x33e   :  { %1608 = vsyncpa [#allocation3], 1 }
 0x33f   :  { %1610 = vsyncpa [#allocation3 + $0x1], 1 }
 0x340   :  { %1611 = vsyncpa [#allocation6], 1 }
 0x341   :  { %1612 = vsyncpa [#allocation9], 1 }
 0x342   :  { %1613 = vsyncpa [#allocation4], 1 }
 0x343   :  { %1615 = vsyncpa [#allocation4 + $0x1], 1 }

</bundles_post_ra>
